<compile_context>
chip_gen: v6e
topology: v6e:2x2x1
jax: 0.10.0
libtpu: 0.0.40
codegen_flags: <defaults>
</compile_context>

<pallas_src>
import jax
import jax.numpy as jnp
from jax.experimental import pallas as pl
from jax.experimental.pallas import tpu as pltpu


def _round_up(x, m):
    return (x + m - 1) // m * m


# ----------------------------------------------------------------------------
# Fused decoder kernel: all GRU layers + final linear in one pallas_call.
# ----------------------------------------------------------------------------
def make_decoder_kernel(num_layers, T, Bp, Ep, Hp, Vp):
    f32 = jnp.float32
    mxu_dt = jnp.bfloat16        # MXU input dtype; accumulation is f32

    def kernel(*refs):
        it = iter(refs)
        x_ref = next(it)          # (T*Bp, Ep)  bf16 time-major flattened embeddings
        ctx_ref = next(it)        # (Bp, Hp)    bf16 encoder context = state[-1]
        layer_refs = []
        for l in range(num_layers):
            n = 5 if l == 0 else 4
            layer_refs.append(tuple(next(it) for _ in range(n)))
        fc_w_ref = next(it)       # (Hp, Vp) bf16
        fc_b_ref = next(it)       # (1, Vp)  f32
        out_ref = next(it)        # (T*Bp, Vp) f32

        seq = None                # (T*Bp, Hp) f32, register-resident layer output
        for lidx in range(num_layers):
            if lidx == 0:
                w_x, w_ctx, w_hh_ref, b_i_ref, b_hn_ref = layer_refs[0]
                # Hoisted input projection: ONE (T*Bp, Ep) @ (Ep, 3Hp) MXU matmul.
                gx = jnp.dot(x_ref[...], w_x[...], preferred_element_type=f32)
                # Time-invariant context term: projected once and folded into gx
                # for ALL steps in a single slab add (off the serial chain),
                # instead of a per-step broadcast + add.
                cb = (jnp.dot(ctx_ref[...], w_ctx[...], preferred_element_type=f32)
                      + b_i_ref[...])                                   # (Bp, 3Hp)
                gx = gx + jnp.concatenate([cb] * T, axis=0)             # (T*Bp, 3Hp)
            else:
                w_x, w_hh_ref, b_i_ref, b_hn_ref = layer_refs[lidx]
                gx = (jnp.dot(seq.astype(mxu_dt), w_x[...],
                              preferred_element_type=f32)
                      + b_i_ref[...])                                   # (T*Bp, 3Hp)

            w_hh = w_hh_ref[...]                                        # (Hp, 3Hp) bf16
            b_hn = jnp.broadcast_to(b_hn_ref[...], (Bp, Hp))            # broadcast once

            # Sequential recurrence: hidden state and per-step outputs live in
            # registers (no per-step VMEM stores).  T is small and static, so
            # the loop is fully unrolled and every slice is a static,
            # 128-lane-aligned slice of a register slab.
            # TODO(synk): for long T / large B*Hp switch to lax.fori_loop with a
            # bf16 VMEM scratch for gx/seq to bound vreg live ranges.
            # TODO(synk): W_hh is reused for all T steps; explicit
            # pltpu.matmul_push_rhs / matmul_acc_lhs would avoid re-pushing the
            # RHS on every step (v5e/v6e MRF latency).
            h = jnp.zeros((Bp, Hp), f32)
            hs = []
            for t in range(T):
                g = gx[t * Bp:(t + 1) * Bp, :]                          # (Bp, 3Hp)
                gh = jnp.dot(h.astype(mxu_dt), w_hh,
                             preferred_element_type=f32)                # (Bp, 3Hp)
                r = jax.nn.sigmoid(g[:, :Hp] + gh[:, :Hp])
                z = jax.nn.sigmoid(g[:, Hp:2 * Hp] + gh[:, Hp:2 * Hp])
                n = jnp.tanh(g[:, 2 * Hp:] + r * (gh[:, 2 * Hp:] + b_hn))
                h = (1.0 - z) * n + z * h
                hs.append(h)
            seq = jnp.concatenate(hs, axis=0)                           # (T*Bp, Hp)

        # Final linear over the whole (T*Bp, Hp) slab in one matmul; Vp is a
        # multiple of 128 so the output store is lane-dense.
        # TODO(synk): for real vocab sizes, tile the final linear over V with its
        # own grid axis (streams fc_w behind the recurrence, fits v7x's 64 MiB
        # VMEM, and lets the second v7x TensorCore share the matmul work).
        out_ref[...] = (jnp.dot(seq.astype(mxu_dt), fc_w_ref[...],
                                preferred_element_type=f32)
                        + fc_b_ref[...])

    return kernel


def _full_spec(shape):
    nd = len(shape)
    return pl.BlockSpec(tuple(shape), lambda i, nd=nd: (0,) * nd)


def seq2seq_deco_forward(kparams, x_tokens, state):
    """Pallas port of seq2seqDeco.forward(x, state) -> vocab logits (B, T, V)."""
    V, Ep = kparams["embedding"].shape          # embedding table is column-padded
    Hp, Vp = kparams["fc_w"].shape
    L = len(kparams["gru"])
    B, T = x_tokens.shape
    H = state.shape[-1]
    Bp = _round_up(max(B, 1), 8)                # sublane-dense batch

    # TODO(synk): nn.Embedding index gather stays as plain-JAX glue (jnp.take);
    # only the GRU recurrence / matmul hot path runs inside Pallas.
    emb = jnp.take(kparams["embedding"], x_tokens, axis=0)      # (B, T, Ep) f32
    x = jnp.transpose(emb, (1, 0, 2))                            # (T, B, Ep) time-major
    x = jnp.pad(x, ((0, 0), (0, Bp - B), (0, 0)))                # (T, Bp, Ep)
    x2d = x.reshape(T * Bp, Ep).astype(jnp.bfloat16)             # bf16 slab -> half DMA

    ctx = state[-1].astype(jnp.float32)                          # (B, H)
    ctx = jnp.pad(ctx, ((0, Bp - B), (0, Hp - H))).astype(jnp.bfloat16)  # (Bp, Hp)

    args = [x2d, ctx]
    in_specs = [_full_spec(x2d.shape), _full_spec(ctx.shape)]
    for layer in kparams["gru"]:
        for arr in layer:
            args.append(arr)
            in_specs.append(_full_spec(arr.shape))
    args += [kparams["fc_w"], kparams["fc_b"]]
    in_specs += [_full_spec(kparams["fc_w"].shape), _full_spec(kparams["fc_b"].shape)]

    kernel = make_decoder_kernel(L, T, Bp, Ep, Hp, Vp)

    out2d = pl.pallas_call(
        kernel,
        out_shape=jax.ShapeDtypeStruct((T * Bp, Vp), jnp.float32),
        grid=(1,),                       # single invocation: no per-timestep launches
        in_specs=in_specs,
        out_specs=_full_spec((T * Bp, Vp)),
        compiler_params=pltpu.CompilerParams(
            dimension_semantics=("arbitrary",)),
    )(*args)

    out = out2d.reshape(T, Bp, Vp)[:, :B, :V]                    # strip padding
    # PyTorch permutes (T,B,H)->(B,T,H) before the linear; the linear is
    # pointwise in time, so applying it first and permuting after is identical.
    return jnp.transpose(out, (1, 0, 2))                         # (B, T, V)


# ----------------------------------------------------------------------------
# Parameters: f32 PyTorch-layout reference params + padded/stacked kernel params
# ----------------------------------------------------------------------------
def init_reference_params(key, vocab_size, embedding_size, hidden_size, hidden_layers):
    """f32 parameters in PyTorch layout (used by the pure-JAX reference)."""
    E, H, V = embedding_size, hidden_size, vocab_size
    assert E == H, ("nn.Linear(embedding_size, vocab_size) applied to the GRU "
                    "hidden output requires embedding_size == hidden_size")
    scale = 1.0 / (H ** 0.5)

    key, k_emb = jax.random.split(key)
    embedding = jax.random.normal(k_emb, (V, E), jnp.float32)

    layers = []
    for layer in range(hidden_layers):
        in_size = (E + H) if layer == 0 else H
        key, kw, ku, kbi, kbh = jax.random.split(key, 5)
        w_ih = jax.random.uniform(kw, (3 * H, in_size), jnp.float32, -scale, scale)
        w_hh = jax.random.uniform(ku, (3 * H, H), jnp.float32, -scale, scale)
        b_ih = jax.random.uniform(kbi, (3 * H,), jnp.float32, -scale, scale)
        b_hh = jax.random.uniform(kbh, (3 * H,), jnp.float32, -scale, scale)
        layers.append((w_ih, w_hh, b_ih, b_hh))

    key, kfw, kfb = jax.random.split(key, 3)
    fscale = 1.0 / (E ** 0.5)
    fc_w = jax.random.uniform(kfw, (V, E), jnp.float32, -fscale, fscale)
    fc_b = jax.random.uniform(kfb, (V,), jnp.float32, -fscale, fscale)
    return {"embedding": embedding, "gru": layers, "fc_w": fc_w, "fc_b": fc_b}


def prepare_kernel_params(ref_params):
    """Pad / transpose / gate-stack / bias-combine / bf16-cast for the kernel.

    Gates are stacked along the output dim as [r | z | n] with each gate padded
    to Hp = round_up(H, 128) lanes so in-kernel gate slices are lane-aligned.
    Zero padding keeps the padded hidden lanes exactly zero through the GRU
    recurrence, so results are unchanged.
    """
    emb = ref_params["embedding"]
    V, E = emb.shape
    H = ref_params["gru"][0][1].shape[1]
    Ep, Hp, Vp = _round_up(E, 128), _round_up(H, 128), _round_up(V, 128)

    def pack_w(w_t, in_dim, in_p):
        # w_t: (in_dim, 3H) with gates [r|z|n] -> (in_p, 3Hp), per-gate lane pad.
        blocks = []
        for g in range(3):
            blk = w_t[:, g * H:(g + 1) * H]
            blocks.append(jnp.pad(blk, ((0, in_p - in_dim), (0, Hp - H))))
        return jnp.concatenate(blocks, axis=1).astype(jnp.bfloat16)

    def pack_b(b):
        # (3H,) -> (1, 3Hp) with per-gate lane padding.
        parts = [jnp.pad(b[g * H:(g + 1) * H], (0, Hp - H)) for g in range(3)]
        return jnp.concatenate(parts)[None, :].astype(jnp.float32)

    layers = []
    for lidx, (w_ih, w_hh, b_ih, b_hh) in enumerate(ref_params["gru"]):
        w_ih_t = w_ih.T                        # (in, 3H)
        w_hh_t = w_hh.T                        # (H, 3H)
        # Pre-combine b_ih + b_hh for r/z; keep b_hn separate (r multiplies it).
        b_comb = jnp.concatenate([b_ih[:2 * H] + b_hh[:2 * H], b_ih[2 * H:]])
        b_i = pack_b(b_comb)                                        # (1, 3Hp)
        b_hn = jnp.pad(b_hh[2 * H:], (0, Hp - H))[None, :].astype(jnp.float32)
        w_hh_p = pack_w(w_hh_t, H, Hp)                              # (Hp, 3Hp)
        if lidx == 0:
            # Split W_ih into the x-part and the (time-invariant) context part.
            w_x = pack_w(w_ih_t[:E], E, Ep)                         # (Ep, 3Hp)
            w_ctx = pack_w(w_ih_t[E:], H, Hp)                       # (Hp, 3Hp)
            layers.append((w_x, w_ctx, w_hh_p, b_i, b_hn))
        else:
            w_x = pack_w(w_ih_t, H, Hp)                             # (Hp, 3Hp)
            layers.append((w_x, w_hh_p, b_i, b_hn))

    fc_w = jnp.pad(ref_params["fc_w"].T, ((0, Hp - H), (0, Vp - V))).astype(jnp.bfloat16)
    fc_b = jnp.pad(ref_params["fc_b"], (0, Vp - V))[None, :].astype(jnp.float32)
    embedding = jnp.pad(emb, ((0, 0), (0, Ep - E)))   # f32, column-padded for gather

    return {"embedding": embedding, "gru": layers, "fc_w": fc_w, "fc_b": fc_b}


# ----------------------------------------------------------------------------
# Pure-f32 JAX reference (mirrors the PyTorch forward exactly)
# ----------------------------------------------------------------------------
def reference_forward(ref_params, x_tokens, state):
    emb = jnp.take(ref_params["embedding"], x_tokens, axis=0)   # (B, T, E)
    x = jnp.transpose(emb, (1, 0, 2))                           # (T, B, E)
    T, B, _ = x.shape
    ctx = state[-1]                                             # (B, H)
    H = ctx.shape[-1]
    seq = jnp.concatenate(
        [x, jnp.broadcast_to(ctx[None], (T, B, H))], axis=-1)   # (T, B, E+H)
    for (w_ih, w_hh, b_ih, b_hh) in ref_params["gru"]:
        h = jnp.zeros((B, H), jnp.float32)   # PyTorch: gru called without h0
        outs = []
        for t in range(T):
            gi = seq[t] @ w_ih.T + b_ih
            gh = h @ w_hh.T + b_hh
            r = jax.nn.sigmoid(gi[:, :H] + gh[:, :H])
            z = jax.nn.sigmoid(gi[:, H:2 * H] + gh[:, H:2 * H])
            n = jnp.tanh(gi[:, 2 * H:] + r * gh[:, 2 * H:])
            h = (1.0 - z) * n + z * h
            outs.append(h)
        seq = jnp.stack(outs, axis=0)                           # (T, B, H)
    out = seq @ ref_params["fc_w"].T + ref_params["fc_b"]       # (T, B, V)
    return jnp.transpose(out, (1, 0, 2))                        # (B, T, V)


# ----------------------------------------------------------------------------
if __name__ == "__main__":
    vocab_size = 16
    embedding_size = 32
    hidden_size = 32        # must equal embedding_size (see init assert)
    hidden_layers = 2
    batch = 2
    seq_len = 8

    key = jax.random.PRNGKey(0)
    key, kp, kx, ks = jax.random.split(key, 4)
    ref_params = init_reference_params(kp, vocab_size, embedding_size,
                                       hidden_size, hidden_layers)
    kparams = prepare_kernel_params(ref_params)

    x_tokens = jax.random.randint(kx, (batch, seq_len), 0, vocab_size, jnp.int32)
    # Encoder state handed to the decoder (init_state returns enco_opts[1]):
    # shape (num_layers, batch, hidden_size); only state[-1] is consumed.
    state = jax.random.normal(ks, (hidden_layers, batch, hidden_size), jnp.float32)

    fwd = jax.jit(seq2seq_deco_forward)
    out = jax.block_until_ready(fwd(kparams, x_tokens, state))
    assert out.shape == (batch, seq_len, vocab_size), out.shape

    # Correctness vs. the pure-f32 JAX re-implementation of the PyTorch forward.
    # bf16 MXU weights -> not bit-identical; generous tolerance (observed ~1e-2).
    ref = reference_forward(ref_params, x_tokens, state)
    assert bool(jnp.isfinite(out).all())
    err = float(jnp.max(jnp.abs(out - ref)))
    assert err < 0.1, f"max abs err {err}"
    print("KERNEL_OK")
</pallas_src>

<mosaic_0001>
module attributes {stable_mosaic.version = 11 : i64} {
  func.func @kernel(%arg0: i32, %arg1: memref<64x128xbf16, #tpu.memory_space<vmem>>, %arg2: memref<8x128xbf16, #tpu.memory_space<vmem>>, %arg3: memref<128x384xbf16, #tpu.memory_space<vmem>>, %arg4: memref<128x384xbf16, #tpu.memory_space<vmem>>, %arg5: memref<128x384xbf16, #tpu.memory_space<vmem>>, %arg6: memref<1x384xf32, #tpu.memory_space<vmem>>, %arg7: memref<1x128xf32, #tpu.memory_space<vmem>>, %arg8: memref<128x384xbf16, #tpu.memory_space<vmem>>, %arg9: memref<128x384xbf16, #tpu.memory_space<vmem>>, %arg10: memref<1x384xf32, #tpu.memory_space<vmem>>, %arg11: memref<1x128xf32, #tpu.memory_space<vmem>>, %arg12: memref<128x128xbf16, #tpu.memory_space<vmem>>, %arg13: memref<1x128xf32, #tpu.memory_space<vmem>>, %arg14: memref<64x128xf32, #tpu.memory_space<vmem>>) attributes {dimension_semantics = [#tpu.dimension_semantics<arbitrary>], iteration_bounds = array<i64: 1>, scalar_prefetch = 0 : i64, scratch_operands = 0 : i64, tpu.core_type = #tpu.core_type<tc>, window_params = [{pipeline_mode = #tpu.pipeline_mode<synchronous>, transform_indices = @transform_0, window_bounds = array<i64: 64, 128>}, {pipeline_mode = #tpu.pipeline_mode<synchronous>, transform_indices = @transform_1, window_bounds = array<i64: 8, 128>}, {pipeline_mode = #tpu.pipeline_mode<synchronous>, transform_indices = @transform_2, window_bounds = array<i64: 128, 384>}, {pipeline_mode = #tpu.pipeline_mode<synchronous>, transform_indices = @transform_3, window_bounds = array<i64: 128, 384>}, {pipeline_mode = #tpu.pipeline_mode<synchronous>, transform_indices = @transform_4, window_bounds = array<i64: 128, 384>}, {pipeline_mode = #tpu.pipeline_mode<synchronous>, transform_indices = @transform_5, window_bounds = array<i64: 1, 384>}, {pipeline_mode = #tpu.pipeline_mode<synchronous>, transform_indices = @transform_6, window_bounds = array<i64: 1, 128>}, {pipeline_mode = #tpu.pipeline_mode<synchronous>, transform_indices = @transform_7, window_bounds = array<i64: 128, 384>}, {pipeline_mode = #tpu.pipeline_mode<synchronous>, transform_indices = @transform_8, window_bounds = array<i64: 128, 384>}, {pipeline_mode = #tpu.pipeline_mode<synchronous>, transform_indices = @transform_9, window_bounds = array<i64: 1, 384>}, {pipeline_mode = #tpu.pipeline_mode<synchronous>, transform_indices = @transform_10, window_bounds = array<i64: 1, 128>}, {pipeline_mode = #tpu.pipeline_mode<synchronous>, transform_indices = @transform_11, window_bounds = array<i64: 128, 128>}, {pipeline_mode = #tpu.pipeline_mode<synchronous>, transform_indices = @transform_12, window_bounds = array<i64: 1, 128>}, {pipeline_mode = #tpu.pipeline_mode<synchronous>, transform_indices = @transform_13, window_bounds = array<i64: 64, 128>}]} {
    %c0 = arith.constant 0 : index
    %c0_0 = arith.constant 0 : index
    %0 = vector.load %arg1[%c0, %c0_0] : memref<64x128xbf16, #tpu.memory_space<vmem>>, vector<64x128xbf16>
    %c0_1 = arith.constant 0 : index
    %c0_2 = arith.constant 0 : index
    %1 = vector.load %arg3[%c0_1, %c0_2] : memref<128x384xbf16, #tpu.memory_space<vmem>>, vector<128x384xbf16>
    %cst = arith.constant dense<0.000000e+00> : vector<64x384xf32>
    %2 = tpu.matmul %0, %1, %cst {dimension_numbers = #tpu.dot_dimension_numbers<[1], [0], [0], [1], [0, 0, 1, 1], [], []>} : vector<64x128xbf16>, vector<128x384xbf16>, vector<64x384xf32> -> vector<64x384xf32>
    %c0_3 = arith.constant 0 : index
    %c0_4 = arith.constant 0 : index
    %3 = vector.load %arg2[%c0_3, %c0_4] : memref<8x128xbf16, #tpu.memory_space<vmem>>, vector<8x128xbf16>
    %c0_5 = arith.constant 0 : index
    %c0_6 = arith.constant 0 : index
    %4 = vector.load %arg4[%c0_5, %c0_6] : memref<128x384xbf16, #tpu.memory_space<vmem>>, vector<128x384xbf16>
    %cst_7 = arith.constant dense<0.000000e+00> : vector<8x384xf32>
    %5 = tpu.matmul %3, %4, %cst_7 {dimension_numbers = #tpu.dot_dimension_numbers<[1], [0], [0], [1], [0, 0, 1, 1], [], []>} : vector<8x128xbf16>, vector<128x384xbf16>, vector<8x384xf32> -> vector<8x384xf32>
    %c0_8 = arith.constant 0 : index
    %c0_9 = arith.constant 0 : index
    %6 = vector.load %arg6[%c0_8, %c0_9] : memref<1x384xf32, #tpu.memory_space<vmem>>, vector<1x384xf32>
    %7 = vector.broadcast %6 : vector<1x384xf32> to vector<8x384xf32>
    %8 = arith.addf %5, %7 : vector<8x384xf32>
    %9 = tpu.concatenate %8, %8, %8, %8, %8, %8, %8, %8 in 0 : vector<8x384xf32>, vector<8x384xf32>, vector<8x384xf32>, vector<8x384xf32>, vector<8x384xf32>, vector<8x384xf32>, vector<8x384xf32>, vector<8x384xf32> -> vector<64x384xf32>
    %10 = arith.addf %2, %9 : vector<64x384xf32>
    %c0_10 = arith.constant 0 : index
    %c0_11 = arith.constant 0 : index
    %11 = vector.load %arg5[%c0_10, %c0_11] : memref<128x384xbf16, #tpu.memory_space<vmem>>, vector<128x384xbf16>
    %c0_12 = arith.constant 0 : index
    %c0_13 = arith.constant 0 : index
    %12 = vector.load %arg7[%c0_12, %c0_13] : memref<1x128xf32, #tpu.memory_space<vmem>>, vector<1x128xf32>
    %13 = vector.shape_cast %12 : vector<1x128xf32> to vector<1x128xf32>
    %14 = vector.broadcast %13 : vector<1x128xf32> to vector<8x128xf32>
    %cst_14 = arith.constant 0.000000e+00 : f32
    %15 = vector.broadcast %cst_14 : f32 to vector<8x128xf32>
    %16 = vector.extract_strided_slice %10 {offsets = [0, 0], sizes = [8, 384], strides = [1, 1]} : vector<64x384xf32> to vector<8x384xf32>
    %17 = arith.truncf %15 : vector<8x128xf32> to vector<8x128xbf16>
    %cst_15 = arith.constant dense<0.000000e+00> : vector<8x384xf32>
    %18 = tpu.matmul %17, %11, %cst_15 {dimension_numbers = #tpu.dot_dimension_numbers<[1], [0], [0], [1], [0, 0, 1, 1], [], []>} : vector<8x128xbf16>, vector<128x384xbf16>, vector<8x384xf32> -> vector<8x384xf32>
    %19 = vector.extract_strided_slice %16 {offsets = [0, 0], sizes = [8, 128], strides = [1, 1]} : vector<8x384xf32> to vector<8x128xf32>
    %20 = vector.extract_strided_slice %18 {offsets = [0, 0], sizes = [8, 128], strides = [1, 1]} : vector<8x384xf32> to vector<8x128xf32>
    %21 = arith.addf %19, %20 : vector<8x128xf32>
    %22 = arith.negf %21 : vector<8x128xf32>
    %23 = math.exp %22 : vector<8x128xf32>
    %cst_16 = arith.constant 1.000000e+00 : f32
    %24 = vector.broadcast %cst_16 : f32 to vector<8x128xf32>
    %25 = arith.addf %24, %23 : vector<8x128xf32>
    %26 = arith.divf %24, %25 : vector<8x128xf32>
    %27 = vector.extract_strided_slice %16 {offsets = [0, 128], sizes = [8, 128], strides = [1, 1]} : vector<8x384xf32> to vector<8x128xf32>
    %28 = vector.extract_strided_slice %18 {offsets = [0, 128], sizes = [8, 128], strides = [1, 1]} : vector<8x384xf32> to vector<8x128xf32>
    %29 = arith.addf %27, %28 : vector<8x128xf32>
    %30 = arith.negf %29 : vector<8x128xf32>
    %31 = math.exp %30 : vector<8x128xf32>
    %cst_17 = arith.constant 1.000000e+00 : f32
    %32 = vector.broadcast %cst_17 : f32 to vector<8x128xf32>
    %33 = arith.addf %32, %31 : vector<8x128xf32>
    %34 = arith.divf %32, %33 : vector<8x128xf32>
    %35 = vector.extract_strided_slice %16 {offsets = [0, 256], sizes = [8, 128], strides = [1, 1]} : vector<8x384xf32> to vector<8x128xf32>
    %36 = vector.extract_strided_slice %18 {offsets = [0, 256], sizes = [8, 128], strides = [1, 1]} : vector<8x384xf32> to vector<8x128xf32>
    %37 = arith.addf %36, %14 : vector<8x128xf32>
    %38 = arith.mulf %26, %37 : vector<8x128xf32>
    %39 = arith.addf %35, %38 : vector<8x128xf32>
    %40 = math.tanh %39 : vector<8x128xf32>
    %cst_18 = arith.constant 1.000000e+00 : f32
    %41 = vector.broadcast %cst_18 : f32 to vector<8x128xf32>
    %42 = arith.subf %41, %34 : vector<8x128xf32>
    %43 = arith.mulf %42, %40 : vector<8x128xf32>
    %44 = arith.mulf %34, %15 : vector<8x128xf32>
    %45 = arith.addf %43, %44 : vector<8x128xf32>
    %46 = vector.extract_strided_slice %10 {offsets = [8, 0], sizes = [8, 384], strides = [1, 1]} : vector<64x384xf32> to vector<8x384xf32>
    %47 = arith.truncf %45 : vector<8x128xf32> to vector<8x128xbf16>
    %cst_19 = arith.constant dense<0.000000e+00> : vector<8x384xf32>
    %48 = tpu.matmul %47, %11, %cst_19 {dimension_numbers = #tpu.dot_dimension_numbers<[1], [0], [0], [1], [0, 0, 1, 1], [], []>} : vector<8x128xbf16>, vector<128x384xbf16>, vector<8x384xf32> -> vector<8x384xf32>
    %49 = vector.extract_strided_slice %46 {offsets = [0, 0], sizes = [8, 128], strides = [1, 1]} : vector<8x384xf32> to vector<8x128xf32>
    %50 = vector.extract_strided_slice %48 {offsets = [0, 0], sizes = [8, 128], strides = [1, 1]} : vector<8x384xf32> to vector<8x128xf32>
    %51 = arith.addf %49, %50 : vector<8x128xf32>
    %52 = arith.negf %51 : vector<8x128xf32>
    %53 = math.exp %52 : vector<8x128xf32>
    %cst_20 = arith.constant 1.000000e+00 : f32
    %54 = vector.broadcast %cst_20 : f32 to vector<8x128xf32>
    %55 = arith.addf %54, %53 : vector<8x128xf32>
    %56 = arith.divf %54, %55 : vector<8x128xf32>
    %57 = vector.extract_strided_slice %46 {offsets = [0, 128], sizes = [8, 128], strides = [1, 1]} : vector<8x384xf32> to vector<8x128xf32>
    %58 = vector.extract_strided_slice %48 {offsets = [0, 128], sizes = [8, 128], strides = [1, 1]} : vector<8x384xf32> to vector<8x128xf32>
    %59 = arith.addf %57, %58 : vector<8x128xf32>
    %60 = arith.negf %59 : vector<8x128xf32>
    %61 = math.exp %60 : vector<8x128xf32>
    %cst_21 = arith.constant 1.000000e+00 : f32
    %62 = vector.broadcast %cst_21 : f32 to vector<8x128xf32>
    %63 = arith.addf %62, %61 : vector<8x128xf32>
    %64 = arith.divf %62, %63 : vector<8x128xf32>
    %65 = vector.extract_strided_slice %46 {offsets = [0, 256], sizes = [8, 128], strides = [1, 1]} : vector<8x384xf32> to vector<8x128xf32>
    %66 = vector.extract_strided_slice %48 {offsets = [0, 256], sizes = [8, 128], strides = [1, 1]} : vector<8x384xf32> to vector<8x128xf32>
    %67 = arith.addf %66, %14 : vector<8x128xf32>
    %68 = arith.mulf %56, %67 : vector<8x128xf32>
    %69 = arith.addf %65, %68 : vector<8x128xf32>
    %70 = math.tanh %69 : vector<8x128xf32>
    %cst_22 = arith.constant 1.000000e+00 : f32
    %71 = vector.broadcast %cst_22 : f32 to vector<8x128xf32>
    %72 = arith.subf %71, %64 : vector<8x128xf32>
    %73 = arith.mulf %72, %70 : vector<8x128xf32>
    %74 = arith.mulf %64, %45 : vector<8x128xf32>
    %75 = arith.addf %73, %74 : vector<8x128xf32>
    %76 = vector.extract_strided_slice %10 {offsets = [16, 0], sizes = [8, 384], strides = [1, 1]} : vector<64x384xf32> to vector<8x384xf32>
    %77 = arith.truncf %75 : vector<8x128xf32> to vector<8x128xbf16>
    %cst_23 = arith.constant dense<0.000000e+00> : vector<8x384xf32>
    %78 = tpu.matmul %77, %11, %cst_23 {dimension_numbers = #tpu.dot_dimension_numbers<[1], [0], [0], [1], [0, 0, 1, 1], [], []>} : vector<8x128xbf16>, vector<128x384xbf16>, vector<8x384xf32> -> vector<8x384xf32>
    %79 = vector.extract_strided_slice %76 {offsets = [0, 0], sizes = [8, 128], strides = [1, 1]} : vector<8x384xf32> to vector<8x128xf32>
    %80 = vector.extract_strided_slice %78 {offsets = [0, 0], sizes = [8, 128], strides = [1, 1]} : vector<8x384xf32> to vector<8x128xf32>
    %81 = arith.addf %79, %80 : vector<8x128xf32>
    %82 = arith.negf %81 : vector<8x128xf32>
    %83 = math.exp %82 : vector<8x128xf32>
    %cst_24 = arith.constant 1.000000e+00 : f32
    %84 = vector.broadcast %cst_24 : f32 to vector<8x128xf32>
    %85 = arith.addf %84, %83 : vector<8x128xf32>
    %86 = arith.divf %84, %85 : vector<8x128xf32>
    %87 = vector.extract_strided_slice %76 {offsets = [0, 128], sizes = [8, 128], strides = [1, 1]} : vector<8x384xf32> to vector<8x128xf32>
    %88 = vector.extract_strided_slice %78 {offsets = [0, 128], sizes = [8, 128], strides = [1, 1]} : vector<8x384xf32> to vector<8x128xf32>
    %89 = arith.addf %87, %88 : vector<8x128xf32>
    %90 = arith.negf %89 : vector<8x128xf32>
    %91 = math.exp %90 : vector<8x128xf32>
    %cst_25 = arith.constant 1.000000e+00 : f32
    %92 = vector.broadcast %cst_25 : f32 to vector<8x128xf32>
    %93 = arith.addf %92, %91 : vector<8x128xf32>
    %94 = arith.divf %92, %93 : vector<8x128xf32>
    %95 = vector.extract_strided_slice %76 {offsets = [0, 256], sizes = [8, 128], strides = [1, 1]} : vector<8x384xf32> to vector<8x128xf32>
    %96 = vector.extract_strided_slice %78 {offsets = [0, 256], sizes = [8, 128], strides = [1, 1]} : vector<8x384xf32> to vector<8x128xf32>
    %97 = arith.addf %96, %14 : vector<8x128xf32>
    %98 = arith.mulf %86, %97 : vector<8x128xf32>
    %99 = arith.addf %95, %98 : vector<8x128xf32>
    %100 = math.tanh %99 : vector<8x128xf32>
    %cst_26 = arith.constant 1.000000e+00 : f32
    %101 = vector.broadcast %cst_26 : f32 to vector<8x128xf32>
    %102 = arith.subf %101, %94 : vector<8x128xf32>
    %103 = arith.mulf %102, %100 : vector<8x128xf32>
    %104 = arith.mulf %94, %75 : vector<8x128xf32>
    %105 = arith.addf %103, %104 : vector<8x128xf32>
    %106 = vector.extract_strided_slice %10 {offsets = [24, 0], sizes = [8, 384], strides = [1, 1]} : vector<64x384xf32> to vector<8x384xf32>
    %107 = arith.truncf %105 : vector<8x128xf32> to vector<8x128xbf16>
    %cst_27 = arith.constant dense<0.000000e+00> : vector<8x384xf32>
    %108 = tpu.matmul %107, %11, %cst_27 {dimension_numbers = #tpu.dot_dimension_numbers<[1], [0], [0], [1], [0, 0, 1, 1], [], []>} : vector<8x128xbf16>, vector<128x384xbf16>, vector<8x384xf32> -> vector<8x384xf32>
    %109 = vector.extract_strided_slice %106 {offsets = [0, 0], sizes = [8, 128], strides = [1, 1]} : vector<8x384xf32> to vector<8x128xf32>
    %110 = vector.extract_strided_slice %108 {offsets = [0, 0], sizes = [8, 128], strides = [1, 1]} : vector<8x384xf32> to vector<8x128xf32>
    %111 = arith.addf %109, %110 : vector<8x128xf32>
    %112 = arith.negf %111 : vector<8x128xf32>
    %113 = math.exp %112 : vector<8x128xf32>
    %cst_28 = arith.constant 1.000000e+00 : f32
    %114 = vector.broadcast %cst_28 : f32 to vector<8x128xf32>
    %115 = arith.addf %114, %113 : vector<8x128xf32>
    %116 = arith.divf %114, %115 : vector<8x128xf32>
    %117 = vector.extract_strided_slice %106 {offsets = [0, 128], sizes = [8, 128], strides = [1, 1]} : vector<8x384xf32> to vector<8x128xf32>
    %118 = vector.extract_strided_slice %108 {offsets = [0, 128], sizes = [8, 128], strides = [1, 1]} : vector<8x384xf32> to vector<8x128xf32>
    %119 = arith.addf %117, %118 : vector<8x128xf32>
    %120 = arith.negf %119 : vector<8x128xf32>
    %121 = math.exp %120 : vector<8x128xf32>
    %cst_29 = arith.constant 1.000000e+00 : f32
    %122 = vector.broadcast %cst_29 : f32 to vector<8x128xf32>
    %123 = arith.addf %122, %121 : vector<8x128xf32>
    %124 = arith.divf %122, %123 : vector<8x128xf32>
    %125 = vector.extract_strided_slice %106 {offsets = [0, 256], sizes = [8, 128], strides = [1, 1]} : vector<8x384xf32> to vector<8x128xf32>
    %126 = vector.extract_strided_slice %108 {offsets = [0, 256], sizes = [8, 128], strides = [1, 1]} : vector<8x384xf32> to vector<8x128xf32>
    %127 = arith.addf %126, %14 : vector<8x128xf32>
    %128 = arith.mulf %116, %127 : vector<8x128xf32>
    %129 = arith.addf %125, %128 : vector<8x128xf32>
    %130 = math.tanh %129 : vector<8x128xf32>
    %cst_30 = arith.constant 1.000000e+00 : f32
    %131 = vector.broadcast %cst_30 : f32 to vector<8x128xf32>
    %132 = arith.subf %131, %124 : vector<8x128xf32>
    %133 = arith.mulf %132, %130 : vector<8x128xf32>
    %134 = arith.mulf %124, %105 : vector<8x128xf32>
    %135 = arith.addf %133, %134 : vector<8x128xf32>
    %136 = vector.extract_strided_slice %10 {offsets = [32, 0], sizes = [8, 384], strides = [1, 1]} : vector<64x384xf32> to vector<8x384xf32>
    %137 = arith.truncf %135 : vector<8x128xf32> to vector<8x128xbf16>
    %cst_31 = arith.constant dense<0.000000e+00> : vector<8x384xf32>
    %138 = tpu.matmul %137, %11, %cst_31 {dimension_numbers = #tpu.dot_dimension_numbers<[1], [0], [0], [1], [0, 0, 1, 1], [], []>} : vector<8x128xbf16>, vector<128x384xbf16>, vector<8x384xf32> -> vector<8x384xf32>
    %139 = vector.extract_strided_slice %136 {offsets = [0, 0], sizes = [8, 128], strides = [1, 1]} : vector<8x384xf32> to vector<8x128xf32>
    %140 = vector.extract_strided_slice %138 {offsets = [0, 0], sizes = [8, 128], strides = [1, 1]} : vector<8x384xf32> to vector<8x128xf32>
    %141 = arith.addf %139, %140 : vector<8x128xf32>
    %142 = arith.negf %141 : vector<8x128xf32>
    %143 = math.exp %142 : vector<8x128xf32>
    %cst_32 = arith.constant 1.000000e+00 : f32
    %144 = vector.broadcast %cst_32 : f32 to vector<8x128xf32>
    %145 = arith.addf %144, %143 : vector<8x128xf32>
    %146 = arith.divf %144, %145 : vector<8x128xf32>
    %147 = vector.extract_strided_slice %136 {offsets = [0, 128], sizes = [8, 128], strides = [1, 1]} : vector<8x384xf32> to vector<8x128xf32>
    %148 = vector.extract_strided_slice %138 {offsets = [0, 128], sizes = [8, 128], strides = [1, 1]} : vector<8x384xf32> to vector<8x128xf32>
    %149 = arith.addf %147, %148 : vector<8x128xf32>
    %150 = arith.negf %149 : vector<8x128xf32>
    %151 = math.exp %150 : vector<8x128xf32>
    %cst_33 = arith.constant 1.000000e+00 : f32
    %152 = vector.broadcast %cst_33 : f32 to vector<8x128xf32>
    %153 = arith.addf %152, %151 : vector<8x128xf32>
    %154 = arith.divf %152, %153 : vector<8x128xf32>
    %155 = vector.extract_strided_slice %136 {offsets = [0, 256], sizes = [8, 128], strides = [1, 1]} : vector<8x384xf32> to vector<8x128xf32>
    %156 = vector.extract_strided_slice %138 {offsets = [0, 256], sizes = [8, 128], strides = [1, 1]} : vector<8x384xf32> to vector<8x128xf32>
    %157 = arith.addf %156, %14 : vector<8x128xf32>
    %158 = arith.mulf %146, %157 : vector<8x128xf32>
    %159 = arith.addf %155, %158 : vector<8x128xf32>
    %160 = math.tanh %159 : vector<8x128xf32>
    %cst_34 = arith.constant 1.000000e+00 : f32
    %161 = vector.broadcast %cst_34 : f32 to vector<8x128xf32>
    %162 = arith.subf %161, %154 : vector<8x128xf32>
    %163 = arith.mulf %162, %160 : vector<8x128xf32>
    %164 = arith.mulf %154, %135 : vector<8x128xf32>
    %165 = arith.addf %163, %164 : vector<8x128xf32>
    %166 = vector.extract_strided_slice %10 {offsets = [40, 0], sizes = [8, 384], strides = [1, 1]} : vector<64x384xf32> to vector<8x384xf32>
    %167 = arith.truncf %165 : vector<8x128xf32> to vector<8x128xbf16>
    %cst_35 = arith.constant dense<0.000000e+00> : vector<8x384xf32>
    %168 = tpu.matmul %167, %11, %cst_35 {dimension_numbers = #tpu.dot_dimension_numbers<[1], [0], [0], [1], [0, 0, 1, 1], [], []>} : vector<8x128xbf16>, vector<128x384xbf16>, vector<8x384xf32> -> vector<8x384xf32>
    %169 = vector.extract_strided_slice %166 {offsets = [0, 0], sizes = [8, 128], strides = [1, 1]} : vector<8x384xf32> to vector<8x128xf32>
    %170 = vector.extract_strided_slice %168 {offsets = [0, 0], sizes = [8, 128], strides = [1, 1]} : vector<8x384xf32> to vector<8x128xf32>
    %171 = arith.addf %169, %170 : vector<8x128xf32>
    %172 = arith.negf %171 : vector<8x128xf32>
    %173 = math.exp %172 : vector<8x128xf32>
    %cst_36 = arith.constant 1.000000e+00 : f32
    %174 = vector.broadcast %cst_36 : f32 to vector<8x128xf32>
    %175 = arith.addf %174, %173 : vector<8x128xf32>
    %176 = arith.divf %174, %175 : vector<8x128xf32>
    %177 = vector.extract_strided_slice %166 {offsets = [0, 128], sizes = [8, 128], strides = [1, 1]} : vector<8x384xf32> to vector<8x128xf32>
    %178 = vector.extract_strided_slice %168 {offsets = [0, 128], sizes = [8, 128], strides = [1, 1]} : vector<8x384xf32> to vector<8x128xf32>
    %179 = arith.addf %177, %178 : vector<8x128xf32>
    %180 = arith.negf %179 : vector<8x128xf32>
    %181 = math.exp %180 : vector<8x128xf32>
    %cst_37 = arith.constant 1.000000e+00 : f32
    %182 = vector.broadcast %cst_37 : f32 to vector<8x128xf32>
    %183 = arith.addf %182, %181 : vector<8x128xf32>
    %184 = arith.divf %182, %183 : vector<8x128xf32>
    %185 = vector.extract_strided_slice %166 {offsets = [0, 256], sizes = [8, 128], strides = [1, 1]} : vector<8x384xf32> to vector<8x128xf32>
    %186 = vector.extract_strided_slice %168 {offsets = [0, 256], sizes = [8, 128], strides = [1, 1]} : vector<8x384xf32> to vector<8x128xf32>
    %187 = arith.addf %186, %14 : vector<8x128xf32>
    %188 = arith.mulf %176, %187 : vector<8x128xf32>
    %189 = arith.addf %185, %188 : vector<8x128xf32>
    %190 = math.tanh %189 : vector<8x128xf32>
    %cst_38 = arith.constant 1.000000e+00 : f32
    %191 = vector.broadcast %cst_38 : f32 to vector<8x128xf32>
    %192 = arith.subf %191, %184 : vector<8x128xf32>
    %193 = arith.mulf %192, %190 : vector<8x128xf32>
    %194 = arith.mulf %184, %165 : vector<8x128xf32>
    %195 = arith.addf %193, %194 : vector<8x128xf32>
    %196 = vector.extract_strided_slice %10 {offsets = [48, 0], sizes = [8, 384], strides = [1, 1]} : vector<64x384xf32> to vector<8x384xf32>
    %197 = arith.truncf %195 : vector<8x128xf32> to vector<8x128xbf16>
    %cst_39 = arith.constant dense<0.000000e+00> : vector<8x384xf32>
    %198 = tpu.matmul %197, %11, %cst_39 {dimension_numbers = #tpu.dot_dimension_numbers<[1], [0], [0], [1], [0, 0, 1, 1], [], []>} : vector<8x128xbf16>, vector<128x384xbf16>, vector<8x384xf32> -> vector<8x384xf32>
    %199 = vector.extract_strided_slice %196 {offsets = [0, 0], sizes = [8, 128], strides = [1, 1]} : vector<8x384xf32> to vector<8x128xf32>
    %200 = vector.extract_strided_slice %198 {offsets = [0, 0], sizes = [8, 128], strides = [1, 1]} : vector<8x384xf32> to vector<8x128xf32>
    %201 = arith.addf %199, %200 : vector<8x128xf32>
    %202 = arith.negf %201 : vector<8x128xf32>
    %203 = math.exp %202 : vector<8x128xf32>
    %cst_40 = arith.constant 1.000000e+00 : f32
    %204 = vector.broadcast %cst_40 : f32 to vector<8x128xf32>
    %205 = arith.addf %204, %203 : vector<8x128xf32>
    %206 = arith.divf %204, %205 : vector<8x128xf32>
    %207 = vector.extract_strided_slice %196 {offsets = [0, 128], sizes = [8, 128], strides = [1, 1]} : vector<8x384xf32> to vector<8x128xf32>
    %208 = vector.extract_strided_slice %198 {offsets = [0, 128], sizes = [8, 128], strides = [1, 1]} : vector<8x384xf32> to vector<8x128xf32>
    %209 = arith.addf %207, %208 : vector<8x128xf32>
    %210 = arith.negf %209 : vector<8x128xf32>
    %211 = math.exp %210 : vector<8x128xf32>
    %cst_41 = arith.constant 1.000000e+00 : f32
    %212 = vector.broadcast %cst_41 : f32 to vector<8x128xf32>
    %213 = arith.addf %212, %211 : vector<8x128xf32>
    %214 = arith.divf %212, %213 : vector<8x128xf32>
    %215 = vector.extract_strided_slice %196 {offsets = [0, 256], sizes = [8, 128], strides = [1, 1]} : vector<8x384xf32> to vector<8x128xf32>
    %216 = vector.extract_strided_slice %198 {offsets = [0, 256], sizes = [8, 128], strides = [1, 1]} : vector<8x384xf32> to vector<8x128xf32>
    %217 = arith.addf %216, %14 : vector<8x128xf32>
    %218 = arith.mulf %206, %217 : vector<8x128xf32>
    %219 = arith.addf %215, %218 : vector<8x128xf32>
    %220 = math.tanh %219 : vector<8x128xf32>
    %cst_42 = arith.constant 1.000000e+00 : f32
    %221 = vector.broadcast %cst_42 : f32 to vector<8x128xf32>
    %222 = arith.subf %221, %214 : vector<8x128xf32>
    %223 = arith.mulf %222, %220 : vector<8x128xf32>
    %224 = arith.mulf %214, %195 : vector<8x128xf32>
    %225 = arith.addf %223, %224 : vector<8x128xf32>
    %226 = vector.extract_strided_slice %10 {offsets = [56, 0], sizes = [8, 384], strides = [1, 1]} : vector<64x384xf32> to vector<8x384xf32>
    %227 = arith.truncf %225 : vector<8x128xf32> to vector<8x128xbf16>
    %cst_43 = arith.constant dense<0.000000e+00> : vector<8x384xf32>
    %228 = tpu.matmul %227, %11, %cst_43 {dimension_numbers = #tpu.dot_dimension_numbers<[1], [0], [0], [1], [0, 0, 1, 1], [], []>} : vector<8x128xbf16>, vector<128x384xbf16>, vector<8x384xf32> -> vector<8x384xf32>
    %229 = vector.extract_strided_slice %226 {offsets = [0, 0], sizes = [8, 128], strides = [1, 1]} : vector<8x384xf32> to vector<8x128xf32>
    %230 = vector.extract_strided_slice %228 {offsets = [0, 0], sizes = [8, 128], strides = [1, 1]} : vector<8x384xf32> to vector<8x128xf32>
    %231 = arith.addf %229, %230 : vector<8x128xf32>
    %232 = arith.negf %231 : vector<8x128xf32>
    %233 = math.exp %232 : vector<8x128xf32>
    %cst_44 = arith.constant 1.000000e+00 : f32
    %234 = vector.broadcast %cst_44 : f32 to vector<8x128xf32>
    %235 = arith.addf %234, %233 : vector<8x128xf32>
    %236 = arith.divf %234, %235 : vector<8x128xf32>
    %237 = vector.extract_strided_slice %226 {offsets = [0, 128], sizes = [8, 128], strides = [1, 1]} : vector<8x384xf32> to vector<8x128xf32>
    %238 = vector.extract_strided_slice %228 {offsets = [0, 128], sizes = [8, 128], strides = [1, 1]} : vector<8x384xf32> to vector<8x128xf32>
    %239 = arith.addf %237, %238 : vector<8x128xf32>
    %240 = arith.negf %239 : vector<8x128xf32>
    %241 = math.exp %240 : vector<8x128xf32>
    %cst_45 = arith.constant 1.000000e+00 : f32
    %242 = vector.broadcast %cst_45 : f32 to vector<8x128xf32>
    %243 = arith.addf %242, %241 : vector<8x128xf32>
    %244 = arith.divf %242, %243 : vector<8x128xf32>
    %245 = vector.extract_strided_slice %226 {offsets = [0, 256], sizes = [8, 128], strides = [1, 1]} : vector<8x384xf32> to vector<8x128xf32>
    %246 = vector.extract_strided_slice %228 {offsets = [0, 256], sizes = [8, 128], strides = [1, 1]} : vector<8x384xf32> to vector<8x128xf32>
    %247 = arith.addf %246, %14 : vector<8x128xf32>
    %248 = arith.mulf %236, %247 : vector<8x128xf32>
    %249 = arith.addf %245, %248 : vector<8x128xf32>
    %250 = math.tanh %249 : vector<8x128xf32>
    %cst_46 = arith.constant 1.000000e+00 : f32
    %251 = vector.broadcast %cst_46 : f32 to vector<8x128xf32>
    %252 = arith.subf %251, %244 : vector<8x128xf32>
    %253 = arith.mulf %252, %250 : vector<8x128xf32>
    %254 = arith.mulf %244, %225 : vector<8x128xf32>
    %255 = arith.addf %253, %254 : vector<8x128xf32>
    %256 = tpu.concatenate %45, %75, %105, %135, %165, %195, %225, %255 in 0 : vector<8x128xf32>, vector<8x128xf32>, vector<8x128xf32>, vector<8x128xf32>, vector<8x128xf32>, vector<8x128xf32>, vector<8x128xf32>, vector<8x128xf32> -> vector<64x128xf32>
    %257 = arith.truncf %256 : vector<64x128xf32> to vector<64x128xbf16>
    %c0_47 = arith.constant 0 : index
    %c0_48 = arith.constant 0 : index
    %258 = vector.load %arg8[%c0_47, %c0_48] : memref<128x384xbf16, #tpu.memory_space<vmem>>, vector<128x384xbf16>
    %cst_49 = arith.constant dense<0.000000e+00> : vector<64x384xf32>
    %259 = tpu.matmul %257, %258, %cst_49 {dimension_numbers = #tpu.dot_dimension_numbers<[1], [0], [0], [1], [0, 0, 1, 1], [], []>} : vector<64x128xbf16>, vector<128x384xbf16>, vector<64x384xf32> -> vector<64x384xf32>
    %c0_50 = arith.constant 0 : index
    %c0_51 = arith.constant 0 : index
    %260 = vector.load %arg10[%c0_50, %c0_51] : memref<1x384xf32, #tpu.memory_space<vmem>>, vector<1x384xf32>
    %261 = vector.broadcast %260 : vector<1x384xf32> to vector<64x384xf32>
    %262 = arith.addf %259, %261 : vector<64x384xf32>
    %c0_52 = arith.constant 0 : index
    %c0_53 = arith.constant 0 : index
    %263 = vector.load %arg9[%c0_52, %c0_53] : memref<128x384xbf16, #tpu.memory_space<vmem>>, vector<128x384xbf16>
    %c0_54 = arith.constant 0 : index
    %c0_55 = arith.constant 0 : index
    %264 = vector.load %arg11[%c0_54, %c0_55] : memref<1x128xf32, #tpu.memory_space<vmem>>, vector<1x128xf32>
    %265 = vector.shape_cast %264 : vector<1x128xf32> to vector<1x128xf32>
    %266 = vector.broadcast %265 : vector<1x128xf32> to vector<8x128xf32>
    %cst_56 = arith.constant 0.000000e+00 : f32
    %267 = vector.broadcast %cst_56 : f32 to vector<8x128xf32>
    %268 = vector.extract_strided_slice %262 {offsets = [0, 0], sizes = [8, 384], strides = [1, 1]} : vector<64x384xf32> to vector<8x384xf32>
    %269 = arith.truncf %267 : vector<8x128xf32> to vector<8x128xbf16>
    %cst_57 = arith.constant dense<0.000000e+00> : vector<8x384xf32>
    %270 = tpu.matmul %269, %263, %cst_57 {dimension_numbers = #tpu.dot_dimension_numbers<[1], [0], [0], [1], [0, 0, 1, 1], [], []>} : vector<8x128xbf16>, vector<128x384xbf16>, vector<8x384xf32> -> vector<8x384xf32>
    %271 = vector.extract_strided_slice %268 {offsets = [0, 0], sizes = [8, 128], strides = [1, 1]} : vector<8x384xf32> to vector<8x128xf32>
    %272 = vector.extract_strided_slice %270 {offsets = [0, 0], sizes = [8, 128], strides = [1, 1]} : vector<8x384xf32> to vector<8x128xf32>
    %273 = arith.addf %271, %272 : vector<8x128xf32>
    %274 = arith.negf %273 : vector<8x128xf32>
    %275 = math.exp %274 : vector<8x128xf32>
    %cst_58 = arith.constant 1.000000e+00 : f32
    %276 = vector.broadcast %cst_58 : f32 to vector<8x128xf32>
    %277 = arith.addf %276, %275 : vector<8x128xf32>
    %278 = arith.divf %276, %277 : vector<8x128xf32>
    %279 = vector.extract_strided_slice %268 {offsets = [0, 128], sizes = [8, 128], strides = [1, 1]} : vector<8x384xf32> to vector<8x128xf32>
    %280 = vector.extract_strided_slice %270 {offsets = [0, 128], sizes = [8, 128], strides = [1, 1]} : vector<8x384xf32> to vector<8x128xf32>
    %281 = arith.addf %279, %280 : vector<8x128xf32>
    %282 = arith.negf %281 : vector<8x128xf32>
    %283 = math.exp %282 : vector<8x128xf32>
    %cst_59 = arith.constant 1.000000e+00 : f32
    %284 = vector.broadcast %cst_59 : f32 to vector<8x128xf32>
    %285 = arith.addf %284, %283 : vector<8x128xf32>
    %286 = arith.divf %284, %285 : vector<8x128xf32>
    %287 = vector.extract_strided_slice %268 {offsets = [0, 256], sizes = [8, 128], strides = [1, 1]} : vector<8x384xf32> to vector<8x128xf32>
    %288 = vector.extract_strided_slice %270 {offsets = [0, 256], sizes = [8, 128], strides = [1, 1]} : vector<8x384xf32> to vector<8x128xf32>
    %289 = arith.addf %288, %266 : vector<8x128xf32>
    %290 = arith.mulf %278, %289 : vector<8x128xf32>
    %291 = arith.addf %287, %290 : vector<8x128xf32>
    %292 = math.tanh %291 : vector<8x128xf32>
    %cst_60 = arith.constant 1.000000e+00 : f32
    %293 = vector.broadcast %cst_60 : f32 to vector<8x128xf32>
    %294 = arith.subf %293, %286 : vector<8x128xf32>
    %295 = arith.mulf %294, %292 : vector<8x128xf32>
    %296 = arith.mulf %286, %267 : vector<8x128xf32>
    %297 = arith.addf %295, %296 : vector<8x128xf32>
    %298 = vector.extract_strided_slice %262 {offsets = [8, 0], sizes = [8, 384], strides = [1, 1]} : vector<64x384xf32> to vector<8x384xf32>
    %299 = arith.truncf %297 : vector<8x128xf32> to vector<8x128xbf16>
    %cst_61 = arith.constant dense<0.000000e+00> : vector<8x384xf32>
    %300 = tpu.matmul %299, %263, %cst_61 {dimension_numbers = #tpu.dot_dimension_numbers<[1], [0], [0], [1], [0, 0, 1, 1], [], []>} : vector<8x128xbf16>, vector<128x384xbf16>, vector<8x384xf32> -> vector<8x384xf32>
    %301 = vector.extract_strided_slice %298 {offsets = [0, 0], sizes = [8, 128], strides = [1, 1]} : vector<8x384xf32> to vector<8x128xf32>
    %302 = vector.extract_strided_slice %300 {offsets = [0, 0], sizes = [8, 128], strides = [1, 1]} : vector<8x384xf32> to vector<8x128xf32>
    %303 = arith.addf %301, %302 : vector<8x128xf32>
    %304 = arith.negf %303 : vector<8x128xf32>
    %305 = math.exp %304 : vector<8x128xf32>
    %cst_62 = arith.constant 1.000000e+00 : f32
    %306 = vector.broadcast %cst_62 : f32 to vector<8x128xf32>
    %307 = arith.addf %306, %305 : vector<8x128xf32>
    %308 = arith.divf %306, %307 : vector<8x128xf32>
    %309 = vector.extract_strided_slice %298 {offsets = [0, 128], sizes = [8, 128], strides = [1, 1]} : vector<8x384xf32> to vector<8x128xf32>
    %310 = vector.extract_strided_slice %300 {offsets = [0, 128], sizes = [8, 128], strides = [1, 1]} : vector<8x384xf32> to vector<8x128xf32>
    %311 = arith.addf %309, %310 : vector<8x128xf32>
    %312 = arith.negf %311 : vector<8x128xf32>
    %313 = math.exp %312 : vector<8x128xf32>
    %cst_63 = arith.constant 1.000000e+00 : f32
    %314 = vector.broadcast %cst_63 : f32 to vector<8x128xf32>
    %315 = arith.addf %314, %313 : vector<8x128xf32>
    %316 = arith.divf %314, %315 : vector<8x128xf32>
    %317 = vector.extract_strided_slice %298 {offsets = [0, 256], sizes = [8, 128], strides = [1, 1]} : vector<8x384xf32> to vector<8x128xf32>
    %318 = vector.extract_strided_slice %300 {offsets = [0, 256], sizes = [8, 128], strides = [1, 1]} : vector<8x384xf32> to vector<8x128xf32>
    %319 = arith.addf %318, %266 : vector<8x128xf32>
    %320 = arith.mulf %308, %319 : vector<8x128xf32>
    %321 = arith.addf %317, %320 : vector<8x128xf32>
    %322 = math.tanh %321 : vector<8x128xf32>
    %cst_64 = arith.constant 1.000000e+00 : f32
    %323 = vector.broadcast %cst_64 : f32 to vector<8x128xf32>
    %324 = arith.subf %323, %316 : vector<8x128xf32>
    %325 = arith.mulf %324, %322 : vector<8x128xf32>
    %326 = arith.mulf %316, %297 : vector<8x128xf32>
    %327 = arith.addf %325, %326 : vector<8x128xf32>
    %328 = vector.extract_strided_slice %262 {offsets = [16, 0], sizes = [8, 384], strides = [1, 1]} : vector<64x384xf32> to vector<8x384xf32>
    %329 = arith.truncf %327 : vector<8x128xf32> to vector<8x128xbf16>
    %cst_65 = arith.constant dense<0.000000e+00> : vector<8x384xf32>
    %330 = tpu.matmul %329, %263, %cst_65 {dimension_numbers = #tpu.dot_dimension_numbers<[1], [0], [0], [1], [0, 0, 1, 1], [], []>} : vector<8x128xbf16>, vector<128x384xbf16>, vector<8x384xf32> -> vector<8x384xf32>
    %331 = vector.extract_strided_slice %328 {offsets = [0, 0], sizes = [8, 128], strides = [1, 1]} : vector<8x384xf32> to vector<8x128xf32>
    %332 = vector.extract_strided_slice %330 {offsets = [0, 0], sizes = [8, 128], strides = [1, 1]} : vector<8x384xf32> to vector<8x128xf32>
    %333 = arith.addf %331, %332 : vector<8x128xf32>
    %334 = arith.negf %333 : vector<8x128xf32>
    %335 = math.exp %334 : vector<8x128xf32>
    %cst_66 = arith.constant 1.000000e+00 : f32
    %336 = vector.broadcast %cst_66 : f32 to vector<8x128xf32>
    %337 = arith.addf %336, %335 : vector<8x128xf32>
    %338 = arith.divf %336, %337 : vector<8x128xf32>
    %339 = vector.extract_strided_slice %328 {offsets = [0, 128], sizes = [8, 128], strides = [1, 1]} : vector<8x384xf32> to vector<8x128xf32>
    %340 = vector.extract_strided_slice %330 {offsets = [0, 128], sizes = [8, 128], strides = [1, 1]} : vector<8x384xf32> to vector<8x128xf32>
    %341 = arith.addf %339, %340 : vector<8x128xf32>
    %342 = arith.negf %341 : vector<8x128xf32>
    %343 = math.exp %342 : vector<8x128xf32>
    %cst_67 = arith.constant 1.000000e+00 : f32
    %344 = vector.broadcast %cst_67 : f32 to vector<8x128xf32>
    %345 = arith.addf %344, %343 : vector<8x128xf32>
    %346 = arith.divf %344, %345 : vector<8x128xf32>
    %347 = vector.extract_strided_slice %328 {offsets = [0, 256], sizes = [8, 128], strides = [1, 1]} : vector<8x384xf32> to vector<8x128xf32>
    %348 = vector.extract_strided_slice %330 {offsets = [0, 256], sizes = [8, 128], strides = [1, 1]} : vector<8x384xf32> to vector<8x128xf32>
    %349 = arith.addf %348, %266 : vector<8x128xf32>
    %350 = arith.mulf %338, %349 : vector<8x128xf32>
    %351 = arith.addf %347, %350 : vector<8x128xf32>
    %352 = math.tanh %351 : vector<8x128xf32>
    %cst_68 = arith.constant 1.000000e+00 : f32
    %353 = vector.broadcast %cst_68 : f32 to vector<8x128xf32>
    %354 = arith.subf %353, %346 : vector<8x128xf32>
    %355 = arith.mulf %354, %352 : vector<8x128xf32>
    %356 = arith.mulf %346, %327 : vector<8x128xf32>
    %357 = arith.addf %355, %356 : vector<8x128xf32>
    %358 = vector.extract_strided_slice %262 {offsets = [24, 0], sizes = [8, 384], strides = [1, 1]} : vector<64x384xf32> to vector<8x384xf32>
    %359 = arith.truncf %357 : vector<8x128xf32> to vector<8x128xbf16>
    %cst_69 = arith.constant dense<0.000000e+00> : vector<8x384xf32>
    %360 = tpu.matmul %359, %263, %cst_69 {dimension_numbers = #tpu.dot_dimension_numbers<[1], [0], [0], [1], [0, 0, 1, 1], [], []>} : vector<8x128xbf16>, vector<128x384xbf16>, vector<8x384xf32> -> vector<8x384xf32>
    %361 = vector.extract_strided_slice %358 {offsets = [0, 0], sizes = [8, 128], strides = [1, 1]} : vector<8x384xf32> to vector<8x128xf32>
    %362 = vector.extract_strided_slice %360 {offsets = [0, 0], sizes = [8, 128], strides = [1, 1]} : vector<8x384xf32> to vector<8x128xf32>
    %363 = arith.addf %361, %362 : vector<8x128xf32>
    %364 = arith.negf %363 : vector<8x128xf32>
    %365 = math.exp %364 : vector<8x128xf32>
    %cst_70 = arith.constant 1.000000e+00 : f32
    %366 = vector.broadcast %cst_70 : f32 to vector<8x128xf32>
    %367 = arith.addf %366, %365 : vector<8x128xf32>
    %368 = arith.divf %366, %367 : vector<8x128xf32>
    %369 = vector.extract_strided_slice %358 {offsets = [0, 128], sizes = [8, 128], strides = [1, 1]} : vector<8x384xf32> to vector<8x128xf32>
    %370 = vector.extract_strided_slice %360 {offsets = [0, 128], sizes = [8, 128], strides = [1, 1]} : vector<8x384xf32> to vector<8x128xf32>
    %371 = arith.addf %369, %370 : vector<8x128xf32>
    %372 = arith.negf %371 : vector<8x128xf32>
    %373 = math.exp %372 : vector<8x128xf32>
    %cst_71 = arith.constant 1.000000e+00 : f32
    %374 = vector.broadcast %cst_71 : f32 to vector<8x128xf32>
    %375 = arith.addf %374, %373 : vector<8x128xf32>
    %376 = arith.divf %374, %375 : vector<8x128xf32>
    %377 = vector.extract_strided_slice %358 {offsets = [0, 256], sizes = [8, 128], strides = [1, 1]} : vector<8x384xf32> to vector<8x128xf32>
    %378 = vector.extract_strided_slice %360 {offsets = [0, 256], sizes = [8, 128], strides = [1, 1]} : vector<8x384xf32> to vector<8x128xf32>
    %379 = arith.addf %378, %266 : vector<8x128xf32>
    %380 = arith.mulf %368, %379 : vector<8x128xf32>
    %381 = arith.addf %377, %380 : vector<8x128xf32>
    %382 = math.tanh %381 : vector<8x128xf32>
    %cst_72 = arith.constant 1.000000e+00 : f32
    %383 = vector.broadcast %cst_72 : f32 to vector<8x128xf32>
    %384 = arith.subf %383, %376 : vector<8x128xf32>
    %385 = arith.mulf %384, %382 : vector<8x128xf32>
    %386 = arith.mulf %376, %357 : vector<8x128xf32>
    %387 = arith.addf %385, %386 : vector<8x128xf32>
    %388 = vector.extract_strided_slice %262 {offsets = [32, 0], sizes = [8, 384], strides = [1, 1]} : vector<64x384xf32> to vector<8x384xf32>
    %389 = arith.truncf %387 : vector<8x128xf32> to vector<8x128xbf16>
    %cst_73 = arith.constant dense<0.000000e+00> : vector<8x384xf32>
    %390 = tpu.matmul %389, %263, %cst_73 {dimension_numbers = #tpu.dot_dimension_numbers<[1], [0], [0], [1], [0, 0, 1, 1], [], []>} : vector<8x128xbf16>, vector<128x384xbf16>, vector<8x384xf32> -> vector<8x384xf32>
    %391 = vector.extract_strided_slice %388 {offsets = [0, 0], sizes = [8, 128], strides = [1, 1]} : vector<8x384xf32> to vector<8x128xf32>
    %392 = vector.extract_strided_slice %390 {offsets = [0, 0], sizes = [8, 128], strides = [1, 1]} : vector<8x384xf32> to vector<8x128xf32>
    %393 = arith.addf %391, %392 : vector<8x128xf32>
    %394 = arith.negf %393 : vector<8x128xf32>
    %395 = math.exp %394 : vector<8x128xf32>
    %cst_74 = arith.constant 1.000000e+00 : f32
    %396 = vector.broadcast %cst_74 : f32 to vector<8x128xf32>
    %397 = arith.addf %396, %395 : vector<8x128xf32>
    %398 = arith.divf %396, %397 : vector<8x128xf32>
    %399 = vector.extract_strided_slice %388 {offsets = [0, 128], sizes = [8, 128], strides = [1, 1]} : vector<8x384xf32> to vector<8x128xf32>
    %400 = vector.extract_strided_slice %390 {offsets = [0, 128], sizes = [8, 128], strides = [1, 1]} : vector<8x384xf32> to vector<8x128xf32>
    %401 = arith.addf %399, %400 : vector<8x128xf32>
    %402 = arith.negf %401 : vector<8x128xf32>
    %403 = math.exp %402 : vector<8x128xf32>
    %cst_75 = arith.constant 1.000000e+00 : f32
    %404 = vector.broadcast %cst_75 : f32 to vector<8x128xf32>
    %405 = arith.addf %404, %403 : vector<8x128xf32>
    %406 = arith.divf %404, %405 : vector<8x128xf32>
    %407 = vector.extract_strided_slice %388 {offsets = [0, 256], sizes = [8, 128], strides = [1, 1]} : vector<8x384xf32> to vector<8x128xf32>
    %408 = vector.extract_strided_slice %390 {offsets = [0, 256], sizes = [8, 128], strides = [1, 1]} : vector<8x384xf32> to vector<8x128xf32>
    %409 = arith.addf %408, %266 : vector<8x128xf32>
    %410 = arith.mulf %398, %409 : vector<8x128xf32>
    %411 = arith.addf %407, %410 : vector<8x128xf32>
    %412 = math.tanh %411 : vector<8x128xf32>
    %cst_76 = arith.constant 1.000000e+00 : f32
    %413 = vector.broadcast %cst_76 : f32 to vector<8x128xf32>
    %414 = arith.subf %413, %406 : vector<8x128xf32>
    %415 = arith.mulf %414, %412 : vector<8x128xf32>
    %416 = arith.mulf %406, %387 : vector<8x128xf32>
    %417 = arith.addf %415, %416 : vector<8x128xf32>
    %418 = vector.extract_strided_slice %262 {offsets = [40, 0], sizes = [8, 384], strides = [1, 1]} : vector<64x384xf32> to vector<8x384xf32>
    %419 = arith.truncf %417 : vector<8x128xf32> to vector<8x128xbf16>
    %cst_77 = arith.constant dense<0.000000e+00> : vector<8x384xf32>
    %420 = tpu.matmul %419, %263, %cst_77 {dimension_numbers = #tpu.dot_dimension_numbers<[1], [0], [0], [1], [0, 0, 1, 1], [], []>} : vector<8x128xbf16>, vector<128x384xbf16>, vector<8x384xf32> -> vector<8x384xf32>
    %421 = vector.extract_strided_slice %418 {offsets = [0, 0], sizes = [8, 128], strides = [1, 1]} : vector<8x384xf32> to vector<8x128xf32>
    %422 = vector.extract_strided_slice %420 {offsets = [0, 0], sizes = [8, 128], strides = [1, 1]} : vector<8x384xf32> to vector<8x128xf32>
    %423 = arith.addf %421, %422 : vector<8x128xf32>
    %424 = arith.negf %423 : vector<8x128xf32>
    %425 = math.exp %424 : vector<8x128xf32>
    %cst_78 = arith.constant 1.000000e+00 : f32
    %426 = vector.broadcast %cst_78 : f32 to vector<8x128xf32>
    %427 = arith.addf %426, %425 : vector<8x128xf32>
    %428 = arith.divf %426, %427 : vector<8x128xf32>
    %429 = vector.extract_strided_slice %418 {offsets = [0, 128], sizes = [8, 128], strides = [1, 1]} : vector<8x384xf32> to vector<8x128xf32>
    %430 = vector.extract_strided_slice %420 {offsets = [0, 128], sizes = [8, 128], strides = [1, 1]} : vector<8x384xf32> to vector<8x128xf32>
    %431 = arith.addf %429, %430 : vector<8x128xf32>
    %432 = arith.negf %431 : vector<8x128xf32>
    %433 = math.exp %432 : vector<8x128xf32>
    %cst_79 = arith.constant 1.000000e+00 : f32
    %434 = vector.broadcast %cst_79 : f32 to vector<8x128xf32>
    %435 = arith.addf %434, %433 : vector<8x128xf32>
    %436 = arith.divf %434, %435 : vector<8x128xf32>
    %437 = vector.extract_strided_slice %418 {offsets = [0, 256], sizes = [8, 128], strides = [1, 1]} : vector<8x384xf32> to vector<8x128xf32>
    %438 = vector.extract_strided_slice %420 {offsets = [0, 256], sizes = [8, 128], strides = [1, 1]} : vector<8x384xf32> to vector<8x128xf32>
    %439 = arith.addf %438, %266 : vector<8x128xf32>
    %440 = arith.mulf %428, %439 : vector<8x128xf32>
    %441 = arith.addf %437, %440 : vector<8x128xf32>
    %442 = math.tanh %441 : vector<8x128xf32>
    %cst_80 = arith.constant 1.000000e+00 : f32
    %443 = vector.broadcast %cst_80 : f32 to vector<8x128xf32>
    %444 = arith.subf %443, %436 : vector<8x128xf32>
    %445 = arith.mulf %444, %442 : vector<8x128xf32>
    %446 = arith.mulf %436, %417 : vector<8x128xf32>
    %447 = arith.addf %445, %446 : vector<8x128xf32>
    %448 = vector.extract_strided_slice %262 {offsets = [48, 0], sizes = [8, 384], strides = [1, 1]} : vector<64x384xf32> to vector<8x384xf32>
    %449 = arith.truncf %447 : vector<8x128xf32> to vector<8x128xbf16>
    %cst_81 = arith.constant dense<0.000000e+00> : vector<8x384xf32>
    %450 = tpu.matmul %449, %263, %cst_81 {dimension_numbers = #tpu.dot_dimension_numbers<[1], [0], [0], [1], [0, 0, 1, 1], [], []>} : vector<8x128xbf16>, vector<128x384xbf16>, vector<8x384xf32> -> vector<8x384xf32>
    %451 = vector.extract_strided_slice %448 {offsets = [0, 0], sizes = [8, 128], strides = [1, 1]} : vector<8x384xf32> to vector<8x128xf32>
    %452 = vector.extract_strided_slice %450 {offsets = [0, 0], sizes = [8, 128], strides = [1, 1]} : vector<8x384xf32> to vector<8x128xf32>
    %453 = arith.addf %451, %452 : vector<8x128xf32>
    %454 = arith.negf %453 : vector<8x128xf32>
    %455 = math.exp %454 : vector<8x128xf32>
    %cst_82 = arith.constant 1.000000e+00 : f32
    %456 = vector.broadcast %cst_82 : f32 to vector<8x128xf32>
    %457 = arith.addf %456, %455 : vector<8x128xf32>
    %458 = arith.divf %456, %457 : vector<8x128xf32>
    %459 = vector.extract_strided_slice %448 {offsets = [0, 128], sizes = [8, 128], strides = [1, 1]} : vector<8x384xf32> to vector<8x128xf32>
    %460 = vector.extract_strided_slice %450 {offsets = [0, 128], sizes = [8, 128], strides = [1, 1]} : vector<8x384xf32> to vector<8x128xf32>
    %461 = arith.addf %459, %460 : vector<8x128xf32>
    %462 = arith.negf %461 : vector<8x128xf32>
    %463 = math.exp %462 : vector<8x128xf32>
    %cst_83 = arith.constant 1.000000e+00 : f32
    %464 = vector.broadcast %cst_83 : f32 to vector<8x128xf32>
    %465 = arith.addf %464, %463 : vector<8x128xf32>
    %466 = arith.divf %464, %465 : vector<8x128xf32>
    %467 = vector.extract_strided_slice %448 {offsets = [0, 256], sizes = [8, 128], strides = [1, 1]} : vector<8x384xf32> to vector<8x128xf32>
    %468 = vector.extract_strided_slice %450 {offsets = [0, 256], sizes = [8, 128], strides = [1, 1]} : vector<8x384xf32> to vector<8x128xf32>
    %469 = arith.addf %468, %266 : vector<8x128xf32>
    %470 = arith.mulf %458, %469 : vector<8x128xf32>
    %471 = arith.addf %467, %470 : vector<8x128xf32>
    %472 = math.tanh %471 : vector<8x128xf32>
    %cst_84 = arith.constant 1.000000e+00 : f32
    %473 = vector.broadcast %cst_84 : f32 to vector<8x128xf32>
    %474 = arith.subf %473, %466 : vector<8x128xf32>
    %475 = arith.mulf %474, %472 : vector<8x128xf32>
    %476 = arith.mulf %466, %447 : vector<8x128xf32>
    %477 = arith.addf %475, %476 : vector<8x128xf32>
    %478 = vector.extract_strided_slice %262 {offsets = [56, 0], sizes = [8, 384], strides = [1, 1]} : vector<64x384xf32> to vector<8x384xf32>
    %479 = arith.truncf %477 : vector<8x128xf32> to vector<8x128xbf16>
    %cst_85 = arith.constant dense<0.000000e+00> : vector<8x384xf32>
    %480 = tpu.matmul %479, %263, %cst_85 {dimension_numbers = #tpu.dot_dimension_numbers<[1], [0], [0], [1], [0, 0, 1, 1], [], []>} : vector<8x128xbf16>, vector<128x384xbf16>, vector<8x384xf32> -> vector<8x384xf32>
    %481 = vector.extract_strided_slice %478 {offsets = [0, 0], sizes = [8, 128], strides = [1, 1]} : vector<8x384xf32> to vector<8x128xf32>
    %482 = vector.extract_strided_slice %480 {offsets = [0, 0], sizes = [8, 128], strides = [1, 1]} : vector<8x384xf32> to vector<8x128xf32>
    %483 = arith.addf %481, %482 : vector<8x128xf32>
    %484 = arith.negf %483 : vector<8x128xf32>
    %485 = math.exp %484 : vector<8x128xf32>
    %cst_86 = arith.constant 1.000000e+00 : f32
    %486 = vector.broadcast %cst_86 : f32 to vector<8x128xf32>
    %487 = arith.addf %486, %485 : vector<8x128xf32>
    %488 = arith.divf %486, %487 : vector<8x128xf32>
    %489 = vector.extract_strided_slice %478 {offsets = [0, 128], sizes = [8, 128], strides = [1, 1]} : vector<8x384xf32> to vector<8x128xf32>
    %490 = vector.extract_strided_slice %480 {offsets = [0, 128], sizes = [8, 128], strides = [1, 1]} : vector<8x384xf32> to vector<8x128xf32>
    %491 = arith.addf %489, %490 : vector<8x128xf32>
    %492 = arith.negf %491 : vector<8x128xf32>
    %493 = math.exp %492 : vector<8x128xf32>
    %cst_87 = arith.constant 1.000000e+00 : f32
    %494 = vector.broadcast %cst_87 : f32 to vector<8x128xf32>
    %495 = arith.addf %494, %493 : vector<8x128xf32>
    %496 = arith.divf %494, %495 : vector<8x128xf32>
    %497 = vector.extract_strided_slice %478 {offsets = [0, 256], sizes = [8, 128], strides = [1, 1]} : vector<8x384xf32> to vector<8x128xf32>
    %498 = vector.extract_strided_slice %480 {offsets = [0, 256], sizes = [8, 128], strides = [1, 1]} : vector<8x384xf32> to vector<8x128xf32>
    %499 = arith.addf %498, %266 : vector<8x128xf32>
    %500 = arith.mulf %488, %499 : vector<8x128xf32>
    %501 = arith.addf %497, %500 : vector<8x128xf32>
    %502 = math.tanh %501 : vector<8x128xf32>
    %cst_88 = arith.constant 1.000000e+00 : f32
    %503 = vector.broadcast %cst_88 : f32 to vector<8x128xf32>
    %504 = arith.subf %503, %496 : vector<8x128xf32>
    %505 = arith.mulf %504, %502 : vector<8x128xf32>
    %506 = arith.mulf %496, %477 : vector<8x128xf32>
    %507 = arith.addf %505, %506 : vector<8x128xf32>
    %508 = tpu.concatenate %297, %327, %357, %387, %417, %447, %477, %507 in 0 : vector<8x128xf32>, vector<8x128xf32>, vector<8x128xf32>, vector<8x128xf32>, vector<8x128xf32>, vector<8x128xf32>, vector<8x128xf32>, vector<8x128xf32> -> vector<64x128xf32>
    %509 = arith.truncf %508 : vector<64x128xf32> to vector<64x128xbf16>
    %c0_89 = arith.constant 0 : index
    %c0_90 = arith.constant 0 : index
    %510 = vector.load %arg12[%c0_89, %c0_90] : memref<128x128xbf16, #tpu.memory_space<vmem>>, vector<128x128xbf16>
    %cst_91 = arith.constant dense<0.000000e+00> : vector<64x128xf32>
    %511 = tpu.matmul %509, %510, %cst_91 {dimension_numbers = #tpu.dot_dimension_numbers<[1], [0], [0], [1], [0, 0, 1, 1], [], []>} : vector<64x128xbf16>, vector<128x128xbf16>, vector<64x128xf32> -> vector<64x128xf32>
    %c0_92 = arith.constant 0 : index
    %c0_93 = arith.constant 0 : index
    %512 = vector.load %arg13[%c0_92, %c0_93] : memref<1x128xf32, #tpu.memory_space<vmem>>, vector<1x128xf32>
    %513 = vector.broadcast %512 : vector<1x128xf32> to vector<64x128xf32>
    %514 = arith.addf %511, %513 : vector<64x128xf32>
    %c0_94 = arith.constant 0 : index
    %c0_95 = arith.constant 0 : index
    %515 = vector.load %arg14[%c0_94, %c0_95] : memref<64x128xf32, #tpu.memory_space<vmem>>, vector<64x128xf32>
    tpu.vector_store %arg14[%c0_94, %c0_95], %514 {strides = array<i32>} : memref<64x128xf32, #tpu.memory_space<vmem>>, vector<64x128xf32>,
    return
  }
  func.func @transform_0(%arg0: i32) -> (i32, i32) {
    %c0_i32 = arith.constant 0 : i32
    %c0_i32_0 = arith.constant 0 : i32
    %c0_i32_1 = arith.constant 0 : i32
    return %c0_i32, %c0_i32_0 : i32, i32
  }
  func.func @transform_1(%arg0: i32) -> (i32, i32) {
    %c0_i32 = arith.constant 0 : i32
    %c0_i32_0 = arith.constant 0 : i32
    %c0_i32_1 = arith.constant 0 : i32
    return %c0_i32, %c0_i32_0 : i32, i32
  }
  func.func @transform_2(%arg0: i32) -> (i32, i32) {
    %c0_i32 = arith.constant 0 : i32
    %c0_i32_0 = arith.constant 0 : i32
    %c0_i32_1 = arith.constant 0 : i32
    return %c0_i32, %c0_i32_0 : i32, i32
  }
  func.func @transform_3(%arg0: i32) -> (i32, i32) {
    %c0_i32 = arith.constant 0 : i32
    %c0_i32_0 = arith.constant 0 : i32
    %c0_i32_1 = arith.constant 0 : i32
    return %c0_i32, %c0_i32_0 : i32, i32
  }
  func.func @transform_4(%arg0: i32) -> (i32, i32) {
    %c0_i32 = arith.constant 0 : i32
    %c0_i32_0 = arith.constant 0 : i32
    %c0_i32_1 = arith.constant 0 : i32
    return %c0_i32, %c0_i32_0 : i32, i32
  }
  func.func @transform_5(%arg0: i32) -> (i32, i32) {
    %c0_i32 = arith.constant 0 : i32
    %c0_i32_0 = arith.constant 0 : i32
    %c0_i32_1 = arith.constant 0 : i32
    return %c0_i32, %c0_i32_0 : i32, i32
  }
  func.func @transform_6(%arg0: i32) -> (i32, i32) {
    %c0_i32 = arith.constant 0 : i32
    %c0_i32_0 = arith.constant 0 : i32
    %c0_i32_1 = arith.constant 0 : i32
    return %c0_i32, %c0_i32_0 : i32, i32
  }
  func.func @transform_7(%arg0: i32) -> (i32, i32) {
    %c0_i32 = arith.constant 0 : i32
    %c0_i32_0 = arith.constant 0 : i32
    %c0_i32_1 = arith.constant 0 : i32
    return %c0_i32, %c0_i32_0 : i32, i32
  }
  func.func @transform_8(%arg0: i32) -> (i32, i32) {
    %c0_i32 = arith.constant 0 : i32
    %c0_i32_0 = arith.constant 0 : i32
    %c0_i32_1 = arith.constant 0 : i32
    return %c0_i32, %c0_i32_0 : i32, i32
  }
  func.func @transform_9(%arg0: i32) -> (i32, i32) {
    %c0_i32 = arith.constant 0 : i32
    %c0_i32_0 = arith.constant 0 : i32
    %c0_i32_1 = arith.constant 0 : i32
    return %c0_i32, %c0_i32_0 : i32, i32
  }
  func.func @transform_10(%arg0: i32) -> (i32, i32) {
    %c0_i32 = arith.constant 0 : i32
    %c0_i32_0 = arith.constant 0 : i32
    %c0_i32_1 = arith.constant 0 : i32
    return %c0_i32, %c0_i32_0 : i32, i32
  }
  func.func @transform_11(%arg0: i32) -> (i32, i32) {
    %c0_i32 = arith.constant 0 : i32
    %c0_i32_0 = arith.constant 0 : i32
    %c0_i32_1 = arith.constant 0 : i32
    return %c0_i32, %c0_i32_0 : i32, i32
  }
  func.func @transform_12(%arg0: i32) -> (i32, i32) {
    %c0_i32 = arith.constant 0 : i32
    %c0_i32_0 = arith.constant 0 : i32
    %c0_i32_1 = arith.constant 0 : i32
    return %c0_i32, %c0_i32_0 : i32, i32
  }
  func.func @transform_13(%arg0: i32) -> (i32, i32) {
    %c0_i32 = arith.constant 0 : i32
    %c0_i32_0 = arith.constant 0 : i32
    %c0_i32_1 = arith.constant 0 : i32
    return %c0_i32, %c0_i32_0 : i32, i32
  }
}

</mosaic_0001>

<bundles_post_ra>
// kernel: seq2seq_deco_forward.1
= control target key start
LH: loop header
LB: loop body
LE: loop exit
PB: predicated region body
PF: predicated region fallthrough
CT: control target
= control target key end

     0   :  { %18 = vsyncpa [#allocation3], 0  ;;  %s5603_s0 = inlined_call_operand.vmem [shape: bf16[64,128], index: 0, kind: input, shape index: {}]   ;;  %s5604_s1 = inlined_call_operand.vmem [shape: bf16[8,128], index: 1, kind: input, shape index: {}]   ;;  %s5605_s2 = inlined_call_operand.hbm [shape: bf16[128,384], index: 2, kind: input, shape index: {}]   ;;  %s5606_s3 = inlined_call_operand.hbm [shape: bf16[128,384], index: 3, kind: input, shape index: {}]   ;;  %s5607_s4 = inlined_call_operand.hbm [shape: bf16[128,384], index: 4, kind: input, shape index: {}]   ;;  %s5608_s5 = inlined_call_operand.vmem [shape: f32[1,384], index: 5, kind: input, shape index: {}]   ;;  %s5609_s6 = inlined_call_operand.vmem [shape: f32[1,128], index: 6, kind: input, shape index: {}]   ;;  %s5610_s7 = inlined_call_operand.hbm [shape: bf16[128,384], index: 7, kind: input, shape index: {}]   ;;  %s5611_s8 = inlined_call_operand.hbm [shape: bf16[128,384], index: 8, kind: input, shape index: {}]   ;;  %s5612_s9 = inlined_call_operand.vmem [shape: f32[1,384], index: 9, kind: input, shape index: {}]   ;;  %s5613_s10 = inlined_call_operand.vmem [shape: f32[1,128], index: 10, kind: input, shape index: {}]   ;;  %s5614_s11 = inlined_call_operand.vmem [shape: bf16[128,128], index: 11, kind: input, shape index: {}]   ;;  %s5615_s12 = inlined_call_operand.vmem [shape: f32[1,128], index: 12, kind: input, shape index: {}]   ;;  %s5616_s13 = inlined_call_operand.vmem [shape: f32[64,128], index: 13, kind: output, shape index: {}]  }
   0x1   :  { %19 = vsyncpa [#allocation5], 0 }
   0x2   :  { %20 = vsyncpa [#allocation8], 0  ;;  %s4428_s25 = smov [#allocation4]   ;;  %s4429_s27 = smov [#allocation7]  }
   0x3   :  { %s42_s26 = sshll.u32 %s4428_s25, 4  ;;  %s70_s28 = sshll.u32 %s4429_s27, 4  ;;  %s43_s26 = int_to_ptr.vmem [resolvable:$true] %s42_s26  ;;  %s71_s28 = int_to_ptr.vmem [resolvable:$true] %s70_s28 }
   0x4   :  { %s4330_s29 = scalar_lea.vmem %s43_s26, 3072  ;;  %p4335_p1 = scmp.lt.s32.totalorder %s43_s26, %s43_s26 }
   0x5   :  { %p4331_p0 = scmp.ne.s32.totalorder %s43_s26, %s4330_s29  ;;  %p4336_p2 = scmp.lt.s32.totalorder %s4330_s29, %s4330_s29 }
   0x7   :  { %p4337_p3 = por %p4336_p2, %p4335_p1 }
   0x9   :  { %p4338_p4 = pnand %p4337_p3, %p4331_p0 }
   0xb   :  { %4341 = shalt.err (!%p4338_p4)
}
   0xc   :  { %s4430_s30 = smov 192   ;;  %s4431_s14 = smov 12  }
   0xd   :  { %48 = dma.hbm_to_vmem [thread:$0]  %s5606_s3, 3072, %s43_s26, [#allocation5], %s4430_s30, %s4430_s30, %s4431_s14  }
   0xe   :  { %s4350_s17 = scalar_lea.vmem %s71_s28, 3072  ;;  %p4355_p6 = scmp.lt.s32.totalorder %s71_s28, %s71_s28 }
   0xf   :  { %p4351_p5 = scmp.ne.s32.totalorder %s71_s28, %s4350_s17  ;;  %p4356_p7 = scmp.lt.s32.totalorder %s4350_s17, %s4350_s17 }
  0x11   :  { %p4357_p8 = por %p4356_p7, %p4355_p6 }
  0x13   :  { %p4358_p9 = pnand %p4357_p8, %p4351_p5 }
  0x15   :  { %4361 = shalt.err (!%p4358_p9)
}
  0x16   :  { %76 = dma.hbm_to_vmem [thread:$0]  %s5610_s7, 3072, %s71_s28, [#allocation8], %s4430_s30, %s4430_s30, %s4431_s14  }
  0x17   :  { %s4432_s20 = smov [#allocation2]   ;;  %s4433_s22 = smov [#allocation6]  }
  0x18   :  { %s30_s21 = sshll.u32 %s4432_s20, 4  ;;  %s54_s23 = sshll.u32 %s4433_s22, 4  ;;  %s31_s21 = int_to_ptr.vmem [resolvable:$true] %s30_s21  ;;  %s55_s23 = int_to_ptr.vmem [resolvable:$true] %s54_s23 }
  0x19   :  { %s4370_s3 = scalar_lea.vmem %s31_s21, 3072  ;;  %p4375_p11 = scmp.lt.s32.totalorder %s31_s21, %s31_s21 }
  0x1a   :  { %p4371_p10 = scmp.ne.s32.totalorder %s31_s21, %s4370_s3  ;;  %p4376_p12 = scmp.lt.s32.totalorder %s4370_s3, %s4370_s3 }
  0x1c   :  { %p4377_p13 = por %p4376_p12, %p4375_p11 }
  0x1e   :  { %p4378_p0 = pnand %p4377_p13, %p4371_p10 }
  0x20   :  { %4381 = shalt.err (!%p4378_p0)
}
  0x21   :  { %36 = dma.hbm_to_vmem [thread:$0]  %s5605_s2, 3072, %s31_s21, [#allocation3], %s4430_s30, %s4430_s30, %s4431_s14  }
  0x22   :  { %s4390_s7 = scalar_lea.vmem %s55_s23, 3072  ;;  %p4395_p2 = scmp.lt.s32.totalorder %s55_s23, %s55_s23 }
  0x23   :  { %p4391_p1 = scmp.ne.s32.totalorder %s55_s23, %s4390_s7  ;;  %p4396_p3 = scmp.lt.s32.totalorder %s4390_s7, %s4390_s7 }
  0x25   :  { %p4397_p4 = por %p4396_p3, %p4395_p2 }
  0x27   :  { %p4398_p5 = pnand %p4397_p4, %p4391_p1 }
  0x29   :  { %4401 = shalt.err (!%p4398_p5)
}
  0x2a   :  { %60 = dma.hbm_to_vmem [thread:$0]  %s5607_s4, 3072, %s55_s23, [#allocation5], %s4430_s30, %s4430_s30, %s4431_s14  }
  0x2b   :  { %s4434_s28 = smov [#allocation9]  }
  0x2c   :  { %s82_s29 = sshll.u32 %s4434_s28, 4  ;;  %s83_s29 = int_to_ptr.vmem [resolvable:$true] %s82_s29 }
  0x2d   :  { %s4410_s15 = scalar_lea.vmem %s83_s29, 3072  ;;  %p4415_p7 = scmp.lt.s32.totalorder %s83_s29, %s83_s29 }
  0x2e   :  { %p4411_p6 = scmp.ne.s32.totalorder %s83_s29, %s4410_s15  ;;  %p4416_p8 = scmp.lt.s32.totalorder %s4410_s15, %s4410_s15 }
  0x30   :  { %p4417_p9 = por %p4416_p8, %p4415_p7 }
  0x32   :  { %p4418_p10 = pnand %p4417_p9, %p4411_p6 }
  0x34   :  { %4421 = shalt.err (!%p4418_p10)
}
  0x35   :  { %88 = dma.hbm_to_vmem [thread:$0]  %s5611_s8, 3072, %s83_s29, [#allocation8], %s4430_s30, %s4430_s30, %s4431_s14  }
  0x36   :  { %4422 = dma.done.wait [#allocation3], 3072  }
  0x37   :  { %4423 = vsyncadd [#allocation3], 4294964224 }
  0x38   :  { %4424 = dma.done.wait [#allocation5], 6144  }
  0x39   :  { %4425 = vsyncadd [#allocation5], 4294961152 }
  0x3a   :  { %4426 = dma.done.wait [#allocation8], 6144  }
  0x3b   :  { %4427 = vsyncadd [#allocation8], 4294961152  ;;  %v5620_v0 = vmov 0   ;;  %v3950_v1 = vld [vmem:[#allocation4 + $0xac] ss:$12 sps:$4 sm:$0xff]   ;;  %v4550_v35 = vld [vmem:[%s5603_s0] sm:$0xff]  }
  0x3c   :  { %363 = vmatprep.mubr.bf16.mxu1 %v5620_v0  ;;  %596 = vmatprep.mubr.bf16.mxu0 %v5620_v0  ;;  %v3952_v2 = vld [vmem:[#allocation2 + $0xac] ss:$12 sps:$4 sm:$0xff]   ;;  %v3954_v3 = vld [vmem:[#allocation4 + $0xa8] ss:$12 sps:$4 sm:$0xff]   ;;  %v3960_v7 = vld [vmem:[#allocation4 + $0x90] ss:$12 sps:$4 sm:$0xff]  }
  0x3d   :  { %331 = vmatprep.subr.bf16.mxu1 %v3950_v1  ;;  %v3955_v4 = vld [vmem:[#allocation2 + $0xa8] ss:$12 sps:$4 sm:$0xff]   ;;  %564 = vmatprep.subr.bf16.mxu0 %v3952_v2  ;;  %v3961_v8 = vld [vmem:[#allocation2 + $0x90] ss:$12 sps:$4 sm:$0xff]   ;;  %v3966_v11 = vld [vmem:[#allocation4 + $0x78] ss:$12 sps:$4 sm:$0xff]  }
  0x3e   :  { %v3956_v5 = vld [vmem:[#allocation4 + $0x94] ss:$12 sps:$4 sm:$0xff]   ;;  %332 = vmatpush1.bf16.msra.mxu1 %v3954_v3  ;;  %565 = vmatpush1.bf16.msra.mxu0 %v3955_v4  ;;  %v3962_v9 = vld [vmem:[#allocation4 + $0x7c] ss:$12 sps:$4 sm:$0xff]   ;;  %v3967_v12 = vld [vmem:[#allocation2 + $0x78] ss:$12 sps:$4 sm:$0xff]  }
  0x3f   :  { %v3958_v6 = vld [vmem:[#allocation2 + $0x94] ss:$12 sps:$4 sm:$0xff]   ;;  %333 = vmatprep.subr.bf16.mxu1 %v3956_v5  ;;  %v3964_v10 = vld [vmem:[#allocation2 + $0x7c] ss:$12 sps:$4 sm:$0xff]   ;;  %v3968_v13 = vld [vmem:[#allocation4 + $0x64] ss:$12 sps:$4 sm:$0xff]  }
  0x40   :  { %566 = vmatprep.subr.bf16.mxu0 %v3958_v6  ;;  %v3970_v14 = vld [vmem:[#allocation2 + $0x64] ss:$12 sps:$4 sm:$0xff]   ;;  %v3972_v15 = vld [vmem:[#allocation4 + $0x60] ss:$12 sps:$4 sm:$0xff]   ;;  %v3978_v19 = vld [vmem:[#allocation4 + $0x48] ss:$12 sps:$4 sm:$0xff]  }
  0x41   :  { %v3973_v16 = vld [vmem:[#allocation2 + $0x60] ss:$12 sps:$4 sm:$0xff]   ;;  %v3979_v20 = vld [vmem:[#allocation2 + $0x48] ss:$12 sps:$4 sm:$0xff]   ;;  %v3984_v23 = vld [vmem:[#allocation4 + $0x30] ss:$12 sps:$4 sm:$0xff]  }
  0x42   :  { %334 = vmatpush1.bf16.msra.mxu1 %v3960_v7  ;;  %567 = vmatpush1.bf16.msra.mxu0 %v3961_v8  ;;  %v3974_v17 = vld [vmem:[#allocation4 + $0x4c] ss:$12 sps:$4 sm:$0xff]   ;;  %v3980_v21 = vld [vmem:[#allocation4 + $0x34] ss:$12 sps:$4 sm:$0xff]   ;;  %v3985_v24 = vld [vmem:[#allocation2 + $0x30] ss:$12 sps:$4 sm:$0xff]  }
  0x43   :  { %335 = vmatprep.subr.bf16.mxu1 %v3962_v9  ;;  %568 = vmatprep.subr.bf16.mxu0 %v3964_v10  ;;  %v3976_v18 = vld [vmem:[#allocation2 + $0x4c] ss:$12 sps:$4 sm:$0xff]   ;;  %v3982_v22 = vld [vmem:[#allocation2 + $0x34] ss:$12 sps:$4 sm:$0xff]   ;;  %v3986_v25 = vld [vmem:[#allocation4 + $0x1c] ss:$12 sps:$4 sm:$0xff]  }
  0x44   :  { %v3988_v26 = vld [vmem:[#allocation2 + $0x1c] ss:$12 sps:$4 sm:$0xff]   ;;  %v3990_v27 = vld [vmem:[#allocation4 + $0x18] ss:$12 sps:$4 sm:$0xff]   ;;  %v3996_v31 = vld [vmem:[#allocation4] ss:$12 sps:$4 sm:$0xff]  }
  0x45   :  { %v3991_v28 = vld [vmem:[#allocation2 + $0x18] ss:$12 sps:$4 sm:$0xff]   ;;  %v3997_v32 = vld [vmem:[#allocation2] ss:$12 sps:$4 sm:$0xff]   ;;  %v4001_v36 = vld [vmem:[#allocation4 + $0xb0] ss:$12 sps:$4 sm:$0xff]  }
  0x46   :  { %336 = vmatpush1.bf16.msra.mxu1 %v3966_v11  ;;  %569 = vmatpush1.bf16.msra.mxu0 %v3967_v12  ;;  %v3992_v29 = vld [vmem:[#allocation4 + $0x4] ss:$12 sps:$4 sm:$0xff]   ;;  %v4540_v33 = vld [vmem:[#allocation6 + $0xac] ss:$12 sps:$4 sm:$0xff]   ;;  %v4545_v34 = vld [vmem:[%s5604_s1] sm:$0xf] }
  0x47   :  { %337 = vmatprep.subr.bf16.mxu1 %v3968_v13  ;;  %570 = vmatprep.subr.bf16.mxu0 %v3970_v14  ;;  %v3994_v30 = vld [vmem:[#allocation2 + $0x4] ss:$12 sps:$4 sm:$0xff]   ;;  %v4552_v37 = vld [vmem:[#allocation6 + $0xa8] ss:$12 sps:$4 sm:$0xff]   ;;  %v5622_v38 = vmov 0.0   ;;  %vm4437_vm0 = vmmov 0  }
  0x48   :  { %v4556_v39 = vld [vmem:[#allocation6 + $0x94] ss:$12 sps:$4 sm:$0xff]   ;;  %v4005_v40 = vld [vmem:[#allocation4 + $0x98] ss:$12 sps:$4 sm:$0xff]   ;;  %v4561_v41 = vld [vmem:[#allocation6 + $0x90] ss:$12 sps:$4 sm:$0xff]  }
  0x49   :  { %v4565_v42 = vld [vmem:[#allocation6 + $0x7c] ss:$12 sps:$4 sm:$0xff]   ;;  %v4010_v44 = vld [vmem:[#allocation4 + $0x80] ss:$12 sps:$4 sm:$0xff]   ;;  %v4576_v45 = vld [vmem:[#allocation6 + $0x78] ss:$12 sps:$4 sm:$0xff]  }
  0x4a   :  { %338 = vmatpush1.bf16.msra.mxu1 %v3972_v15  ;;  %571 = vmatpush1.bf16.msra.mxu0 %v3973_v16  ;;  %v4571_v43 = vld [vmem:[%s5603_s0 + $0x8] sm:$0xff]   ;;  %v4580_v46 = vld [vmem:[#allocation6 + $0x64] ss:$12 sps:$4 sm:$0xff]   ;;  %v4601_v53 = vld [vmem:[#allocation6 + $0x34] ss:$12 sps:$4 sm:$0xff]   ;;  %v188_v16 = vlaneseq }
  0x4b   :  { %339 = vmatprep.subr.bf16.mxu1 %v3974_v17  ;;  %572 = vmatprep.subr.bf16.mxu0 %v3976_v18  ;;  %v4014_v47 = vld [vmem:[#allocation4 + $0x68] ss:$12 sps:$4 sm:$0xff]   ;;  %v4584_v48 = vld [vmem:[#allocation6 + $0x60] ss:$12 sps:$4 sm:$0xff]   ;;  %v4019_v51 = vld [vmem:[#allocation4 + $0x50] ss:$12 sps:$4 sm:$0xff]  }
  0x4c   :  { %v4588_v49 = vld [vmem:[#allocation6 + $0x4c] ss:$12 sps:$4 sm:$0xff]   ;;  %v4594_v50 = vld [vmem:[%s5603_s0 + $0x10] sm:$0xff]   ;;  %v4609_v56 = vld [vmem:[#allocation6 + $0x1c] ss:$12 sps:$4 sm:$0xff]   ;;  %v4710_v17 = vshrl.u32 %v188_v16, 7 }
  0x4d   :  { %v4597_v52 = vld [vmem:[#allocation6 + $0x48] ss:$12 sps:$4 sm:$0xff]   ;;  %v4023_v54 = vld [vmem:[#allocation4 + $0x38] ss:$12 sps:$4 sm:$0xff]   ;;  %v4605_v55 = vld [vmem:[#allocation6 + $0x30] ss:$12 sps:$4 sm:$0xff]  }
  0x4e   :  { %340 = vmatpush1.bf16.msra.mxu1 %v3978_v19  ;;  %573 = vmatpush1.bf16.msra.mxu0 %v3979_v20  ;;  %v4615_v57 = vld [vmem:[%s5603_s0 + $0x18] sm:$0xff]   ;;  %v4028_v58 = vld [vmem:[#allocation4 + $0x20] ss:$12 sps:$4 sm:$0xff]   ;;  %v4622_v60 = vld [vmem:[#allocation6 + $0x4] ss:$12 sps:$4 sm:$0xff]   ;;  %5626 = vst [vmem:[#allocation13_spill] sm:$0xff] %v4710_v17 }
  0x4f   :  { %341 = vmatprep.subr.bf16.mxu1 %v3980_v21  ;;  %574 = vmatprep.subr.bf16.mxu0 %v3982_v22  ;;  %v4618_v59 = vld [vmem:[#allocation6 + $0x18] ss:$12 sps:$4 sm:$0xff]   ;;  %v4032_v61 = vld [vmem:[#allocation4 + $0x8] ss:$12 sps:$4 sm:$0xff]   ;;  %v4626_v62 = vld [vmem:[#allocation6] ss:$12 sps:$4 sm:$0xff]  }
  0x50   :  { %v4034_v63 = vld [vmem:[#allocation2 + $0xb0] ss:$12 sps:$4 sm:$0xff]   ;;  %v4035_v1 = vld [vmem:[#allocation2 + $0x98] ss:$12 sps:$4 sm:$0xff]   ;;  %v4036_v2 = vld [vmem:[#allocation2 + $0x80] ss:$12 sps:$4 sm:$0xff]  }
  0x51   :  { %v4037_v3 = vld [vmem:[#allocation2 + $0x68] ss:$12 sps:$4 sm:$0xff]   ;;  %v4038_v4 = vld [vmem:[#allocation2 + $0x50] ss:$12 sps:$4 sm:$0xff]   ;;  %v4039_v5 = vld [vmem:[#allocation2 + $0x38] ss:$12 sps:$4 sm:$0xff]  }
  0x52   :  { %342 = vmatpush1.bf16.msra.mxu1 %v3984_v23  ;;  %575 = vmatpush1.bf16.msra.mxu0 %v3985_v24  ;;  %v4040_v6 = vld [vmem:[#allocation2 + $0x20] ss:$12 sps:$4 sm:$0xff]   ;;  %v4041_v7 = vld [vmem:[#allocation2 + $0x8] ss:$12 sps:$4 sm:$0xff]   ;;  %v4651_v8 = vld [vmem:[#allocation6 + $0xb0] ss:$12 sps:$4 sm:$0xff]  }
  0x53   :  { %343 = vmatprep.subr.bf16.mxu1 %v3986_v25  ;;  %576 = vmatprep.subr.bf16.mxu0 %v3988_v26  ;;  %v4658_v9 = vld [vmem:[#allocation6 + $0x98] ss:$12 sps:$4 sm:$0xff]   ;;  %v4663_v10 = vld [vmem:[#allocation6 + $0x80] ss:$12 sps:$4 sm:$0xff]   ;;  %v4668_v11 = vld [vmem:[#allocation6 + $0x68] ss:$12 sps:$4 sm:$0xff]  }
  0x54   :  { %v4674_v12 = vld [vmem:[#allocation6 + $0x50] ss:$12 sps:$4 sm:$0xff]   ;;  %v4678_v13 = vld [vmem:[#allocation6 + $0x38] ss:$12 sps:$4 sm:$0xff]   ;;  %v4682_v14 = vld [vmem:[#allocation6 + $0x20] ss:$12 sps:$4 sm:$0xff]  }
  0x55   :  { %v4686_v15 = vld [vmem:[#allocation6 + $0x8] ss:$12 sps:$4 sm:$0xff]   ;;  %v5619_v18 = vsub.s32 0, %v4710_v17  ;;  %v186_v19 = vld [vmem:[%s5608_s5] sm:$0x7]  ;;  %v5617_v20 = vsub.s32 1, %v4710_v17 }
  0x56   :  { %344 = vmatpush1.bf16.msra.mxu1 %v3990_v27  ;;  %577 = vmatpush1.bf16.msra.mxu0 %v3991_v28 }
  0x57   :  { %345 = vmatprep.subr.bf16.mxu1 %v3992_v29  ;;  %578 = vmatprep.subr.bf16.mxu0 %v3994_v30  ;;  %v191_v21 = vrot.slane %v186_v19, %v5619_v18  ;;  %v195_v22 = vrot.slane %v186_v19, %v5617_v20 }
  0x5a   :  { %346 = vmatpush1.bf16.msra.mxu1 %v3996_v31  ;;  %579 = vmatpush1.bf16.msra.mxu0 %v3997_v32 }
  0x5b   :  { %3528 = vmatprep.subr.bf16.mxu1 %v5622_v38  ;;  %869 = vmatprep.subr.bf16.mxu0 %v4540_v33 }
  0x5d   :  { %364 = vmatmul.mubr.bf16.vlgmr.msra.gmra.mxu1 %v4545_v34  ;;  %597 = vmatmul.mubr.bf16.vlgmr.msra.gmra.mxu0 %v4550_v35 }
  0x5e   :  { %3529 = vmatpush3.bf16.msra.mxu1 %v4001_v36  ;;  %870 = vmatpush1.bf16.msra.mxu0 %v4552_v37 }
  0x5f   :  { %3530 = vmatprep.subr.bf16.mxu1 %v5622_v38  ;;  %871 = vmatprep.subr.bf16.mxu0 %v4556_v39 }
  0x60   :  { %606 = vmatprep.mubr.bf16.mxu0 %v5620_v0  ;;  %3544 = vmatprep.mubr.msk.bf16.mxu1 %vm4437_vm0, %v5622_v38 }
  0x62   :  { %3531 = vmatpush3.bf16.msra.mxu1 %v4005_v40  ;;  %872 = vmatpush1.bf16.msra.mxu0 %v4561_v41 }
  0x63   :  { %3532 = vmatprep.subr.bf16.mxu1 %v5622_v38  ;;  %873 = vmatprep.subr.bf16.mxu0 %v4565_v42 }
  0x65   :  { %607 = vmatmul.mubr.bf16.gmra.mxu0 %v4571_v43 }
  0x66   :  { %3533 = vmatpush3.bf16.msra.mxu1 %v4010_v44  ;;  %874 = vmatpush1.bf16.msra.mxu0 %v4576_v45 }
  0x67   :  { %3534 = vmatprep.subr.bf16.mxu1 %v5622_v38  ;;  %875 = vmatprep.subr.bf16.mxu0 %v4580_v46 }
  0x68   :  { %616 = vmatprep.mubr.bf16.mxu0 %v5620_v0 }
  0x6a   :  { %3535 = vmatpush3.bf16.msra.mxu1 %v4014_v47  ;;  %876 = vmatpush1.bf16.msra.mxu0 %v4584_v48 }
  0x6b   :  { %3536 = vmatprep.subr.bf16.mxu1 %v5622_v38  ;;  %877 = vmatprep.subr.bf16.mxu0 %v4588_v49 }
  0x6d   :  { %617 = vmatmul.mubr.bf16.gmra.mxu0 %v4594_v50 }
  0x6e   :  { %3537 = vmatpush3.bf16.msra.mxu1 %v4019_v51  ;;  %878 = vmatpush1.bf16.msra.mxu0 %v4597_v52 }
  0x6f   :  { %3538 = vmatprep.subr.bf16.mxu1 %v5622_v38  ;;  %879 = vmatprep.subr.bf16.mxu0 %v4601_v53 }
  0x70   :  { %626 = vmatprep.mubr.bf16.mxu0 %v5620_v0 }
  0x72   :  { %3539 = vmatpush3.bf16.msra.mxu1 %v4023_v54  ;;  %880 = vmatpush1.bf16.msra.mxu0 %v4605_v55 }
  0x73   :  { %3540 = vmatprep.subr.bf16.mxu1 %v5622_v38  ;;  %881 = vmatprep.subr.bf16.mxu0 %v4609_v56 }
  0x75   :  { %627 = vmatmul.mubr.bf16.gmra.mxu0 %v4615_v57 }
  0x76   :  { %3541 = vmatpush3.bf16.msra.mxu1 %v4028_v58  ;;  %882 = vmatpush1.bf16.msra.mxu0 %v4618_v59 }
  0x77   :  { %3542 = vmatprep.subr.bf16.mxu1 %v5622_v38  ;;  %883 = vmatprep.subr.bf16.mxu0 %v4622_v60 }
  0x78   :  { %901 = vmatprep.mubr.bf16.mxu0 %v5620_v0 }
  0x7a   :  { %3543 = vmatpush3.bf16.msra.mxu1 %v4032_v61  ;;  %884 = vmatpush1.bf16.msra.mxu0 %v4626_v62 }
  0x7b   :  { %3548 = vmatprep.subr.bf16.mxu1 %v4034_v63  ;;  %973 = vmatprep.subr.bf16.mxu0 %v4540_v33 }
  0x7d   :  { %3545 = vmatmul.mubr.bf16.vlgmr.msra.gmra.mxu1 %v4545_v34  ;;  %902 = vmatmul.mubr.bf16.vlgmr.msra.gmra.mxu0 %v5620_v0 }
  0x7e   :  { %3549 = vmatpush3.bf16.msra.mxu1 %v4034_v63  ;;  %3564 = vmatprep.mubr.bf16.mxu1 %v4550_v35 }
  0x7f   :  { %3550 = vmatprep.subr.bf16.mxu1 %v4035_v1  ;;  %974 = vmatpush1.bf16.msra.mxu0 %v4552_v37 }
  0x80   :  { %975 = vmatprep.subr.bf16.mxu0 %v4556_v39  ;;  %1005 = vmatprep.mubr.bf16.mxu0 %v5620_v0 }
  0x82   :  { %3551 = vmatpush3.bf16.msra.mxu1 %v4035_v1 }
  0x83   :  { %3552 = vmatprep.subr.bf16.mxu1 %v4036_v2  ;;  %976 = vmatpush1.bf16.msra.mxu0 %v4561_v41 }
  0x84   :  { %977 = vmatprep.subr.bf16.mxu0 %v4565_v42 }
  0x86   :  { %3553 = vmatpush3.bf16.msra.mxu1 %v4036_v2 }
  0x87   :  { %3554 = vmatprep.subr.bf16.mxu1 %v4037_v3  ;;  %978 = vmatpush1.bf16.msra.mxu0 %v4576_v45 }
  0x88   :  { %979 = vmatprep.subr.bf16.mxu0 %v4580_v46 }
  0x8a   :  { %3555 = vmatpush3.bf16.msra.mxu1 %v4037_v3 }
  0x8b   :  { %3556 = vmatprep.subr.bf16.mxu1 %v4038_v4  ;;  %980 = vmatpush1.bf16.msra.mxu0 %v4584_v48 }
  0x8c   :  { %981 = vmatprep.subr.bf16.mxu0 %v4588_v49 }
  0x8e   :  { %3557 = vmatpush3.bf16.msra.mxu1 %v4038_v4 }
  0x8f   :  { %3558 = vmatprep.subr.bf16.mxu1 %v4039_v5  ;;  %982 = vmatpush1.bf16.msra.mxu0 %v4597_v52 }
  0x90   :  { %983 = vmatprep.subr.bf16.mxu0 %v4601_v53 }
  0x92   :  { %3559 = vmatpush3.bf16.msra.mxu1 %v4039_v5 }
  0x93   :  { %3560 = vmatprep.subr.bf16.mxu1 %v4040_v6  ;;  %984 = vmatpush1.bf16.msra.mxu0 %v4605_v55 }
  0x94   :  { %985 = vmatprep.subr.bf16.mxu0 %v4609_v56 }
  0x96   :  { %3561 = vmatpush3.bf16.msra.mxu1 %v4040_v6 }
  0x97   :  { %3562 = vmatprep.subr.bf16.mxu1 %v4041_v7  ;;  %986 = vmatpush1.bf16.msra.mxu0 %v4618_v59 }
  0x98   :  { %987 = vmatprep.subr.bf16.mxu0 %v4622_v60 }
  0x9a   :  { %3563 = vmatpush3.bf16.msra.mxu1 %v4041_v7 }
  0x9b   :  { %3572 = vmatprep.subr.bf16.mxu1 %v5622_v38  ;;  %988 = vmatpush1.bf16.msra.mxu0 %v4626_v62 }
  0x9c   :  { %1077 = vmatprep.subr.bf16.mxu0 %v4540_v33 }
  0x9d   :  { %3565 = vmatmul.mubr.bf16.vlgmr.msra.gmra.mxu1 %v4571_v43 }
  0x9e   :  { %3573 = vmatpush3.bf16.msra.mxu1 %v4651_v8  ;;  %3568 = vmatprep.mubr.bf16.mxu1 %v4594_v50 }
  0x9f   :  { %3574 = vmatprep.subr.bf16.mxu1 %v5622_v38 }
  0xa2   :  { %3575 = vmatpush3.bf16.msra.mxu1 %v4658_v9 }
  0xa3   :  { %3576 = vmatprep.subr.bf16.mxu1 %v5622_v38 }
  0xa5   :  { %3569 = vmatmul.mubr.bf16.gmra.mxu1 %v4615_v57 }
  0xa6   :  { %3577 = vmatpush3.bf16.msra.mxu1 %v4663_v10  ;;  %3588 = vmatprep.mubr.msk.bf16.mxu1 %vm4437_vm0, %v5622_v38 }
  0xa7   :  { %3578 = vmatprep.subr.bf16.mxu1 %v5622_v38 }
  0xaa   :  { %3579 = vmatpush3.bf16.msra.mxu1 %v4668_v11 }
  0xab   :  { %3580 = vmatprep.subr.bf16.mxu1 %v5622_v38 }
  0xae   :  { %3581 = vmatpush3.bf16.msra.mxu1 %v4674_v12 }
  0xaf   :  { %3582 = vmatprep.subr.bf16.mxu1 %v5622_v38 }
  0xb2   :  { %3583 = vmatpush3.bf16.msra.mxu1 %v4678_v13 }
  0xb3   :  { %3584 = vmatprep.subr.bf16.mxu1 %v5622_v38 }
  0xb6   :  { %3585 = vmatpush3.bf16.msra.mxu1 %v4682_v14 }
  0xb7   :  { %3586 = vmatprep.subr.bf16.mxu1 %v5622_v38 }
  0xba   :  { %3587 = vmatpush3.bf16.msra.mxu1 %v4686_v15 }
  0xbb   :  { %3592 = vmatprep.subr.bf16.mxu1 %v5622_v38 }
  0xbd   :  { %3589 = vmatmul.mubr.bf16.vlgmr.msra.gmra.mxu1 %v5620_v0 }
  0xbe   :  { %3593 = vmatpush3.bf16.msra.mxu1 %v4651_v8  ;;  %3608 = vmatprep.mubr.msk.bf16.mxu1 %vm4437_vm0, %v5622_v38 }
  0xbf   :  { %3594 = vmatprep.subr.bf16.mxu1 %v5622_v38 }
  0xc2   :  { %3595 = vmatpush3.bf16.msra.mxu1 %v4658_v9 }
  0xc3   :  { %3596 = vmatprep.subr.bf16.mxu1 %v5622_v38 }
  0xc6   :  { %3597 = vmatpush3.bf16.msra.mxu1 %v4663_v10 }
  0xc7   :  { %3598 = vmatprep.subr.bf16.mxu1 %v5622_v38 }
  0xca   :  { %3599 = vmatpush3.bf16.msra.mxu1 %v4668_v11 }
  0xcb   :  { %3600 = vmatprep.subr.bf16.mxu1 %v5622_v38 }
  0xce   :  { %3601 = vmatpush3.bf16.msra.mxu1 %v4674_v12 }
  0xcf   :  { %3602 = vmatprep.subr.bf16.mxu1 %v5622_v38 }
  0xd2   :  { %3603 = vmatpush3.bf16.msra.mxu1 %v4678_v13 }
  0xd3   :  { %3604 = vmatprep.subr.bf16.mxu1 %v5622_v38 }
  0xd6   :  { %3605 = vmatpush3.bf16.msra.mxu1 %v4682_v14 }
  0xd7   :  { %3606 = vmatprep.subr.bf16.mxu1 %v5622_v38 }
  0xda   :  { %3607 = vmatpush3.bf16.msra.mxu1 %v4686_v15 }
  0xdb   :  { %3612 = vmatprep.subr.bf16.mxu1 %v5622_v38 }
 0x11d   :  { %v365_v23 = vpop.f32.mrf.mxu1  ;;  %v598_v24 = vpop.f32.mrf.mxu0 }
 0x11e   :  { %v366_v25 = vadd.f32 %v365_v23, %v191_v21 }
 0x11f   :  { %v367_v26 = vpop.f32.mrf.mxu1  ;;  %v600_v27 = vpop.f32.mrf.mxu0 }
 0x120   :  { %v368_v28 = vadd.f32 %v367_v26, %v195_v22 }
 0x121   :  { %v369_v29 = vpop.f32.mrf.mxu1  ;;  %v602_v30 = vpop.f32.mrf.mxu0 }
 0x122   :  { %v601_v31 = vadd.f32 %v600_v27, %v368_v28  ;;  %v4721_v32 = vadd.f32 %v602_v30, %v366_v25 }
 0x123   :  { %v370_v34 = vpop.f32.mrf.mxu1  ;;  %v604_v35 = vpop.f32.mrf.mxu0 }
 0x124   :  { %v4723_v36 = vadd.f32 %v604_v35, %v368_v28 }
 0x125   :  { %v608_v40 = vpop.f32.mrf.mxu0 }
 0x126   :  { %v4725_v43 = vadd.f32 %v608_v40, %v366_v25 }
 0x127   :  { %v610_v44 = vpop.f32.mrf.mxu0 }
 0x128   :  { %v4727_v47 = vadd.f32 %v610_v44, %v368_v28 }
 0x129   :  { %v612_v50 = vpop.f32.mrf.mxu0 }
 0x12a   :  { %v4729_v51 = vadd.f32 %v612_v50, %v366_v25 }
 0x12b   :  { %v614_v54 = vpop.f32.mrf.mxu0 }
 0x12c   :  { %v4731_v57 = vadd.f32 %v614_v54, %v368_v28 }
 0x12d   :  { %v618_v58 = vpop.f32.mrf.mxu0 }
 0x12e   :  { %v4733_v61 = vadd.f32 %v618_v58, %v366_v25  ;;  %v599_v58 = vadd.f32 %v598_v24, %v366_v25 }
 0x12f   :  { %v620_v63 = vpop.f32.mrf.mxu0 }
 0x130   :  { %v4735_v1 = vadd.f32 %v620_v63, %v368_v28  ;;  %v5618_v63 = vsub.s32 2, %v4710_v17 }
 0x131   :  { %v622_v2 = vpop.f32.mrf.mxu0 }
 0x132   :  { %v4737_v3 = vadd.f32 %v622_v2, %v366_v25 }
 0x133   :  { %v624_v4 = vpop.f32.mrf.mxu0 }
 0x134   :  { %v4739_v5 = vadd.f32 %v624_v4, %v368_v28  ;;  %v199_v4 = vrot.slane %v186_v19, %v5618_v63 }
 0x135   :  { %v628_v6 = vpop.f32.mrf.mxu0 }
 0x136   :  { %v4741_v7 = vadd.f32 %v628_v6, %v366_v25 }
 0x137   :  { %v630_v16 = vpop.f32.mrf.mxu0 }
 0x138   :  { %v4743_v21 = vadd.f32 %v630_v16, %v368_v28 }
 0x139   :  { %v632_v22 = vpop.f32.mrf.mxu0 }
 0x13a   :  { %v4745_v23 = vadd.f32 %v632_v22, %v366_v25 }
 0x13b   :  { %v634_v26 = vpop.f32.mrf.mxu0 }
 0x13c   :  { %v4747_v27 = vadd.f32 %v634_v26, %v368_v28 }
 0x13d   :  { %v406_v29 = vpop.f32.mrf.mxu1  ;;  %v903_v30 = vpop.f32.mrf.mxu0 }
 0x13e   :  { %5627 = vst [vmem:[#allocation14_spill] sm:$0xff] %v4747_v27  ;;  %v950_v2 = vadd.f32 %v903_v30, %v599_v58  ;;  %v407_v16 = vadd.f32 %v406_v29, %v199_v4 }
 0x13f   :  { %v3546_v34 = vpop.f32.mrf.mxu1  ;;  %v905_v35 = vpop.f32.mrf.mxu0 }
 0x140   :  { %v3249_v6 = vmul.f32 -1.442695, %v950_v2 }
 0x141   :  { %v409_v40 = vpop.f32.mrf.mxu1  ;;  %v907_v44 = vpop.f32.mrf.mxu0 }
 0x142   :  { %4122 = vpow2.f32 %v3249_v6  ;;  %v957_v44 = vadd.f32 %v905_v35, %v601_v31  ;;  %v4769_v35 = vld [vmem:[%s5609_s6] ss:$0 sm:$0xff] }
 0x143   :  { %v3547_v50 = vpop.f32.mrf.mxu1  ;;  %v908_v54 = vpop.f32.mrf.mxu0 }
 0x144   :  { %v3250_v54 = vmul.f32 -1.442695, %v957_v44 }
 0x146   :  { %4124 = vpow2.f32 %v3250_v54 }
 0x14f   :  { %v4123_v2 = vpop.eup %4122 }
 0x153   :  { %v4125_v31 = vpop.eup %4124 }
 0x15d   :  { %v3566_v22 = vpop.f32.mrf.mxu1 }
 0x15e   :  { %v4752_v28 = vadd.f32 %v3566_v22, %v407_v16  ;;  %v954_v22 = vadd.f32 1.0, %v4123_v2 }
 0x15f   :  { %v671_v26 = vpop.f32.mrf.mxu1 }
 0x160   :  { %4126 = vrcp.f32 %v954_v22 }
 0x161   :  { %v3567_v34 = vpop.f32.mrf.mxu1 }
 0x162   :  { %v4754_v20 = vadd.f32 %v3567_v34, %v407_v16  ;;  %v961_v34 = vadd.f32 1.0, %v4125_v31 }
 0x163   :  { %v674_v40 = vpop.f32.mrf.mxu1 }
 0x164   :  { %v4756_v50 = vadd.f32 %v674_v40, %v407_v16  ;;  %4128 = vrcp.f32 %v961_v34 }
 0x165   :  { %v3570_v24 = vpop.f32.mrf.mxu1 }
 0x166   :  { %v4758_v25 = vadd.f32 %v3570_v24, %v407_v16 }
 0x167   :  { %v687_v30 = vpop.f32.mrf.mxu1 }
 0x168   :  { %v4760_v19 = vadd.f32 %v687_v30, %v407_v16 }
 0x169   :  { %v3571_v29 = vpop.f32.mrf.mxu1 }
 0x16a   :  { %v4762_v58 = vadd.f32 %v3571_v29, %v407_v16  ;;  %v672_v29 = vadd.f32 %v671_v26, %v407_v16 }
 0x16b   :  { %v690_v4 = vpop.f32.mrf.mxu1 }
 0x16c   :  { %5628 = vst [vmem:[#allocation15_spill] sm:$0xff] %v4762_v58  ;;  %v4764_v6 = vadd.f32 %v690_v4, %v407_v16 }
 0x16d   :  { %v4127_v24 = vpop.eup %4126 }
 0x171   :  { %v4129_v2 = vpop.eup %4128 }
 0x172   :  { %v968_v22 = vsub.f32 1.0, %v4129_v2  ;;  %v970_v17 = vmul.f32 0.0, %v4129_v2 }
 0x17d   :  { %v944_v40 = vpop.f32.mrf.mxu1 }
 0x17e   :  { %v964_v44 = vadd.f32 %v4769_v35, %v944_v40 }
 0x17f   :  { %v3590_v30 = vpop.f32.mrf.mxu1 }
 0x180   :  { %v965_v63 = vmul.f32 %v4127_v24, %v964_v44 }
 0x181   :  { %v947_v54 = vpop.f32.mrf.mxu1 }
 0x182   :  { %v966_v4 = vadd.f32 %v965_v63, %v672_v29  ;;  %v5630_v63 = vmov 0  }
 0x183   :  { %v3591_v18 = vpop.f32.mrf.mxu1 }
 0x184   :  { %4130 = vtanh.f32 %v966_v4  ;;  %v5629_v18 = vmov 0.0  }
 0x191   :  { %v4131_v0 = vpop.eup %4130 }
 0x192   :  { %v969_v38 = vmul.f32 %v4131_v0, %v968_v22 }
 0x194   :  { %v4772_v58 = vadd.f32 %v970_v17, %v969_v38 }
 0x196   :  { %v972_v31 = vpack.c.bf16 %v4772_v58, %v4772_v58 }
 0x198   :  { %1006 = vmatmul.mubr.bf16.vlgmr.msra.gmra.mxu0 %v972_v31  ;;  %3609 = vmatmul.mubr.bf16.vlgmr.msra.gmra.mxu1 %v972_v31 }
 0x199   :  { %1078 = vmatpush1.bf16.msra.mxu0 %v4552_v37  ;;  %3613 = vmatpush3.bf16.msra.mxu1 %v4651_v8 }
 0x19a   :  { %1079 = vmatprep.subr.bf16.mxu0 %v4556_v39  ;;  %3614 = vmatprep.subr.bf16.mxu1 %v5629_v18 }
 0x19b   :  { %1109 = vmatprep.mubr.bf16.mxu0 %v5630_v63  ;;  %3628 = vmatprep.mubr.msk.bf16.mxu1 %vm4437_vm0, %v5629_v18 }
 0x19d   :  { %1080 = vmatpush1.bf16.msra.mxu0 %v4561_v41  ;;  %3615 = vmatpush3.bf16.msra.mxu1 %v4658_v9 }
 0x19e   :  { %1081 = vmatprep.subr.bf16.mxu0 %v4565_v42  ;;  %3616 = vmatprep.subr.bf16.mxu1 %v5629_v18 }
 0x1a1   :  { %1082 = vmatpush1.bf16.msra.mxu0 %v4576_v45  ;;  %3617 = vmatpush3.bf16.msra.mxu1 %v4663_v10 }
 0x1a2   :  { %1083 = vmatprep.subr.bf16.mxu0 %v4580_v46  ;;  %3618 = vmatprep.subr.bf16.mxu1 %v5629_v18 }
 0x1a5   :  { %1084 = vmatpush1.bf16.msra.mxu0 %v4584_v48  ;;  %3619 = vmatpush3.bf16.msra.mxu1 %v4668_v11 }
 0x1a6   :  { %1085 = vmatprep.subr.bf16.mxu0 %v4588_v49  ;;  %3620 = vmatprep.subr.bf16.mxu1 %v5629_v18 }
 0x1a9   :  { %1086 = vmatpush1.bf16.msra.mxu0 %v4597_v52  ;;  %3621 = vmatpush3.bf16.msra.mxu1 %v4674_v12 }
 0x1aa   :  { %1087 = vmatprep.subr.bf16.mxu0 %v4601_v53  ;;  %3622 = vmatprep.subr.bf16.mxu1 %v5629_v18 }
 0x1ad   :  { %1088 = vmatpush1.bf16.msra.mxu0 %v4605_v55  ;;  %3623 = vmatpush3.bf16.msra.mxu1 %v4678_v13 }
 0x1ae   :  { %1089 = vmatprep.subr.bf16.mxu0 %v4609_v56  ;;  %3624 = vmatprep.subr.bf16.mxu1 %v5629_v18 }
 0x1b1   :  { %1090 = vmatpush1.bf16.msra.mxu0 %v4618_v59  ;;  %3625 = vmatpush3.bf16.msra.mxu1 %v4682_v14 }
 0x1b2   :  { %1091 = vmatprep.subr.bf16.mxu0 %v4622_v60  ;;  %3626 = vmatprep.subr.bf16.mxu1 %v5629_v18 }
 0x1b5   :  { %1092 = vmatpush1.bf16.msra.mxu0 %v4626_v62  ;;  %3627 = vmatpush3.bf16.msra.mxu1 %v4686_v15 }
 0x1b6   :  { %1181 = vmatprep.subr.bf16.mxu0 %v4540_v33  ;;  %3632 = vmatprep.subr.bf16.mxu1 %v5629_v18 }
 0x258   :  { %v1007_v0 = vpop.f32.mrf.mxu0  ;;  %v1048_v38 = vpop.f32.mrf.mxu1 }
 0x259   :  { %v1054_v17 = vadd.f32 %v1007_v0, %v4721_v32  ;;  %v1068_v27 = vadd.f32 %v4769_v35, %v1048_v38 }
 0x25a   :  { %v1009_v16 = vpop.f32.mrf.mxu0  ;;  %v3610_v26 = vpop.f32.mrf.mxu1 }
 0x25b   :  { %v3251_v34 = vmul.f32 -1.442695, %v1054_v17  ;;  %v1061_v29 = vadd.f32 %v1009_v16, %v4723_v36 }
 0x25c   :  { %v1011_v40 = vpop.f32.mrf.mxu0  ;;  %v1051_v44 = vpop.f32.mrf.mxu1 }
 0x25d   :  { %4132 = vpow2.f32 %v3251_v34  ;;  %v3252_v54 = vmul.f32 -1.442695, %v1061_v29 }
 0x25e   :  { %v1012_v24 = vpop.f32.mrf.mxu0  ;;  %v3611_v30 = vpop.f32.mrf.mxu1 }
 0x25f   :  { %4134 = vpow2.f32 %v3252_v54 }
 0x26a   :  { %v4133_v4 = vpop.eup %4132 }
 0x26b   :  { %v1058_v2 = vadd.f32 1.0, %v4133_v4 }
 0x26c   :  { %v4135_v22 = vpop.eup %4134 }
 0x26d   :  { %4136 = vrcp.f32 %v1058_v2  ;;  %v1065_v31 = vadd.f32 1.0, %v4135_v22 }
 0x26f   :  { %4138 = vrcp.f32 %v1065_v31 }
 0x27a   :  { %v4137_v32 = vpop.eup %4136 }
 0x27b   :  { %v1069_v0 = vmul.f32 %v4137_v32, %v1068_v27 }
 0x27c   :  { %v4139_v26 = vpop.eup %4138 }
 0x27d   :  { %v1070_v17 = vadd.f32 %v1069_v0, %v4756_v50  ;;  %v1072_v34 = vsub.f32 1.0, %v4139_v26  ;;  %v1074_v36 = vmul.f32 %v4139_v26, %v4772_v58 }
 0x27f   :  { %4140 = vtanh.f32 %v1070_v17 }
 0x28c   :  { %v4141_v40 = vpop.eup %4140 }
 0x28d   :  { %v1073_v44 = vmul.f32 %v4141_v40, %v1072_v34 }
 0x28f   :  { %v4816_v16 = vadd.f32 %v1074_v36, %v1073_v44 }
 0x291   :  { %v1076_v24 = vpack.c.bf16 %v4816_v16, %v4816_v16 }
 0x293   :  { %1110 = vmatmul.mubr.bf16.vlgmr.msra.gmra.mxu0 %v1076_v24  ;;  %3629 = vmatmul.mubr.bf16.vlgmr.msra.gmra.mxu1 %v1076_v24 }
 0x294   :  { %1182 = vmatpush1.bf16.msra.mxu0 %v4552_v37  ;;  %3633 = vmatpush3.bf16.msra.mxu1 %v4651_v8 }
 0x295   :  { %1183 = vmatprep.subr.bf16.mxu0 %v4556_v39  ;;  %3634 = vmatprep.subr.bf16.mxu1 %v5629_v18 }
 0x296   :  { %1213 = vmatprep.mubr.bf16.mxu0 %v5630_v63  ;;  %3648 = vmatprep.mubr.msk.bf16.mxu1 %vm4437_vm0, %v5629_v18 }
 0x298   :  { %1184 = vmatpush1.bf16.msra.mxu0 %v4561_v41  ;;  %3635 = vmatpush3.bf16.msra.mxu1 %v4658_v9 }
 0x299   :  { %1185 = vmatprep.subr.bf16.mxu0 %v4565_v42  ;;  %3636 = vmatprep.subr.bf16.mxu1 %v5629_v18 }
 0x29c   :  { %1186 = vmatpush1.bf16.msra.mxu0 %v4576_v45  ;;  %3637 = vmatpush3.bf16.msra.mxu1 %v4663_v10 }
 0x29d   :  { %1187 = vmatprep.subr.bf16.mxu0 %v4580_v46  ;;  %3638 = vmatprep.subr.bf16.mxu1 %v5629_v18 }
 0x2a0   :  { %1188 = vmatpush1.bf16.msra.mxu0 %v4584_v48  ;;  %3639 = vmatpush3.bf16.msra.mxu1 %v4668_v11 }
 0x2a1   :  { %1189 = vmatprep.subr.bf16.mxu0 %v4588_v49  ;;  %3640 = vmatprep.subr.bf16.mxu1 %v5629_v18 }
 0x2a4   :  { %1190 = vmatpush1.bf16.msra.mxu0 %v4597_v52  ;;  %3641 = vmatpush3.bf16.msra.mxu1 %v4674_v12 }
 0x2a5   :  { %1191 = vmatprep.subr.bf16.mxu0 %v4601_v53  ;;  %3642 = vmatprep.subr.bf16.mxu1 %v5629_v18 }
 0x2a8   :  { %1192 = vmatpush1.bf16.msra.mxu0 %v4605_v55  ;;  %3643 = vmatpush3.bf16.msra.mxu1 %v4678_v13 }
 0x2a9   :  { %1193 = vmatprep.subr.bf16.mxu0 %v4609_v56  ;;  %3644 = vmatprep.subr.bf16.mxu1 %v5629_v18 }
 0x2ac   :  { %1194 = vmatpush1.bf16.msra.mxu0 %v4618_v59  ;;  %3645 = vmatpush3.bf16.msra.mxu1 %v4682_v14 }
 0x2ad   :  { %1195 = vmatprep.subr.bf16.mxu0 %v4622_v60  ;;  %3646 = vmatprep.subr.bf16.mxu1 %v5629_v18 }
 0x2b0   :  { %1196 = vmatpush1.bf16.msra.mxu0 %v4626_v62  ;;  %3647 = vmatpush3.bf16.msra.mxu1 %v4686_v15 }
 0x2b1   :  { %1285 = vmatprep.subr.bf16.mxu0 %v4540_v33  ;;  %3652 = vmatprep.subr.bf16.mxu1 %v5629_v18 }
 0x353   :  { %v1111_v37 = vpop.f32.mrf.mxu0  ;;  %v1152_v39 = vpop.f32.mrf.mxu1 }
 0x354   :  { %v1158_v41 = vadd.f32 %v1111_v37, %v4725_v43  ;;  %v1172_v0 = vadd.f32 %v4769_v35, %v1152_v39  ;;  %v4864_v39 = vld [vmem:[#allocation6 + $0xa8] ss:$12 sps:$4 sm:$0xff]  }
 0x355   :  { %v1113_v42 = vpop.f32.mrf.mxu0  ;;  %v3630_v27 = vpop.f32.mrf.mxu1 }
 0x356   :  { %v3253_v50 = vmul.f32 -1.442695, %v1158_v41  ;;  %v1165_v4 = vadd.f32 %v1113_v42, %v4727_v47  ;;  %v4875_v41 = vld [vmem:[#allocation6 + $0x90] ss:$12 sps:$4 sm:$0xff]  }
 0x357   :  { %v1115_v38 = vpop.f32.mrf.mxu0  ;;  %v1155_v30 = vpop.f32.mrf.mxu1  ;;  %v4879_v42 = vld [vmem:[#allocation6 + $0x7c] ss:$12 sps:$4 sm:$0xff]  }
 0x358   :  { %4142 = vpow2.f32 %v3253_v50  ;;  %v3254_v2 = vmul.f32 -1.442695, %v1165_v4 }
 0x359   :  { %v1116_v29 = vpop.f32.mrf.mxu0  ;;  %v3631_v54 = vpop.f32.mrf.mxu1 }
 0x35a   :  { %4144 = vpow2.f32 %v3254_v2 }
 0x365   :  { %v4143_v22 = vpop.eup %4142 }
 0x366   :  { %v1162_v33 = vadd.f32 1.0, %v4143_v22 }
 0x367   :  { %v4145_v31 = vpop.eup %4144 }
 0x368   :  { %4146 = vrcp.f32 %v1162_v33  ;;  %v1169_v32 = vadd.f32 1.0, %v4145_v31 }
 0x36a   :  { %4148 = vrcp.f32 %v1169_v32 }
 0x375   :  { %v4147_v43 = vpop.eup %4146 }
 0x376   :  { %v1173_v17 = vmul.f32 %v4147_v43, %v1172_v0 }
 0x377   :  { %v4149_v34 = vpop.eup %4148 }
 0x378   :  { %v1174_v26 = vadd.f32 %v1173_v17, %v4752_v28  ;;  %v1176_v40 = vsub.f32 1.0, %v4149_v34  ;;  %v1178_v47 = vmul.f32 %v4149_v34, %v4816_v16  ;;  %v4868_v28 = vld [vmem:[#allocation6 + $0x94] ss:$12 sps:$4 sm:$0xff]  }
 0x379   :  { %v4937_v34 = vld [vmem:[#allocation6 + $0x60] ss:$12 sps:$4 sm:$0xff]  }
 0x37a   :  { %4150 = vtanh.f32 %v1174_v26  ;;  %v4933_v26 = vld [vmem:[#allocation6 + $0x64] ss:$12 sps:$4 sm:$0xff]  }
 0x387   :  { %v4151_v44 = vpop.eup %4150 }
 0x388   :  { %v1177_v36 = vmul.f32 %v4151_v44, %v1176_v40  ;;  %v4941_v40 = vld [vmem:[#allocation6 + $0x4c] ss:$12 sps:$4 sm:$0xff]   ;;  %v4945_v44 = vld [vmem:[#allocation6 + $0x48] ss:$12 sps:$4 sm:$0xff]  }
 0x38a   :  { %v4860_v24 = vadd.f32 %v1178_v47, %v1177_v36  ;;  %v4949_v36 = vld [vmem:[#allocation6 + $0x34] ss:$12 sps:$4 sm:$0xff]   ;;  %v4953_v47 = vld [vmem:[#allocation6 + $0x30] ss:$12 sps:$4 sm:$0xff]  }
 0x38c   :  { %v1180_v37 = vpack.c.bf16 %v4860_v24, %v4860_v24 }
 0x38e   :  { %1214 = vmatmul.mubr.bf16.vlgmr.msra.gmra.mxu0 %v1180_v37  ;;  %3649 = vmatmul.mubr.bf16.vlgmr.msra.gmra.mxu1 %v1180_v37  ;;  %v4957_v37 = vld [vmem:[#allocation6 + $0x1c] ss:$12 sps:$4 sm:$0xff]  }
 0x38f   :  { %1286 = vmatpush1.bf16.msra.mxu0 %v4864_v39  ;;  %3653 = vmatpush3.bf16.msra.mxu1 %v4651_v8 }
 0x390   :  { %1287 = vmatprep.subr.bf16.mxu0 %v4868_v28  ;;  %3654 = vmatprep.subr.bf16.mxu1 %v5629_v18 }
 0x391   :  { %1317 = vmatprep.mubr.bf16.mxu0 %v5630_v63  ;;  %3668 = vmatprep.mubr.msk.bf16.mxu1 %vm4437_vm0, %v5629_v18 }
 0x393   :  { %1288 = vmatpush1.bf16.msra.mxu0 %v4875_v41  ;;  %3655 = vmatpush3.bf16.msra.mxu1 %v4658_v9 }
 0x394   :  { %1289 = vmatprep.subr.bf16.mxu0 %v4879_v42  ;;  %3656 = vmatprep.subr.bf16.mxu1 %v5629_v18 }
 0x397   :  { %1290 = vmatpush1.bf16.msra.mxu0 %v4576_v45  ;;  %3657 = vmatpush3.bf16.msra.mxu1 %v4663_v10  ;;  %v4905_v45 = vld [vmem:[#allocation6 + $0xac] ss:$12 sps:$4 sm:$0xff]  }
 0x398   :  { %1291 = vmatprep.subr.bf16.mxu0 %v4580_v46  ;;  %3658 = vmatprep.subr.bf16.mxu1 %v5629_v18 }
 0x39b   :  { %1292 = vmatpush1.bf16.msra.mxu0 %v4584_v48  ;;  %3659 = vmatpush3.bf16.msra.mxu1 %v4668_v11 }
 0x39c   :  { %1293 = vmatprep.subr.bf16.mxu0 %v4588_v49  ;;  %3660 = vmatprep.subr.bf16.mxu1 %v5629_v18 }
 0x39f   :  { %1294 = vmatpush1.bf16.msra.mxu0 %v4597_v52  ;;  %3661 = vmatpush3.bf16.msra.mxu1 %v4674_v12 }
 0x3a0   :  { %1295 = vmatprep.subr.bf16.mxu0 %v4601_v53  ;;  %3662 = vmatprep.subr.bf16.mxu1 %v5629_v18 }
 0x3a3   :  { %1296 = vmatpush1.bf16.msra.mxu0 %v4605_v55  ;;  %3663 = vmatpush3.bf16.msra.mxu1 %v4678_v13 }
 0x3a4   :  { %1297 = vmatprep.subr.bf16.mxu0 %v4609_v56  ;;  %3664 = vmatprep.subr.bf16.mxu1 %v5629_v18 }
 0x3a7   :  { %1298 = vmatpush1.bf16.msra.mxu0 %v4618_v59  ;;  %3665 = vmatpush3.bf16.msra.mxu1 %v4682_v14 }
 0x3a8   :  { %1299 = vmatprep.subr.bf16.mxu0 %v4622_v60  ;;  %3666 = vmatprep.subr.bf16.mxu1 %v5629_v18 }
 0x3ab   :  { %1300 = vmatpush1.bf16.msra.mxu0 %v4626_v62  ;;  %3667 = vmatpush3.bf16.msra.mxu1 %v4686_v15 }
 0x3ac   :  { %1389 = vmatprep.subr.bf16.mxu0 %v4905_v45  ;;  %3672 = vmatprep.subr.bf16.mxu1 %v5629_v18 }
 0x44e   :  { %v1215_v46 = vpop.f32.mrf.mxu0  ;;  %v1256_v48 = vpop.f32.mrf.mxu1 }
 0x44f   :  { %v1262_v49 = vadd.f32 %v1215_v46, %v4729_v51  ;;  %v1276_v4 = vadd.f32 %v4769_v35, %v1256_v48  ;;  %v4961_v46 = vld [vmem:[#allocation6 + $0x18] ss:$12 sps:$4 sm:$0xff]  }
 0x450   :  { %v1217_v52 = vpop.f32.mrf.mxu0  ;;  %v3650_v53 = vpop.f32.mrf.mxu1  ;;  %v4965_v48 = vld [vmem:[#allocation6 + $0x4] ss:$12 sps:$4 sm:$0xff]  }
 0x451   :  { %v3255_v55 = vmul.f32 -1.442695, %v1262_v49  ;;  %v1269_v27 = vadd.f32 %v1217_v52, %v4731_v57  ;;  %v4969_v49 = vld [vmem:[#allocation6] ss:$12 sps:$4 sm:$0xff]  }
 0x452   :  { %v1219_v56 = vpop.f32.mrf.mxu0  ;;  %v1259_v59 = vpop.f32.mrf.mxu1 }
 0x453   :  { %4152 = vpow2.f32 %v3255_v55  ;;  %v3256_v50 = vmul.f32 -1.442695, %v1269_v27 }
 0x454   :  { %v1220_v60 = vpop.f32.mrf.mxu0  ;;  %v3651_v62 = vpop.f32.mrf.mxu1 }
 0x455   :  { %4154 = vpow2.f32 %v3256_v50 }
 0x460   :  { %v4153_v38 = vpop.eup %4152 }
 0x461   :  { %v1266_v30 = vadd.f32 1.0, %v4153_v38 }
 0x462   :  { %v4155_v29 = vpop.eup %4154 }
 0x463   :  { %4156 = vrcp.f32 %v1266_v30  ;;  %v1273_v54 = vadd.f32 1.0, %v4155_v29 }
 0x465   :  { %4158 = vrcp.f32 %v1273_v54 }
 0x470   :  { %v4157_v51 = vpop.eup %4156 }
 0x471   :  { %v1277_v2 = vmul.f32 %v4157_v51, %v1276_v4 }
 0x472   :  { %v4159_v33 = vpop.eup %4158 }
 0x473   :  { %v1278_v22 = vadd.f32 %v1277_v2, %v4754_v20  ;;  %v1280_v31 = vsub.f32 1.0, %v4159_v33  ;;  %v1282_v57 = vmul.f32 %v4159_v33, %v4860_v24  ;;  %v4929_v20 = vld [vmem:[#allocation6 + $0x78] ss:$12 sps:$4 sm:$0xff]  }
 0x475   :  { %4160 = vtanh.f32 %v1278_v22 }
 0x482   :  { %v4161_v32 = vpop.eup %4160 }
 0x483   :  { %v1281_v0 = vmul.f32 %v4161_v32, %v1280_v31 }
 0x485   :  { %v4914_v43 = vadd.f32 %v1282_v57, %v1281_v0 }
 0x487   :  { %v1284_v17 = vpack.c.bf16 %v4914_v43, %v4914_v43 }
 0x489   :  { %1318 = vmatmul.mubr.bf16.vlgmr.msra.gmra.mxu0 %v1284_v17  ;;  %3669 = vmatmul.mubr.bf16.vlgmr.msra.gmra.mxu1 %v1284_v17 }
 0x48a   :  { %1390 = vmatpush1.bf16.msra.mxu0 %v4864_v39  ;;  %3673 = vmatpush3.bf16.msra.mxu1 %v4651_v8 }
 0x48b   :  { %1391 = vmatprep.subr.bf16.mxu0 %v4868_v28  ;;  %3674 = vmatprep.subr.bf16.mxu1 %v5629_v18 }
 0x48c   :  { %1421 = vmatprep.mubr.bf16.mxu0 %v5630_v63  ;;  %3688 = vmatprep.mubr.msk.bf16.mxu1 %vm4437_vm0, %v5629_v18 }
 0x48e   :  { %1392 = vmatpush1.bf16.msra.mxu0 %v4875_v41  ;;  %3675 = vmatpush3.bf16.msra.mxu1 %v4658_v9 }
 0x48f   :  { %1393 = vmatprep.subr.bf16.mxu0 %v4879_v42  ;;  %3676 = vmatprep.subr.bf16.mxu1 %v5629_v18 }
 0x492   :  { %1394 = vmatpush1.bf16.msra.mxu0 %v4929_v20  ;;  %3677 = vmatpush3.bf16.msra.mxu1 %v4663_v10 }
 0x493   :  { %1395 = vmatprep.subr.bf16.mxu0 %v4933_v26  ;;  %3678 = vmatprep.subr.bf16.mxu1 %v5629_v18 }
 0x496   :  { %1396 = vmatpush1.bf16.msra.mxu0 %v4937_v34  ;;  %3679 = vmatpush3.bf16.msra.mxu1 %v4668_v11 }
 0x497   :  { %1397 = vmatprep.subr.bf16.mxu0 %v4941_v40  ;;  %3680 = vmatprep.subr.bf16.mxu1 %v5629_v18 }
 0x49a   :  { %1398 = vmatpush1.bf16.msra.mxu0 %v4945_v44  ;;  %3681 = vmatpush3.bf16.msra.mxu1 %v4674_v12 }
 0x49b   :  { %1399 = vmatprep.subr.bf16.mxu0 %v4949_v36  ;;  %3682 = vmatprep.subr.bf16.mxu1 %v5629_v18 }
 0x49e   :  { %1400 = vmatpush1.bf16.msra.mxu0 %v4953_v47  ;;  %3683 = vmatpush3.bf16.msra.mxu1 %v4678_v13 }
 0x49f   :  { %1401 = vmatprep.subr.bf16.mxu0 %v4957_v37  ;;  %3684 = vmatprep.subr.bf16.mxu1 %v5629_v18 }
 0x4a2   :  { %1402 = vmatpush1.bf16.msra.mxu0 %v4961_v46  ;;  %3685 = vmatpush3.bf16.msra.mxu1 %v4682_v14 }
 0x4a3   :  { %1403 = vmatprep.subr.bf16.mxu0 %v4965_v48  ;;  %3686 = vmatprep.subr.bf16.mxu1 %v5629_v18 }
 0x4a6   :  { %1404 = vmatpush1.bf16.msra.mxu0 %v4969_v49  ;;  %3687 = vmatpush3.bf16.msra.mxu1 %v4686_v15 }
 0x4a7   :  { %1493 = vmatprep.subr.bf16.mxu0 %v4905_v45  ;;  %3692 = vmatprep.subr.bf16.mxu1 %v5629_v18 }
 0x549   :  { %v1319_v52 = vpop.f32.mrf.mxu0  ;;  %v1360_v53 = vpop.f32.mrf.mxu1 }
 0x54a   :  { %v1366_v55 = vadd.f32 %v1319_v52, %v4733_v61  ;;  %v1380_v22 = vadd.f32 %v4769_v35, %v1360_v53 }
 0x54b   :  { %v1321_v56 = vpop.f32.mrf.mxu0  ;;  %v3670_v59 = vpop.f32.mrf.mxu1 }
 0x54c   :  { %v3257_v60 = vmul.f32 -1.442695, %v1366_v55  ;;  %v1373_v30 = vadd.f32 %v1321_v56, %v4735_v1 }
 0x54d   :  { %v1323_v62 = vpop.f32.mrf.mxu0  ;;  %v1363_v27 = vpop.f32.mrf.mxu1 }
 0x54e   :  { %4162 = vpow2.f32 %v3257_v60  ;;  %v3258_v29 = vmul.f32 -1.442695, %v1373_v30 }
 0x54f   :  { %v1324_v50 = vpop.f32.mrf.mxu0  ;;  %v3671_v38 = vpop.f32.mrf.mxu1 }
 0x550   :  { %4164 = vpow2.f32 %v3258_v29 }
 0x55b   :  { %v4163_v54 = vpop.eup %4162 }
 0x55c   :  { %v1370_v4 = vadd.f32 1.0, %v4163_v54 }
 0x55d   :  { %v4165_v51 = vpop.eup %4164 }
 0x55e   :  { %4166 = vrcp.f32 %v1370_v4  ;;  %v1377_v2 = vadd.f32 1.0, %v4165_v51 }
 0x560   :  { %4168 = vrcp.f32 %v1377_v2 }
 0x56b   :  { %v4167_v61 = vpop.eup %4166 }
 0x56c   :  { %v1381_v33 = vmul.f32 %v4167_v61, %v1380_v22 }
 0x56d   :  { %v4169_v32 = vpop.eup %4168 }
 0x56e   :  { %v1382_v31 = vadd.f32 %v1381_v33, %v4760_v19  ;;  %v1384_v0 = vsub.f32 1.0, %v4169_v32  ;;  %v1386_v1 = vmul.f32 %v4169_v32, %v4914_v43 }
 0x570   :  { %4170 = vtanh.f32 %v1382_v31 }
 0x57d   :  { %v4171_v57 = vpop.eup %4170 }
 0x57e   :  { %v1385_v17 = vmul.f32 %v4171_v57, %v1384_v0 }
 0x580   :  { %v4980_v52 = vadd.f32 %v1386_v1, %v1385_v17 }
 0x582   :  { %v1388_v55 = vpack.c.bf16 %v4980_v52, %v4980_v52 }
 0x584   :  { %1422 = vmatmul.mubr.bf16.vlgmr.msra.gmra.mxu0 %v1388_v55  ;;  %3689 = vmatmul.mubr.bf16.vlgmr.msra.gmra.mxu1 %v1388_v55 }
 0x585   :  { %1494 = vmatpush1.bf16.msra.mxu0 %v4864_v39  ;;  %3693 = vmatpush3.bf16.msra.mxu1 %v4651_v8 }
 0x586   :  { %1495 = vmatprep.subr.bf16.mxu0 %v4868_v28  ;;  %3694 = vmatprep.subr.bf16.mxu1 %v5629_v18 }
 0x587   :  { %1525 = vmatprep.mubr.bf16.mxu0 %v5630_v63  ;;  %3708 = vmatprep.mubr.msk.bf16.mxu1 %vm4437_vm0, %v5629_v18 }
 0x589   :  { %1496 = vmatpush1.bf16.msra.mxu0 %v4875_v41  ;;  %3695 = vmatpush3.bf16.msra.mxu1 %v4658_v9 }
 0x58a   :  { %1497 = vmatprep.subr.bf16.mxu0 %v4879_v42  ;;  %3696 = vmatprep.subr.bf16.mxu1 %v5629_v18 }
 0x58d   :  { %1498 = vmatpush1.bf16.msra.mxu0 %v4929_v20  ;;  %3697 = vmatpush3.bf16.msra.mxu1 %v4663_v10 }
 0x58e   :  { %1499 = vmatprep.subr.bf16.mxu0 %v4933_v26  ;;  %3698 = vmatprep.subr.bf16.mxu1 %v5629_v18 }
 0x591   :  { %1500 = vmatpush1.bf16.msra.mxu0 %v4937_v34  ;;  %3699 = vmatpush3.bf16.msra.mxu1 %v4668_v11 }
 0x592   :  { %1501 = vmatprep.subr.bf16.mxu0 %v4941_v40  ;;  %3700 = vmatprep.subr.bf16.mxu1 %v5629_v18 }
 0x595   :  { %1502 = vmatpush1.bf16.msra.mxu0 %v4945_v44  ;;  %3701 = vmatpush3.bf16.msra.mxu1 %v4674_v12 }
 0x596   :  { %1503 = vmatprep.subr.bf16.mxu0 %v4949_v36  ;;  %3702 = vmatprep.subr.bf16.mxu1 %v5629_v18 }
 0x599   :  { %1504 = vmatpush1.bf16.msra.mxu0 %v4953_v47  ;;  %3703 = vmatpush3.bf16.msra.mxu1 %v4678_v13 }
 0x59a   :  { %1505 = vmatprep.subr.bf16.mxu0 %v4957_v37  ;;  %3704 = vmatprep.subr.bf16.mxu1 %v5629_v18 }
 0x59d   :  { %1506 = vmatpush1.bf16.msra.mxu0 %v4961_v46  ;;  %3705 = vmatpush3.bf16.msra.mxu1 %v4682_v14 }
 0x59e   :  { %1507 = vmatprep.subr.bf16.mxu0 %v4965_v48  ;;  %3706 = vmatprep.subr.bf16.mxu1 %v5629_v18 }
 0x5a1   :  { %1508 = vmatpush1.bf16.msra.mxu0 %v4969_v49  ;;  %3707 = vmatpush3.bf16.msra.mxu1 %v4686_v15 }
 0x5a2   :  { %1597 = vmatprep.subr.bf16.mxu0 %v4905_v45  ;;  %3712 = vmatprep.subr.bf16.mxu1 %v5629_v18 }
 0x644   :  { %v1423_v19 = vpop.f32.mrf.mxu0  ;;  %v1464_v53 = vpop.f32.mrf.mxu1 }
 0x645   :  { %v1470_v56 = vadd.f32 %v1423_v19, %v4737_v3  ;;  %v1484_v22 = vadd.f32 %v4769_v35, %v1464_v53  ;;  %v4050_v53 = vld [vmem:[#allocation7 + $0xa8] ss:$12 sps:$4 sm:$0xff]  }
 0x646   :  { %v1425_v59 = vpop.f32.mrf.mxu0  ;;  %v3690_v60 = vpop.f32.mrf.mxu1 }
 0x647   :  { %v3259_v62 = vmul.f32 -1.442695, %v1470_v56  ;;  %v1477_v29 = vadd.f32 %v1425_v59, %v4739_v5  ;;  %v4056_v59 = vld [vmem:[#allocation7 + $0x94] ss:$12 sps:$4 sm:$0xff]   ;;  %v4054_v60 = vld [vmem:[#allocation7 + $0x90] ss:$12 sps:$4 sm:$0xff]  }
 0x648   :  { %v1427_v27 = vpop.f32.mrf.mxu0  ;;  %v1467_v50 = vpop.f32.mrf.mxu1 }
 0x649   :  { %4172 = vpow2.f32 %v3259_v62  ;;  %v3260_v54 = vmul.f32 -1.442695, %v1477_v29  ;;  %v4060_v62 = vld [vmem:[#allocation7 + $0x7c] ss:$12 sps:$4 sm:$0xff]   ;;  %v4061_v27 = vld [vmem:[#allocation7 + $0x80] ss:$12 sps:$4 sm:$0xff]  }
 0x64a   :  { %v1428_v38 = vpop.f32.mrf.mxu0  ;;  %v3691_v30 = vpop.f32.mrf.mxu1  ;;  %v4058_v50 = vld [vmem:[#allocation7 + $0x78] ss:$12 sps:$4 sm:$0xff]   ;;  %v4069_v29 = vld [vmem:[#allocation7 + $0x50] ss:$12 sps:$4 sm:$0xff]  }
 0x64b   :  { %4174 = vpow2.f32 %v3260_v54  ;;  %v4064_v38 = vld [vmem:[#allocation7 + $0x64] ss:$12 sps:$4 sm:$0xff]   ;;  %v4065_v30 = vld [vmem:[#allocation7 + $0x68] ss:$12 sps:$4 sm:$0xff]  }
 0x64c   :  { %v4066_v54 = vld [vmem:[#allocation7 + $0x48] ss:$12 sps:$4 sm:$0xff]  }
 0x656   :  { %v4173_v4 = vpop.eup %4172 }
 0x657   :  { %v1474_v45 = vadd.f32 1.0, %v4173_v4  ;;  %v4072_v4 = vld [vmem:[#allocation7 + $0x34] ss:$12 sps:$4 sm:$0xff]  }
 0x658   :  { %v4175_v51 = vpop.eup %4174 }
 0x659   :  { %4176 = vrcp.f32 %v1474_v45  ;;  %v1481_v2 = vadd.f32 1.0, %v4175_v51  ;;  %v4073_v45 = vld [vmem:[#allocation7 + $0x38] ss:$12 sps:$4 sm:$0xff]   ;;  %v4070_v51 = vld [vmem:[#allocation7 + $0x30] ss:$12 sps:$4 sm:$0xff]  }
 0x65b   :  { %4178 = vrcp.f32 %v1481_v2  ;;  %v4076_v2 = vld [vmem:[#allocation7 + $0x1c] ss:$12 sps:$4 sm:$0xff]  }
 0x666   :  { %v4177_v3 = vpop.eup %4176 }
 0x667   :  { %v1485_v61 = vmul.f32 %v4177_v3, %v1484_v22  ;;  %v4077_v22 = vld [vmem:[#allocation7 + $0x20] ss:$12 sps:$4 sm:$0xff]   ;;  %v4074_v3 = vld [vmem:[#allocation7 + $0x18] ss:$12 sps:$4 sm:$0xff]  }
 0x668   :  { %v4179_v31 = vpop.eup %4178 }
 0x669   :  { %v1486_v33 = vadd.f32 %v1485_v61, %v4764_v6  ;;  %v1488_v32 = vsub.f32 1.0, %v4179_v31  ;;  %v1490_v5 = vmul.f32 %v4179_v31, %v4980_v52  ;;  %v4080_v61 = vld [vmem:[#allocation7 + $0x4] ss:$12 sps:$4 sm:$0xff]   ;;  %v4078_v31 = vld [vmem:[#allocation7] ss:$12 sps:$4 sm:$0xff]  }
 0x66b   :  { %4180 = vtanh.f32 %v1486_v33  ;;  %v4081_v33 = vld [vmem:[#allocation7 + $0x8] ss:$12 sps:$4 sm:$0xff]  }
 0x678   :  { %v4181_v0 = vpop.eup %4180 }
 0x679   :  { %v1489_v57 = vmul.f32 %v4181_v0, %v1488_v32  ;;  %v1701_v32 = vpack.c.bf16 %v4914_v43, %v4860_v24  ;;  %v5087_v24 = vld [vmem:[#allocation9 + $0x94] ss:$12 sps:$4 sm:$0xff]   ;;  %v5089_v43 = vld [vmem:[#allocation9 + $0x90] ss:$12 sps:$4 sm:$0xff]  }
 0x67b   :  { %v5024_v17 = vadd.f32 %v1490_v5, %v1489_v57  ;;  %v5081_v57 = vld [vmem:[#allocation9 + $0xac] ss:$12 sps:$4 sm:$0xff]   ;;  %v5083_v5 = vld [vmem:[#allocation9 + $0xa8] ss:$12 sps:$4 sm:$0xff]  }
 0x67d   :  { %v1492_v1 = vpack.c.bf16 %v5024_v17, %v5024_v17  ;;  %v1702_v0 = vpack.c.bf16 %v5024_v17, %v4980_v52  ;;  %v5093_v52 = vld [vmem:[#allocation9 + $0x7c] ss:$12 sps:$4 sm:$0xff]  }
 0x67f   :  { %1526 = vmatmul.mubr.bf16.vlgmr.msra.gmra.mxu0 %v1492_v1  ;;  %3709 = vmatmul.mubr.bf16.vlgmr.msra.gmra.mxu1 %v1492_v1  ;;  %v5099_v1 = vld [vmem:[#allocation9 + $0x64] ss:$12 sps:$4 sm:$0xff]  }
 0x680   :  { %1598 = vmatpush1.bf16.msra.mxu0 %v4864_v39  ;;  %3713 = vmatpush3.bf16.msra.mxu1 %v4651_v8  ;;  %v4052_v8 = vld [vmem:[#allocation7 + $0xac] ss:$12 sps:$4 sm:$0xff]  }
 0x681   :  { %1599 = vmatprep.subr.bf16.mxu0 %v4868_v28  ;;  %3714 = vmatprep.subr.bf16.mxu1 %v5629_v18 }
 0x682   :  { %1629 = vmatprep.mubr.bf16.mxu0 %v5630_v63  ;;  %3728 = vmatprep.mubr.msk.bf16.mxu1 %vm4437_vm0, %v5629_v18 }
 0x684   :  { %1600 = vmatpush1.bf16.msra.mxu0 %v4875_v41  ;;  %3715 = vmatpush3.bf16.msra.mxu1 %v4658_v9  ;;  %v4053_v9 = vld [vmem:[#allocation7 + $0xb0] ss:$12 sps:$4 sm:$0xff]  }
 0x685   :  { %1601 = vmatprep.subr.bf16.mxu0 %v4879_v42  ;;  %3716 = vmatprep.subr.bf16.mxu1 %v5629_v18 }
 0x688   :  { %1602 = vmatpush1.bf16.msra.mxu0 %v4929_v20  ;;  %3717 = vmatpush3.bf16.msra.mxu1 %v4663_v10 }
 0x689   :  { %1603 = vmatprep.subr.bf16.mxu0 %v4933_v26  ;;  %3718 = vmatprep.subr.bf16.mxu1 %v5629_v18 }
 0x68c   :  { %1604 = vmatpush1.bf16.msra.mxu0 %v4937_v34  ;;  %3719 = vmatpush3.bf16.msra.mxu1 %v4668_v11 }
 0x68d   :  { %1605 = vmatprep.subr.bf16.mxu0 %v4941_v40  ;;  %3720 = vmatprep.subr.bf16.mxu1 %v5629_v18 }
 0x690   :  { %1606 = vmatpush1.bf16.msra.mxu0 %v4945_v44  ;;  %3721 = vmatpush3.bf16.msra.mxu1 %v4674_v12 }
 0x691   :  { %1607 = vmatprep.subr.bf16.mxu0 %v4949_v36  ;;  %3722 = vmatprep.subr.bf16.mxu1 %v5629_v18 }
 0x694   :  { %1608 = vmatpush1.bf16.msra.mxu0 %v4953_v47  ;;  %3723 = vmatpush3.bf16.msra.mxu1 %v4678_v13 }
 0x695   :  { %1609 = vmatprep.subr.bf16.mxu0 %v4957_v37  ;;  %3724 = vmatprep.subr.bf16.mxu1 %v5629_v18 }
 0x698   :  { %1610 = vmatpush1.bf16.msra.mxu0 %v4961_v46  ;;  %3725 = vmatpush3.bf16.msra.mxu1 %v4682_v14 }
 0x699   :  { %1611 = vmatprep.subr.bf16.mxu0 %v4965_v48  ;;  %3726 = vmatprep.subr.bf16.mxu1 %v5629_v18 }
 0x69c   :  { %1612 = vmatpush1.bf16.msra.mxu0 %v4969_v49  ;;  %3727 = vmatpush3.bf16.msra.mxu1 %v4686_v15 }
 0x69d   :  { %1881 = vmatprep.subr.bf16.mxu0 %v4052_v8  ;;  %3732 = vmatprep.subr.bf16.mxu1 %v4053_v9  ;;  %v5101_v8 = vld [vmem:[#allocation9 + $0x60] ss:$12 sps:$4 sm:$0xff]  }
 0x73f   :  { %v1527_v10 = vpop.f32.mrf.mxu0  ;;  %v1568_v11 = vpop.f32.mrf.mxu1 }
 0x740   :  { %v1574_v12 = vadd.f32 %v1527_v10, %v4741_v7  ;;  %v1588_v36 = vadd.f32 %v4769_v35, %v1568_v11  ;;  %v4057_v35 = vld [vmem:[#allocation7 + $0x98] ss:$12 sps:$4 sm:$0xff]   ;;  %v5107_v10 = vld [vmem:[#allocation9 + $0x48] ss:$12 sps:$4 sm:$0xff]  }
 0x741   :  { %v1529_v13 = vpop.f32.mrf.mxu0  ;;  %v3710_v6 = vpop.f32.mrf.mxu1  ;;  %v5111_v11 = vld [vmem:[#allocation9 + $0x34] ss:$12 sps:$4 sm:$0xff]  }
 0x742   :  { %v3261_v39 = vmul.f32 -1.442695, %v1574_v12  ;;  %v1581_v20 = vadd.f32 %v1529_v13, %v4743_v21  ;;  %v5113_v12 = vld [vmem:[#allocation9 + $0x30] ss:$12 sps:$4 sm:$0xff]   ;;  %v5120_v6 = vld [vmem:[#allocation9 + $0x18] ss:$12 sps:$4 sm:$0xff]  }
 0x743   :  { %v1531_v14 = vpop.f32.mrf.mxu0  ;;  %v1571_v28 = vpop.f32.mrf.mxu1  ;;  %v5115_v13 = vld [vmem:[#allocation9 + $0x1c] ss:$12 sps:$4 sm:$0xff]  }
 0x744   :  { %4182 = vpow2.f32 %v3261_v39  ;;  %v3262_v26 = vmul.f32 -1.442695, %v1581_v20  ;;  %v5122_v39 = vld [vmem:[#allocation9 + $0x4] ss:$12 sps:$4 sm:$0xff]   ;;  %v5128_v28 = vld [vmem:[#allocation9] ss:$12 sps:$4 sm:$0xff]  }
 0x745   :  { %v1532_v41 = vpop.f32.mrf.mxu0  ;;  %v3711_v42 = vpop.f32.mrf.mxu1  ;;  %v5124_v14 = vld [vmem:[#allocation9 + $0xb0] ss:$12 sps:$4 sm:$0xff]   ;;  %v5141_v20 = vld [vmem:[#allocation9 + $0x68] ss:$12 sps:$4 sm:$0xff]  }
 0x746   :  { %4184 = vpow2.f32 %v3262_v26  ;;  %v5130_v41 = vld [vmem:[#allocation9 + $0x98] ss:$12 sps:$4 sm:$0xff]   ;;  %v5138_v42 = vld [vmem:[#allocation9 + $0x80] ss:$12 sps:$4 sm:$0xff]   ;;  %v5145_v26 = vld [vmem:[#allocation9 + $0x50] ss:$12 sps:$4 sm:$0xff]  }
 0x751   :  { %v4183_v15 = vpop.eup %4182 }
 0x752   :  { %v1578_v34 = vadd.f32 1.0, %v4183_v15  ;;  %v5149_v15 = vld [vmem:[#allocation9 + $0x38] ss:$12 sps:$4 sm:$0xff]  }
 0x753   :  { %v4185_v40 = vpop.eup %4184 }
 0x754   :  { %4186 = vrcp.f32 %v1578_v34  ;;  %v1585_v44 = vadd.f32 1.0, %v4185_v40  ;;  %v5153_v34 = vld [vmem:[#allocation9 + $0x20] ss:$12 sps:$4 sm:$0xff]   ;;  %v5157_v40 = vld [vmem:[#allocation9 + $0x8] ss:$12 sps:$4 sm:$0xff]  }
 0x756   :  { %4188 = vrcp.f32 %v1585_v44 }
 0x761   :  { %v4187_v7 = vpop.eup %4186 }
 0x762   :  { %v1589_v47 = vmul.f32 %v4187_v7, %v1588_v36 }
 0x763   :  { %v4189_v46 = vpop.eup %4188 }
 0x764   :  { %v1590_v37 = vadd.f32 %v1589_v47, %v4758_v25  ;;  %v1592_v48 = vsub.f32 1.0, %v4189_v46  ;;  %v1594_v21 = vmul.f32 %v4189_v46, %v5024_v17  ;;  %v1700_v25 = vpack.c.bf16 %v4816_v16, %v4772_v58  ;;  %v4062_v58 = vld [vmem:[#allocation7 + $0x60] ss:$12 sps:$4 sm:$0xff]   ;;  %v5095_v17 = vld [vmem:[#allocation9 + $0x78] ss:$12 sps:$4 sm:$0xff]  }
 0x765   :  { %v4068_v16 = vld [vmem:[#allocation7 + $0x4c] ss:$12 sps:$4 sm:$0xff]  }
 0x766   :  { %4190 = vtanh.f32 %v1590_v37 }
 0x773   :  { %v4191_v49 = vpop.eup %4190 }
 0x774   :  { %v1593_v55 = vmul.f32 %v4191_v49, %v1592_v48 }
 0x776   :  { %v5066_v19 = vadd.f32 %v1594_v21, %v1593_v55 }
 0x778   :  { %v1596_v56 = vpack.c.bf16 %v5066_v19, %v5066_v19 }
 0x77a   :  { %1630 = vmatmul.mubr.bf16.vlgmr.msra.gmra.mxu0 %v1596_v56  ;;  %3729 = vmatmul.mubr.bf16.vlgmr.msra.gmra.mxu1 %v1596_v56 }
 0x77b   :  { %1882 = vmatpush1.bf16.msra.mxu0 %v4050_v53  ;;  %3733 = vmatpush3.bf16.msra.mxu1 %v4053_v9  ;;  %v5105_v9 = vld [vmem:[#allocation9 + $0x4c] ss:$12 sps:$4 sm:$0xff]  }
 0x77c   :  { %3748 = vmatprep.mubr.bf16.mxu1 %v1700_v25  ;;  %1883 = vmatprep.subr.bf16.mxu0 %v4056_v59  ;;  %v5631_v53 = vld [vmem:[#allocation14_spill] sm:$0xff] }
 0x77d   :  { %3734 = vmatprep.subr.bf16.mxu1 %v4057_v35  ;;  %1913 = vmatprep.mubr.bf16.mxu0 %v5630_v63 }
 0x77f   :  { %1884 = vmatpush1.bf16.msra.mxu0 %v4054_v60  ;;  %3735 = vmatpush3.bf16.msra.mxu1 %v4057_v35 }
 0x780   :  { %1885 = vmatprep.subr.bf16.mxu0 %v4060_v62  ;;  %3736 = vmatprep.subr.bf16.mxu1 %v4061_v27 }
 0x783   :  { %1886 = vmatpush1.bf16.msra.mxu0 %v4058_v50  ;;  %3737 = vmatpush3.bf16.msra.mxu1 %v4061_v27 }
 0x784   :  { %1887 = vmatprep.subr.bf16.mxu0 %v4064_v38  ;;  %3738 = vmatprep.subr.bf16.mxu1 %v4065_v30 }
 0x787   :  { %1888 = vmatpush1.bf16.msra.mxu0 %v4062_v58  ;;  %3739 = vmatpush3.bf16.msra.mxu1 %v4065_v30  ;;  %v5632_v30 = vld [vmem:[#allocation15_spill] sm:$0xff] }
 0x788   :  { %1889 = vmatprep.subr.bf16.mxu0 %v4068_v16  ;;  %3740 = vmatprep.subr.bf16.mxu1 %v4069_v29 }
 0x78b   :  { %1890 = vmatpush1.bf16.msra.mxu0 %v4066_v54  ;;  %3741 = vmatpush3.bf16.msra.mxu1 %v4069_v29 }
 0x78c   :  { %1891 = vmatprep.subr.bf16.mxu0 %v4072_v4  ;;  %3742 = vmatprep.subr.bf16.mxu1 %v4073_v45 }
 0x78f   :  { %1892 = vmatpush1.bf16.msra.mxu0 %v4070_v51  ;;  %3743 = vmatpush3.bf16.msra.mxu1 %v4073_v45 }
 0x790   :  { %1893 = vmatprep.subr.bf16.mxu0 %v4076_v2  ;;  %3744 = vmatprep.subr.bf16.mxu1 %v4077_v22 }
 0x793   :  { %1894 = vmatpush1.bf16.msra.mxu0 %v4074_v3  ;;  %3745 = vmatpush3.bf16.msra.mxu1 %v4077_v22 }
 0x794   :  { %1895 = vmatprep.subr.bf16.mxu0 %v4080_v61  ;;  %3746 = vmatprep.subr.bf16.mxu1 %v4081_v33 }
 0x797   :  { %1896 = vmatpush1.bf16.msra.mxu0 %v4078_v31  ;;  %3747 = vmatpush3.bf16.msra.mxu1 %v4081_v33 }
 0x798   :  { %3756 = vmatprep.subr.bf16.mxu1 %v5629_v18  ;;  %2186 = vmatprep.subr.bf16.mxu0 %v5081_v57 }
 0x79a   :  { %1914 = vmatmul.mubr.bf16.vlgmr.msra.gmra.mxu0 %v1700_v25  ;;  %3749 = vmatmul.mubr.bf16.vlgmr.msra.gmra.mxu1 %v1701_v32 }
 0x79b   :  { %3752 = vmatprep.mubr.bf16.mxu1 %v1702_v0  ;;  %1923 = vmatprep.mubr.bf16.mxu0 %v5630_v63 }
 0x79c   :  { %2187 = vmatpush1.bf16.msra.mxu0 %v5083_v5  ;;  %3757 = vmatpush3.bf16.msra.mxu1 %v5124_v14 }
 0x79d   :  { %2188 = vmatprep.subr.bf16.mxu0 %v5087_v24  ;;  %3758 = vmatprep.subr.bf16.mxu1 %v5629_v18 }
 0x7a0   :  { %2189 = vmatpush1.bf16.msra.mxu0 %v5089_v43  ;;  %3759 = vmatpush3.bf16.msra.mxu1 %v5130_v41 }
 0x7a1   :  { %2190 = vmatprep.subr.bf16.mxu0 %v5093_v52  ;;  %3760 = vmatprep.subr.bf16.mxu1 %v5629_v18 }
 0x7a2   :  { %1924 = vmatmul.mubr.bf16.gmra.mxu0 %v1701_v32 }
 0x7a3   :  { %1933 = vmatprep.mubr.bf16.mxu0 %v5630_v63 }
 0x7a4   :  { %2191 = vmatpush1.bf16.msra.mxu0 %v5095_v17  ;;  %3761 = vmatpush3.bf16.msra.mxu1 %v5138_v42 }
 0x7a5   :  { %2192 = vmatprep.subr.bf16.mxu0 %v5099_v1  ;;  %3762 = vmatprep.subr.bf16.mxu1 %v5629_v18 }
 0x7a8   :  { %2193 = vmatpush1.bf16.msra.mxu0 %v5101_v8  ;;  %3763 = vmatpush3.bf16.msra.mxu1 %v5141_v20 }
 0x7a9   :  { %2194 = vmatprep.subr.bf16.mxu0 %v5105_v9  ;;  %3764 = vmatprep.subr.bf16.mxu1 %v5629_v18 }
 0x7aa   :  { %1934 = vmatmul.mubr.bf16.gmra.mxu0 %v1702_v0 }
 0x7ab   :  { %1943 = vmatprep.mubr.bf16.mxu0 %v5630_v63 }
 0x7ac   :  { %2195 = vmatpush1.bf16.msra.mxu0 %v5107_v10  ;;  %3765 = vmatpush3.bf16.msra.mxu1 %v5145_v26 }
 0x7ad   :  { %2196 = vmatprep.subr.bf16.mxu0 %v5111_v11  ;;  %3766 = vmatprep.subr.bf16.mxu1 %v5629_v18 }
 0x7b0   :  { %2197 = vmatpush1.bf16.msra.mxu0 %v5113_v12  ;;  %3767 = vmatpush3.bf16.msra.mxu1 %v5149_v15 }
 0x7b1   :  { %2198 = vmatprep.subr.bf16.mxu0 %v5115_v13  ;;  %3768 = vmatprep.subr.bf16.mxu1 %v5629_v18 }
 0x7b4   :  { %2199 = vmatpush1.bf16.msra.mxu0 %v5120_v6  ;;  %3769 = vmatpush3.bf16.msra.mxu1 %v5153_v34 }
 0x7b5   :  { %2200 = vmatprep.subr.bf16.mxu0 %v5122_v39  ;;  %3770 = vmatprep.subr.bf16.mxu1 %v5629_v18 }
 0x7b8   :  { %2201 = vmatpush1.bf16.msra.mxu0 %v5128_v28  ;;  %3771 = vmatpush3.bf16.msra.mxu1 %v5157_v40 }
 0x7b9   :  { %2290 = vmatprep.subr.bf16.mxu0 %v5081_v57  ;;  %3776 = vmatprep.subr.bf16.mxu1 %v5629_v18 }
 0x83a   :  { %v1631_v44 = vpop.f32.mrf.mxu0  ;;  %v1672_v36 = vpop.f32.mrf.mxu1 }
 0x83b   :  { %v1678_v7 = vadd.f32 %v1631_v44, %v4745_v23  ;;  %v4298_v23 = vld [vmem:[%s5609_s6] ss:$0 sm:$0xff] }
 0x83c   :  { %v1633_v47 = vpop.f32.mrf.mxu0  ;;  %v3730_v37 = vpop.f32.mrf.mxu1  ;;  %v1692_v27 = vadd.f32 %v4298_v23, %v1672_v36 }
 0x83d   :  { %v3263_v46 = vmul.f32 -1.442695, %v1678_v7  ;;  %v1685_v56 = vadd.f32 %v1633_v47, %v5631_v53 }
 0x83e   :  { %v1635_v48 = vpop.f32.mrf.mxu0  ;;  %v1675_v49 = vpop.f32.mrf.mxu1 }
 0x83f   :  { %4192 = vpow2.f32 %v3263_v46  ;;  %v3264_v59 = vmul.f32 -1.442695, %v1685_v56 }
 0x840   :  { %v1636_v55 = vpop.f32.mrf.mxu0  ;;  %v3731_v21 = vpop.f32.mrf.mxu1 }
 0x841   :  { %4194 = vpow2.f32 %v3264_v59  ;;  %v1736_v55 = vld [vmem:[%s5612_s9] sm:$0x7] }
 0x84c   :  { %v4193_v35 = vpop.eup %4192 }
 0x84d   :  { %v1682_v25 = vadd.f32 1.0, %v4193_v35  ;;  %v5636_v35 = vld [vmem:[#allocation13_spill] sm:$0xff] }
 0x84e   :  { %v4195_v60 = vpop.eup %4194 }
 0x84f   :  { %4196 = vrcp.f32 %v1682_v25  ;;  %v1689_v62 = vadd.f32 1.0, %v4195_v60  ;;  %v5637_v25 = vsub.s32 0, %v5636_v35 }
 0x851   :  { %4198 = vrcp.f32 %v1689_v62  ;;  %v5249_v60 = vrot.slane %v1736_v55, %v5637_v25 }
 0x85a   :  { %v5222_v44 = vpop.f32.mrf.mxu1 }
 0x85c   :  { %v4197_v50 = vpop.eup %4196  ;;  %v1988_v7 = vpop.f32.mrf.mxu1 }
 0x85d   :  { %v1693_v38 = vmul.f32 %v4197_v50, %v1692_v27 }
 0x85e   :  { %v4199_v16 = vpop.eup %4198  ;;  %v5228_v37 = vpop.f32.mrf.mxu1 }
 0x85f   :  { %v1694_v58 = vadd.f32 %v1693_v38, %v5632_v30  ;;  %v1696_v29 = vsub.f32 1.0, %v4199_v16  ;;  %v1698_v45 = vmul.f32 %v4199_v16, %v5066_v19  ;;  %v5642_v16 = vsub.s32 1, %v5636_v35 }
 0x860   :  { %v5232_v48 = vpop.f32.mrf.mxu1 }
 0x861   :  { %4200 = vtanh.f32 %v1694_v58 }
 0x86e   :  { %v4201_v54 = vpop.eup %4200 }
 0x86f   :  { %v1697_v4 = vmul.f32 %v4201_v54, %v1696_v29  ;;  %v5262_v29 = vrot.slane %v1736_v55, %v5642_v16 }
 0x871   :  { %v1699_v51 = vadd.f32 %v1698_v45, %v1697_v4 }
 0x873   :  { %v1703_v2 = vpack.c.bf16 %v1699_v51, %v5066_v19  ;;  %v1915_v19 = vpop.f32.mrf.mxu0 }
 0x874   :  { %v1916_v38 = vadd.f32 %v1915_v19, %v5249_v60 }
 0x875   :  { %1944 = vmatmul.mubr.bf16.gmra.mxu0 %v1703_v2  ;;  %3753 = vmatmul.mubr.bf16.gmra.mxu1 %v1703_v2  ;;  %v1917_v22 = vpop.f32.mrf.mxu0 }
 0x876   :  { %2218 = vmatprep.mubr.bf16.mxu0 %v5630_v63  ;;  %3772 = vmatprep.mubr.msk.bf16.mxu1 %vm4437_vm0, %v5629_v18 }
 0x877   :  { %v5210_v3 = vpop.f32.mrf.mxu0 }
 0x879   :  { %v5212_v61 = vpop.f32.mrf.mxu0 }
 0x87b   :  { %v5214_v33 = vpop.f32.mrf.mxu0 }
 0x87d   :  { %2219 = vmatmul.mubr.bf16.vlgmr.msra.gmra.mxu0 %v5630_v63  ;;  %3773 = vmatmul.mubr.bf16.vlgmr.msra.gmra.mxu1 %v5630_v63  ;;  %v5216_v31 = vpop.f32.mrf.mxu0 }
 0x87e   :  { %2291 = vmatpush1.bf16.msra.mxu0 %v5083_v5  ;;  %3777 = vmatpush3.bf16.msra.mxu1 %v5124_v14 }
 0x87f   :  { %2292 = vmatprep.subr.bf16.mxu0 %v5087_v24  ;;  %3778 = vmatprep.subr.bf16.mxu1 %v5629_v18  ;;  %v5218_v32 = vpop.f32.mrf.mxu0 }
 0x880   :  { %2322 = vmatprep.mubr.bf16.mxu0 %v5630_v63  ;;  %3792 = vmatprep.mubr.msk.bf16.mxu1 %vm4437_vm0, %v5629_v18 }
 0x881   :  { %v5220_v0 = vpop.f32.mrf.mxu0 }
 0x882   :  { %2293 = vmatpush1.bf16.msra.mxu0 %v5089_v43  ;;  %3779 = vmatpush3.bf16.msra.mxu1 %v5130_v41 }
 0x883   :  { %2294 = vmatprep.subr.bf16.mxu0 %v5093_v52  ;;  %3780 = vmatprep.subr.bf16.mxu1 %v5629_v18  ;;  %v5224_v36 = vpop.f32.mrf.mxu0 }
 0x885   :  { %v5226_v47 = vpop.f32.mrf.mxu0 }
 0x886   :  { %2295 = vmatpush1.bf16.msra.mxu0 %v5095_v17  ;;  %3781 = vmatpush3.bf16.msra.mxu1 %v5138_v42 }
 0x887   :  { %2296 = vmatprep.subr.bf16.mxu0 %v5099_v1  ;;  %3782 = vmatprep.subr.bf16.mxu1 %v5629_v18  ;;  %v5230_v46 = vpop.f32.mrf.mxu0 }
 0x889   :  { %v5234_v49 = vpop.f32.mrf.mxu0 }
 0x88a   :  { %2297 = vmatpush1.bf16.msra.mxu0 %v5101_v8  ;;  %3783 = vmatpush3.bf16.msra.mxu1 %v5141_v20 }
 0x88b   :  { %2298 = vmatprep.subr.bf16.mxu0 %v5105_v9  ;;  %3784 = vmatprep.subr.bf16.mxu1 %v5629_v18 }
 0x88e   :  { %2299 = vmatpush1.bf16.msra.mxu0 %v5107_v10  ;;  %3785 = vmatpush3.bf16.msra.mxu1 %v5145_v26 }
 0x88f   :  { %2300 = vmatprep.subr.bf16.mxu0 %v5111_v11  ;;  %3786 = vmatprep.subr.bf16.mxu1 %v5629_v18 }
 0x892   :  { %2301 = vmatpush1.bf16.msra.mxu0 %v5113_v12  ;;  %3787 = vmatpush3.bf16.msra.mxu1 %v5149_v15 }
 0x893   :  { %2302 = vmatprep.subr.bf16.mxu0 %v5115_v13  ;;  %3788 = vmatprep.subr.bf16.mxu1 %v5629_v18 }
 0x896   :  { %2303 = vmatpush1.bf16.msra.mxu0 %v5120_v6  ;;  %3789 = vmatpush3.bf16.msra.mxu1 %v5153_v34 }
 0x897   :  { %2304 = vmatprep.subr.bf16.mxu0 %v5122_v39  ;;  %3790 = vmatprep.subr.bf16.mxu1 %v5629_v18 }
 0x89a   :  { %2305 = vmatpush1.bf16.msra.mxu0 %v5128_v28  ;;  %3791 = vmatpush3.bf16.msra.mxu1 %v5157_v40 }
 0x89b   :  { %2394 = vmatprep.subr.bf16.mxu0 %v5081_v57  ;;  %3796 = vmatprep.subr.bf16.mxu1 %v5629_v18 }
 0x935   :  { %v5239_v21 = vpop.f32.mrf.mxu0  ;;  %v5241_v53 = vpop.f32.mrf.mxu1 }
 0x936   :  { %5633 = vst [vmem:[#allocation14_spill] sm:$0xff] %v5239_v21  ;;  %5634 = vst [vmem:[#allocation15_spill] sm:$0xff] %v5241_v53 }
 0x937   :  { %v5243_v56 = vpop.f32.mrf.mxu0  ;;  %v5245_v59 = vpop.f32.mrf.mxu1 }
 0x938   :  { %5635 = vst [vmem:[#allocation16_spill] sm:$0xff] %v5243_v56 }
 0x939   :  { %v5251_v62 = vpop.f32.mrf.mxu0  ;;  %v5253_v23 = vpop.f32.mrf.mxu1 }
 0x93a   :  { %5638 = vst [vmem:[#allocation13_spill] sm:$0xff] %v5251_v62  ;;  %5639 = vst [vmem:[#allocation17_spill] sm:$0xff] %v5253_v23  ;;  %v1918_v23 = vadd.f32 %v1917_v22, %v5262_v29  ;;  %v5643_v22 = vsub.s32 2, %v5636_v35 }
 0x93b   :  { %v5255_v27 = vpop.f32.mrf.mxu0  ;;  %v5257_v50 = vpop.f32.mrf.mxu1 }
 0x93c   :  { %5640 = vst [vmem:[#allocation18_spill] sm:$0xff] %v5255_v27  ;;  %5641 = vst [vmem:[#allocation19_spill] sm:$0xff] %v5257_v50 }
 0x93d   :  { %v2220_v30 = vpop.f32.mrf.mxu0  ;;  %v2261_v58 = vpop.f32.mrf.mxu1 }
 0x93e   :  { %v2267_v54 = vadd.f32 %v2220_v30, %v1916_v38  ;;  %v5268_v38 = vld [vmem:[%s5613_s10] ss:$0 sm:$0xff] }
 0x93f   :  { %v2222_v4 = vpop.f32.mrf.mxu0  ;;  %v3774_v45 = vpop.f32.mrf.mxu1  ;;  %v2281_v16 = vadd.f32 %v5268_v38, %v2261_v58 }
 0x940   :  { %v3314_v51 = vmul.f32 -1.442695, %v2267_v54  ;;  %v2274_v53 = vadd.f32 %v2222_v4, %v1918_v23  ;;  %v5273_v54 = vrot.slane %v1736_v55, %v5643_v22 }
 0x941   :  { %v2224_v2 = vpop.f32.mrf.mxu0  ;;  %v2264_v25 = vpop.f32.mrf.mxu1 }
 0x942   :  { %4202 = vpow2.f32 %v3314_v51  ;;  %v3315_v56 = vmul.f32 -1.442695, %v2274_v53  ;;  %v1989_v53 = vadd.f32 %v1988_v7, %v5273_v54  ;;  %v1920_v7 = vadd.f32 %v5210_v3, %v5249_v60 }
 0x943   :  { %v2225_v27 = vpop.f32.mrf.mxu0  ;;  %v3775_v62 = vpop.f32.mrf.mxu1 }
 0x944   :  { %4204 = vpow2.f32 %v3315_v56 }
 0x94f   :  { %v4203_v19 = vpop.eup %4202 }
 0x950   :  { %v2271_v21 = vadd.f32 1.0, %v4203_v19 }
 0x951   :  { %v4205_v50 = vpop.eup %4204 }
 0x952   :  { %4206 = vrcp.f32 %v2271_v21  ;;  %v2278_v30 = vadd.f32 1.0, %v4205_v50 }
 0x954   :  { %4208 = vrcp.f32 %v2278_v30 }
 0x95f   :  { %v4207_v62 = vpop.eup %4206 }
 0x960   :  { %v2282_v56 = vmul.f32 %v4207_v62, %v2281_v16  ;;  %v1922_v62 = vadd.f32 %v5212_v61, %v5262_v29 }
 0x961   :  { %v4209_v21 = vpop.eup %4208 }
 0x962   :  { %v2283_v23 = vadd.f32 %v2282_v56, %v1989_v53  ;;  %v2285_v27 = vsub.f32 1.0, %v4209_v21  ;;  %v2287_v51 = vmul.f32 0.0, %v4209_v21 }
 0x964   :  { %4210 = vtanh.f32 %v2283_v23 }
 0x971   :  { %v4211_v4 = vpop.eup %4210 }
 0x972   :  { %v2286_v45 = vmul.f32 %v4211_v4, %v2285_v27 }
 0x974   :  { %v5276_v2 = vadd.f32 %v2287_v51, %v2286_v45 }
 0x976   :  { %v2289_v50 = vpack.c.bf16 %v5276_v2, %v5276_v2 }
 0x978   :  { %2323 = vmatmul.mubr.bf16.vlgmr.msra.gmra.mxu0 %v2289_v50  ;;  %3793 = vmatmul.mubr.bf16.vlgmr.msra.gmra.mxu1 %v2289_v50 }
 0x979   :  { %2395 = vmatpush1.bf16.msra.mxu0 %v5083_v5  ;;  %3797 = vmatpush3.bf16.msra.mxu1 %v5124_v14 }
 0x97a   :  { %2396 = vmatprep.subr.bf16.mxu0 %v5087_v24  ;;  %3798 = vmatprep.subr.bf16.mxu1 %v5629_v18 }
 0x97b   :  { %2426 = vmatprep.mubr.bf16.mxu0 %v5630_v63  ;;  %3812 = vmatprep.mubr.msk.bf16.mxu1 %vm4437_vm0, %v5629_v18 }
 0x97d   :  { %2397 = vmatpush1.bf16.msra.mxu0 %v5089_v43  ;;  %3799 = vmatpush3.bf16.msra.mxu1 %v5130_v41 }
 0x97e   :  { %2398 = vmatprep.subr.bf16.mxu0 %v5093_v52  ;;  %3800 = vmatprep.subr.bf16.mxu1 %v5629_v18 }
 0x981   :  { %2399 = vmatpush1.bf16.msra.mxu0 %v5095_v17  ;;  %3801 = vmatpush3.bf16.msra.mxu1 %v5138_v42 }
 0x982   :  { %2400 = vmatprep.subr.bf16.mxu0 %v5099_v1  ;;  %3802 = vmatprep.subr.bf16.mxu1 %v5629_v18 }
 0x985   :  { %2401 = vmatpush1.bf16.msra.mxu0 %v5101_v8  ;;  %3803 = vmatpush3.bf16.msra.mxu1 %v5141_v20 }
 0x986   :  { %2402 = vmatprep.subr.bf16.mxu0 %v5105_v9  ;;  %3804 = vmatprep.subr.bf16.mxu1 %v5629_v18 }
 0x989   :  { %2403 = vmatpush1.bf16.msra.mxu0 %v5107_v10  ;;  %3805 = vmatpush3.bf16.msra.mxu1 %v5145_v26 }
 0x98a   :  { %2404 = vmatprep.subr.bf16.mxu0 %v5111_v11  ;;  %3806 = vmatprep.subr.bf16.mxu1 %v5629_v18 }
 0x98d   :  { %2405 = vmatpush1.bf16.msra.mxu0 %v5113_v12  ;;  %3807 = vmatpush3.bf16.msra.mxu1 %v5149_v15 }
 0x98e   :  { %2406 = vmatprep.subr.bf16.mxu0 %v5115_v13  ;;  %3808 = vmatprep.subr.bf16.mxu1 %v5629_v18 }
 0x991   :  { %2407 = vmatpush1.bf16.msra.mxu0 %v5120_v6  ;;  %3809 = vmatpush3.bf16.msra.mxu1 %v5153_v34 }
 0x992   :  { %2408 = vmatprep.subr.bf16.mxu0 %v5122_v39  ;;  %3810 = vmatprep.subr.bf16.mxu1 %v5629_v18 }
 0x995   :  { %2409 = vmatpush1.bf16.msra.mxu0 %v5128_v28  ;;  %3811 = vmatpush3.bf16.msra.mxu1 %v5157_v40 }
 0x996   :  { %2498 = vmatprep.subr.bf16.mxu0 %v5081_v57  ;;  %3816 = vmatprep.subr.bf16.mxu1 %v5629_v18 }
 0xa38   :  { %v2324_v55 = vpop.f32.mrf.mxu0  ;;  %v2365_v35 = vpop.f32.mrf.mxu1 }
 0xa39   :  { %v2371_v58 = vadd.f32 %v2324_v55, %v1920_v7  ;;  %v2385_v51 = vadd.f32 %v5268_v38, %v2365_v35  ;;  %v1992_v7 = vadd.f32 %v5232_v48, %v5273_v54  ;;  %v1926_v48 = vadd.f32 %v5214_v33, %v5249_v60 }
 0xa3a   :  { %v2326_v25 = vpop.f32.mrf.mxu0  ;;  %v3794_v19 = vpop.f32.mrf.mxu1 }
 0xa3b   :  { %v3316_v30 = vmul.f32 -1.442695, %v2371_v58  ;;  %v2378_v23 = vadd.f32 %v2326_v25, %v1922_v62 }
 0xa3c   :  { %v2328_v16 = vpop.f32.mrf.mxu0  ;;  %v2368_v22 = vpop.f32.mrf.mxu1 }
 0xa3d   :  { %4212 = vpow2.f32 %v3316_v30  ;;  %v3317_v21 = vmul.f32 -1.442695, %v2378_v23 }
 0xa3e   :  { %v2329_v53 = vpop.f32.mrf.mxu0  ;;  %v3795_v56 = vpop.f32.mrf.mxu1 }
 0xa3f   :  { %4214 = vpow2.f32 %v3317_v21 }
 0xa4a   :  { %v4213_v27 = vpop.eup %4212 }
 0xa4b   :  { %v2375_v4 = vadd.f32 1.0, %v4213_v27 }
 0xa4c   :  { %v4215_v3 = vpop.eup %4214 }
 0xa4d   :  { %4216 = vrcp.f32 %v2375_v4  ;;  %v2382_v45 = vadd.f32 1.0, %v4215_v3 }
 0xa4f   :  { %4218 = vrcp.f32 %v2382_v45  ;;  %v1928_v45 = vadd.f32 %v5216_v31, %v5262_v29 }
 0xa5a   :  { %v4217_v50 = vpop.eup %4216 }
 0xa5b   :  { %v2386_v55 = vmul.f32 %v4217_v50, %v2385_v51 }
 0xa5c   :  { %v4219_v58 = vpop.eup %4218 }
 0xa5d   :  { %v2387_v61 = vadd.f32 %v2386_v55, %v1992_v7  ;;  %v2389_v19 = vsub.f32 1.0, %v4219_v58  ;;  %v2391_v16 = vmul.f32 %v4219_v58, %v5276_v2 }
 0xa5f   :  { %4220 = vtanh.f32 %v2387_v61 }
 0xa6c   :  { %v4221_v25 = vpop.eup %4220 }
 0xa6d   :  { %v2390_v30 = vmul.f32 %v4221_v25, %v2389_v19 }
 0xa6f   :  { %v5323_v22 = vadd.f32 %v2391_v16, %v2390_v30  ;;  %v1997_v16 = vadd.f32 %v5222_v44, %v5273_v54  ;;  %v1930_v44 = vadd.f32 %v5218_v32, %v5249_v60 }
 0xa71   :  { %v2393_v62 = vpack.c.bf16 %v5323_v22, %v5323_v22 }
 0xa73   :  { %2427 = vmatmul.mubr.bf16.vlgmr.msra.gmra.mxu0 %v2393_v62  ;;  %3813 = vmatmul.mubr.bf16.vlgmr.msra.gmra.mxu1 %v2393_v62 }
 0xa74   :  { %2499 = vmatpush1.bf16.msra.mxu0 %v5083_v5  ;;  %3817 = vmatpush3.bf16.msra.mxu1 %v5124_v14 }
 0xa75   :  { %2500 = vmatprep.subr.bf16.mxu0 %v5087_v24  ;;  %3818 = vmatprep.subr.bf16.mxu1 %v5629_v18 }
 0xa76   :  { %2530 = vmatprep.mubr.bf16.mxu0 %v5630_v63  ;;  %3832 = vmatprep.mubr.msk.bf16.mxu1 %vm4437_vm0, %v5629_v18 }
 0xa78   :  { %2501 = vmatpush1.bf16.msra.mxu0 %v5089_v43  ;;  %3819 = vmatpush3.bf16.msra.mxu1 %v5130_v41 }
 0xa79   :  { %2502 = vmatprep.subr.bf16.mxu0 %v5093_v52  ;;  %3820 = vmatprep.subr.bf16.mxu1 %v5629_v18 }
 0xa7c   :  { %2503 = vmatpush1.bf16.msra.mxu0 %v5095_v17  ;;  %3821 = vmatpush3.bf16.msra.mxu1 %v5138_v42 }
 0xa7d   :  { %2504 = vmatprep.subr.bf16.mxu0 %v5099_v1  ;;  %3822 = vmatprep.subr.bf16.mxu1 %v5629_v18 }
 0xa80   :  { %2505 = vmatpush1.bf16.msra.mxu0 %v5101_v8  ;;  %3823 = vmatpush3.bf16.msra.mxu1 %v5141_v20 }
 0xa81   :  { %2506 = vmatprep.subr.bf16.mxu0 %v5105_v9  ;;  %3824 = vmatprep.subr.bf16.mxu1 %v5629_v18 }
 0xa84   :  { %2507 = vmatpush1.bf16.msra.mxu0 %v5107_v10  ;;  %3825 = vmatpush3.bf16.msra.mxu1 %v5145_v26 }
 0xa85   :  { %2508 = vmatprep.subr.bf16.mxu0 %v5111_v11  ;;  %3826 = vmatprep.subr.bf16.mxu1 %v5629_v18 }
 0xa88   :  { %2509 = vmatpush1.bf16.msra.mxu0 %v5113_v12  ;;  %3827 = vmatpush3.bf16.msra.mxu1 %v5149_v15 }
 0xa89   :  { %2510 = vmatprep.subr.bf16.mxu0 %v5115_v13  ;;  %3828 = vmatprep.subr.bf16.mxu1 %v5629_v18 }
 0xa8c   :  { %2511 = vmatpush1.bf16.msra.mxu0 %v5120_v6  ;;  %3829 = vmatpush3.bf16.msra.mxu1 %v5153_v34 }
 0xa8d   :  { %2512 = vmatprep.subr.bf16.mxu0 %v5122_v39  ;;  %3830 = vmatprep.subr.bf16.mxu1 %v5629_v18 }
 0xa90   :  { %2513 = vmatpush1.bf16.msra.mxu0 %v5128_v28  ;;  %3831 = vmatpush3.bf16.msra.mxu1 %v5157_v40 }
 0xa91   :  { %2602 = vmatprep.subr.bf16.mxu0 %v5081_v57  ;;  %3836 = vmatprep.subr.bf16.mxu1 %v5629_v18 }
 0xb33   :  { %v2428_v35 = vpop.f32.mrf.mxu0  ;;  %v2469_v53 = vpop.f32.mrf.mxu1 }
 0xb34   :  { %v2475_v56 = vadd.f32 %v2428_v35, %v1926_v48  ;;  %v2489_v25 = vadd.f32 %v5268_v38, %v2469_v53 }
 0xb35   :  { %v2430_v23 = vpop.f32.mrf.mxu0  ;;  %v3814_v21 = vpop.f32.mrf.mxu1 }
 0xb36   :  { %v3318_v27 = vmul.f32 -1.442695, %v2475_v56  ;;  %v2482_v7 = vadd.f32 %v2430_v23, %v1928_v45 }
 0xb37   :  { %v2432_v4 = vpop.f32.mrf.mxu0  ;;  %v2472_v3 = vpop.f32.mrf.mxu1 }
 0xb38   :  { %4222 = vpow2.f32 %v3318_v27  ;;  %v3319_v55 = vmul.f32 -1.442695, %v2482_v7 }
 0xb39   :  { %v2433_v51 = vpop.f32.mrf.mxu0  ;;  %v3815_v50 = vpop.f32.mrf.mxu1 }
 0xb3a   :  { %4224 = vpow2.f32 %v3319_v55 }
 0xb45   :  { %v4223_v61 = vpop.eup %4222 }
 0xb46   :  { %v2479_v58 = vadd.f32 1.0, %v4223_v61 }
 0xb47   :  { %v4225_v33 = vpop.eup %4224 }
 0xb48   :  { %4226 = vrcp.f32 %v2479_v58  ;;  %v2486_v19 = vadd.f32 1.0, %v4225_v33  ;;  %v1932_v58 = vadd.f32 %v5220_v0, %v5262_v29 }
 0xb4a   :  { %4228 = vrcp.f32 %v2486_v19 }
 0xb55   :  { %v4227_v30 = vpop.eup %4226 }
 0xb56   :  { %v2490_v62 = vmul.f32 %v4227_v30, %v2489_v25 }
 0xb57   :  { %v4229_v48 = vpop.eup %4228 }
 0xb58   :  { %v2491_v31 = vadd.f32 %v2490_v62, %v1997_v16  ;;  %v2493_v35 = vsub.f32 1.0, %v4229_v48  ;;  %v2495_v21 = vmul.f32 %v4229_v48, %v5323_v22 }
 0xb5a   :  { %4230 = vtanh.f32 %v2491_v31 }
 0xb67   :  { %v4231_v56 = vpop.eup %4230 }
 0xb68   :  { %v2494_v23 = vmul.f32 %v4231_v56, %v2493_v35  ;;  %v2000_v56 = vadd.f32 %v5228_v37, %v5273_v54  ;;  %v1936_v37 = vadd.f32 %v5224_v36, %v5249_v60 }
 0xb6a   :  { %v5370_v27 = vadd.f32 %v2495_v21, %v2494_v23 }
 0xb6c   :  { %v2497_v4 = vpack.c.bf16 %v5370_v27, %v5370_v27 }
 0xb6e   :  { %2531 = vmatmul.mubr.bf16.vlgmr.msra.gmra.mxu0 %v2497_v4  ;;  %3833 = vmatmul.mubr.bf16.vlgmr.msra.gmra.mxu1 %v2497_v4 }
 0xb6f   :  { %2603 = vmatpush1.bf16.msra.mxu0 %v5083_v5  ;;  %3837 = vmatpush3.bf16.msra.mxu1 %v5124_v14 }
 0xb70   :  { %2604 = vmatprep.subr.bf16.mxu0 %v5087_v24  ;;  %3838 = vmatprep.subr.bf16.mxu1 %v5629_v18 }
 0xb71   :  { %2634 = vmatprep.mubr.bf16.mxu0 %v5630_v63  ;;  %3852 = vmatprep.mubr.msk.bf16.mxu1 %vm4437_vm0, %v5629_v18 }
 0xb73   :  { %2605 = vmatpush1.bf16.msra.mxu0 %v5089_v43  ;;  %3839 = vmatpush3.bf16.msra.mxu1 %v5130_v41 }
 0xb74   :  { %2606 = vmatprep.subr.bf16.mxu0 %v5093_v52  ;;  %3840 = vmatprep.subr.bf16.mxu1 %v5629_v18 }
 0xb77   :  { %2607 = vmatpush1.bf16.msra.mxu0 %v5095_v17  ;;  %3841 = vmatpush3.bf16.msra.mxu1 %v5138_v42 }
 0xb78   :  { %2608 = vmatprep.subr.bf16.mxu0 %v5099_v1  ;;  %3842 = vmatprep.subr.bf16.mxu1 %v5629_v18 }
 0xb7b   :  { %2609 = vmatpush1.bf16.msra.mxu0 %v5101_v8  ;;  %3843 = vmatpush3.bf16.msra.mxu1 %v5141_v20 }
 0xb7c   :  { %2610 = vmatprep.subr.bf16.mxu0 %v5105_v9  ;;  %3844 = vmatprep.subr.bf16.mxu1 %v5629_v18 }
 0xb7f   :  { %2611 = vmatpush1.bf16.msra.mxu0 %v5107_v10  ;;  %3845 = vmatpush3.bf16.msra.mxu1 %v5145_v26 }
 0xb80   :  { %2612 = vmatprep.subr.bf16.mxu0 %v5111_v11  ;;  %3846 = vmatprep.subr.bf16.mxu1 %v5629_v18 }
 0xb83   :  { %2613 = vmatpush1.bf16.msra.mxu0 %v5113_v12  ;;  %3847 = vmatpush3.bf16.msra.mxu1 %v5149_v15 }
 0xb84   :  { %2614 = vmatprep.subr.bf16.mxu0 %v5115_v13  ;;  %3848 = vmatprep.subr.bf16.mxu1 %v5629_v18 }
 0xb87   :  { %2615 = vmatpush1.bf16.msra.mxu0 %v5120_v6  ;;  %3849 = vmatpush3.bf16.msra.mxu1 %v5153_v34 }
 0xb88   :  { %2616 = vmatprep.subr.bf16.mxu0 %v5122_v39  ;;  %3850 = vmatprep.subr.bf16.mxu1 %v5629_v18 }
 0xb8b   :  { %2617 = vmatpush1.bf16.msra.mxu0 %v5128_v28  ;;  %3851 = vmatpush3.bf16.msra.mxu1 %v5157_v40 }
 0xb8c   :  { %2706 = vmatprep.subr.bf16.mxu0 %v5081_v57  ;;  %3856 = vmatprep.subr.bf16.mxu1 %v5629_v18 }
 0xc2e   :  { %v2532_v53 = vpop.f32.mrf.mxu0  ;;  %v2573_v3 = vpop.f32.mrf.mxu1 }
 0xc2f   :  { %v2579_v45 = vadd.f32 %v2532_v53, %v1930_v44  ;;  %v2593_v48 = vadd.f32 %v5268_v38, %v2573_v3 }
 0xc30   :  { %v2534_v51 = vpop.f32.mrf.mxu0  ;;  %v3834_v50 = vpop.f32.mrf.mxu1 }
 0xc31   :  { %v3320_v7 = vmul.f32 -1.442695, %v2579_v45  ;;  %v2586_v25 = vadd.f32 %v2534_v51, %v1932_v58 }
 0xc32   :  { %v2536_v55 = vpop.f32.mrf.mxu0  ;;  %v2576_v61 = vpop.f32.mrf.mxu1 }
 0xc33   :  { %4232 = vpow2.f32 %v3320_v7  ;;  %v3321_v30 = vmul.f32 -1.442695, %v2586_v25 }
 0xc34   :  { %v2537_v33 = vpop.f32.mrf.mxu0  ;;  %v3835_v19 = vpop.f32.mrf.mxu1 }
 0xc35   :  { %4234 = vpow2.f32 %v3321_v30  ;;  %v1938_v30 = vadd.f32 %v5226_v47, %v5262_v29 }
 0xc40   :  { %v4233_v16 = vpop.eup %4232 }
 0xc41   :  { %v2583_v62 = vadd.f32 1.0, %v4233_v16 }
 0xc42   :  { %v4235_v32 = vpop.eup %4234 }
 0xc43   :  { %4236 = vrcp.f32 %v2583_v62  ;;  %v2590_v31 = vadd.f32 1.0, %v4235_v32 }
 0xc45   :  { %4238 = vrcp.f32 %v2590_v31 }
 0xc50   :  { %v4237_v35 = vpop.eup %4236 }
 0xc51   :  { %v2594_v23 = vmul.f32 %v4237_v35, %v2593_v48 }
 0xc52   :  { %v4239_v21 = vpop.eup %4238 }
 0xc53   :  { %v2595_v0 = vadd.f32 %v2594_v23, %v2000_v56  ;;  %v2597_v4 = vsub.f32 1.0, %v4239_v21  ;;  %v2599_v45 = vmul.f32 %v4239_v21, %v5370_v27  ;;  %v2005_v21 = vadd.f32 %v5245_v59, %v5273_v54 }
 0xc55   :  { %4240 = vtanh.f32 %v2595_v0 }
 0xc62   :  { %v4241_v44 = vpop.eup %4240 }
 0xc63   :  { %v2598_v53 = vmul.f32 %v4241_v44, %v2597_v4 }
 0xc65   :  { %v5417_v51 = vadd.f32 %v2599_v45, %v2598_v53 }
 0xc67   :  { %v2601_v50 = vpack.c.bf16 %v5417_v51, %v5417_v51 }
 0xc69   :  { %2635 = vmatmul.mubr.bf16.vlgmr.msra.gmra.mxu0 %v2601_v50  ;;  %3853 = vmatmul.mubr.bf16.vlgmr.msra.gmra.mxu1 %v2601_v50 }
 0xc6a   :  { %2707 = vmatpush1.bf16.msra.mxu0 %v5083_v5  ;;  %3857 = vmatpush3.bf16.msra.mxu1 %v5124_v14 }
 0xc6b   :  { %2708 = vmatprep.subr.bf16.mxu0 %v5087_v24  ;;  %3858 = vmatprep.subr.bf16.mxu1 %v5629_v18 }
 0xc6c   :  { %2738 = vmatprep.mubr.bf16.mxu0 %v5630_v63  ;;  %3872 = vmatprep.mubr.msk.bf16.mxu1 %vm4437_vm0, %v5629_v18 }
 0xc6e   :  { %2709 = vmatpush1.bf16.msra.mxu0 %v5089_v43  ;;  %3859 = vmatpush3.bf16.msra.mxu1 %v5130_v41 }
 0xc6f   :  { %2710 = vmatprep.subr.bf16.mxu0 %v5093_v52  ;;  %3860 = vmatprep.subr.bf16.mxu1 %v5629_v18 }
 0xc72   :  { %2711 = vmatpush1.bf16.msra.mxu0 %v5095_v17  ;;  %3861 = vmatpush3.bf16.msra.mxu1 %v5138_v42 }
 0xc73   :  { %2712 = vmatprep.subr.bf16.mxu0 %v5099_v1  ;;  %3862 = vmatprep.subr.bf16.mxu1 %v5629_v18 }
 0xc76   :  { %2713 = vmatpush1.bf16.msra.mxu0 %v5101_v8  ;;  %3863 = vmatpush3.bf16.msra.mxu1 %v5141_v20 }
 0xc77   :  { %2714 = vmatprep.subr.bf16.mxu0 %v5105_v9  ;;  %3864 = vmatprep.subr.bf16.mxu1 %v5629_v18 }
 0xc7a   :  { %2715 = vmatpush1.bf16.msra.mxu0 %v5107_v10  ;;  %3865 = vmatpush3.bf16.msra.mxu1 %v5145_v26 }
 0xc7b   :  { %2716 = vmatprep.subr.bf16.mxu0 %v5111_v11  ;;  %3866 = vmatprep.subr.bf16.mxu1 %v5629_v18 }
 0xc7e   :  { %2717 = vmatpush1.bf16.msra.mxu0 %v5113_v12  ;;  %3867 = vmatpush3.bf16.msra.mxu1 %v5149_v15 }
 0xc7f   :  { %2718 = vmatprep.subr.bf16.mxu0 %v5115_v13  ;;  %3868 = vmatprep.subr.bf16.mxu1 %v5629_v18 }
 0xc82   :  { %2719 = vmatpush1.bf16.msra.mxu0 %v5120_v6  ;;  %3869 = vmatpush3.bf16.msra.mxu1 %v5153_v34 }
 0xc83   :  { %2720 = vmatprep.subr.bf16.mxu0 %v5122_v39  ;;  %3870 = vmatprep.subr.bf16.mxu1 %v5629_v18 }
 0xc86   :  { %2721 = vmatpush1.bf16.msra.mxu0 %v5128_v28  ;;  %3871 = vmatpush3.bf16.msra.mxu1 %v5157_v40 }
 0xc87   :  { %2810 = vmatprep.subr.bf16.mxu0 %v5081_v57  ;;  %3876 = vmatprep.subr.bf16.mxu1 %v5629_v18 }
 0xd29   :  { %v2636_v3 = vpop.f32.mrf.mxu0  ;;  %v2677_v7 = vpop.f32.mrf.mxu1 }
 0xd2a   :  { %v2683_v55 = vadd.f32 %v2636_v3, %v1936_v37  ;;  %v2697_v23 = vadd.f32 %v5268_v38, %v2677_v7 }
 0xd2b   :  { %v2638_v61 = vpop.f32.mrf.mxu0  ;;  %v3854_v58 = vpop.f32.mrf.mxu1 }
 0xd2c   :  { %v3322_v33 = vmul.f32 -1.442695, %v2683_v55  ;;  %v2690_v32 = vadd.f32 %v2638_v61, %v1938_v30  ;;  %v4301_v30 = vld [vmem:[#allocation9 + $0x94] ss:$12 sps:$4 sm:$0xff]  }
 0xd2d   :  { %v2640_v19 = vpop.f32.mrf.mxu0  ;;  %v2680_v25 = vpop.f32.mrf.mxu1 }
 0xd2e   :  { %4242 = vpow2.f32 %v3322_v33  ;;  %v3323_v31 = vmul.f32 -1.442695, %v2690_v32  ;;  %v4299_v19 = vld [vmem:[#allocation9 + $0xa8] ss:$12 sps:$4 sm:$0xff]   ;;  %v4300_v25 = vld [vmem:[#allocation9 + $0xb0] ss:$12 sps:$4 sm:$0xff]  }
 0xd2f   :  { %v2641_v16 = vpop.f32.mrf.mxu0  ;;  %v3855_v62 = vpop.f32.mrf.mxu1  ;;  %v4304_v32 = vld [vmem:[#allocation9 + $0x7c] ss:$12 sps:$4 sm:$0xff]  }
 0xd30   :  { %4244 = vpow2.f32 %v3323_v31  ;;  %v4302_v16 = vld [vmem:[#allocation9 + $0x90] ss:$12 sps:$4 sm:$0xff]   ;;  %v4303_v62 = vld [vmem:[#allocation9 + $0x98] ss:$12 sps:$4 sm:$0xff]  }
 0xd31   :  { %v4305_v31 = vld [vmem:[#allocation9 + $0x78] ss:$12 sps:$4 sm:$0xff]  }
 0xd3b   :  { %v4243_v48 = vpop.eup %4242 }
 0xd3c   :  { %v2687_v35 = vadd.f32 1.0, %v4243_v48  ;;  %v4306_v48 = vld [vmem:[#allocation9 + $0x80] ss:$12 sps:$4 sm:$0xff]  }
 0xd3d   :  { %v4245_v36 = vpop.eup %4244 }
 0xd3e   :  { %4246 = vrcp.f32 %v2687_v35  ;;  %v2694_v56 = vadd.f32 1.0, %v4245_v36  ;;  %v4307_v35 = vld [vmem:[#allocation9 + $0x64] ss:$12 sps:$4 sm:$0xff]   ;;  %v4309_v36 = vld [vmem:[#allocation9 + $0x68] ss:$12 sps:$4 sm:$0xff]  }
 0xd40   :  { %4248 = vrcp.f32 %v2694_v56  ;;  %v4310_v56 = vld [vmem:[#allocation9 + $0x4c] ss:$12 sps:$4 sm:$0xff]  }
 0xd4b   :  { %v4247_v0 = vpop.eup %4246 }
 0xd4c   :  { %v2698_v4 = vmul.f32 %v4247_v0, %v2697_v23  ;;  %v4311_v23 = vld [vmem:[#allocation9 + $0x48] ss:$12 sps:$4 sm:$0xff]   ;;  %v4312_v0 = vld [vmem:[#allocation9 + $0x50] ss:$12 sps:$4 sm:$0xff]  }
 0xd4d   :  { %v4249_v44 = vpop.eup %4248 }
 0xd4e   :  { %v2699_v47 = vadd.f32 %v2698_v4, %v2005_v21  ;;  %v2701_v53 = vsub.f32 1.0, %v4249_v44  ;;  %v2703_v37 = vmul.f32 %v4249_v44, %v5417_v51  ;;  %v4313_v21 = vld [vmem:[#allocation9 + $0x34] ss:$12 sps:$4 sm:$0xff]   ;;  %v4314_v4 = vld [vmem:[#allocation9 + $0x30] ss:$12 sps:$4 sm:$0xff]  }
 0xd4f   :  { %v4316_v44 = vld [vmem:[#allocation9 + $0x1c] ss:$12 sps:$4 sm:$0xff]  }
 0xd50   :  { %4250 = vtanh.f32 %v2699_v47  ;;  %v4315_v47 = vld [vmem:[#allocation9 + $0x38] ss:$12 sps:$4 sm:$0xff]  }
 0xd5d   :  { %v4251_v45 = vpop.eup %4250 }
 0xd5e   :  { %v2702_v50 = vmul.f32 %v4251_v45, %v2701_v53  ;;  %v4317_v53 = vld [vmem:[#allocation9 + $0x18] ss:$12 sps:$4 sm:$0xff]   ;;  %v4318_v45 = vld [vmem:[#allocation9 + $0x20] ss:$12 sps:$4 sm:$0xff]  }
 0xd60   :  { %v5464_v3 = vadd.f32 %v2703_v37, %v2702_v50  ;;  %v4319_v50 = vld [vmem:[#allocation9 + $0x4] ss:$12 sps:$4 sm:$0xff]   ;;  %v4320_v37 = vld [vmem:[#allocation9] ss:$12 sps:$4 sm:$0xff]  }
 0xd62   :  { %v2705_v55 = vpack.c.bf16 %v5464_v3, %v5464_v3 }
 0xd64   :  { %2739 = vmatmul.mubr.bf16.vlgmr.msra.gmra.mxu0 %v2705_v55  ;;  %3873 = vmatmul.mubr.bf16.vlgmr.msra.gmra.mxu1 %v2705_v55  ;;  %v4321_v55 = vld [vmem:[#allocation9 + $0x8] ss:$12 sps:$4 sm:$0xff]  }
 0xd65   :  { %2811 = vmatpush1.bf16.msra.mxu0 %v5083_v5  ;;  %3877 = vmatpush3.bf16.msra.mxu1 %v5124_v14  ;;  %v1940_v5 = vadd.f32 %v5230_v46, %v5249_v60 }
 0xd66   :  { %2812 = vmatprep.subr.bf16.mxu0 %v5087_v24  ;;  %3878 = vmatprep.subr.bf16.mxu1 %v5629_v18 }
 0xd67   :  { %2842 = vmatprep.mubr.bf16.mxu0 %v5630_v63  ;;  %3892 = vmatprep.mubr.msk.bf16.mxu1 %vm4437_vm0, %v5629_v18 }
 0xd69   :  { %2813 = vmatpush1.bf16.msra.mxu0 %v5089_v43  ;;  %3879 = vmatpush3.bf16.msra.mxu1 %v5130_v41 }
 0xd6a   :  { %2814 = vmatprep.subr.bf16.mxu0 %v5093_v52  ;;  %3880 = vmatprep.subr.bf16.mxu1 %v5629_v18 }
 0xd6d   :  { %2815 = vmatpush1.bf16.msra.mxu0 %v5095_v17  ;;  %3881 = vmatpush3.bf16.msra.mxu1 %v5138_v42 }
 0xd6e   :  { %2816 = vmatprep.subr.bf16.mxu0 %v5099_v1  ;;  %3882 = vmatprep.subr.bf16.mxu1 %v5629_v18 }
 0xd71   :  { %2817 = vmatpush1.bf16.msra.mxu0 %v5101_v8  ;;  %3883 = vmatpush3.bf16.msra.mxu1 %v5141_v20 }
 0xd72   :  { %2818 = vmatprep.subr.bf16.mxu0 %v5105_v9  ;;  %3884 = vmatprep.subr.bf16.mxu1 %v5629_v18 }
 0xd75   :  { %2819 = vmatpush1.bf16.msra.mxu0 %v5107_v10  ;;  %3885 = vmatpush3.bf16.msra.mxu1 %v5145_v26  ;;  %v5644_v26 = vld [vmem:[#allocation19_spill] sm:$0xff] }
 0xd76   :  { %2820 = vmatprep.subr.bf16.mxu0 %v5111_v11  ;;  %3886 = vmatprep.subr.bf16.mxu1 %v5629_v18  ;;  %v1942_v11 = vadd.f32 %v5234_v49, %v5262_v29 }
 0xd79   :  { %2821 = vmatpush1.bf16.msra.mxu0 %v5113_v12  ;;  %3887 = vmatpush3.bf16.msra.mxu1 %v5149_v15  ;;  %v2008_v15 = vadd.f32 %v5644_v26, %v5273_v54 }
 0xd7a   :  { %2822 = vmatprep.subr.bf16.mxu0 %v5115_v13  ;;  %3888 = vmatprep.subr.bf16.mxu1 %v5629_v18 }
 0xd7d   :  { %2823 = vmatpush1.bf16.msra.mxu0 %v5120_v6  ;;  %3889 = vmatpush3.bf16.msra.mxu1 %v5153_v34 }
 0xd7e   :  { %2824 = vmatprep.subr.bf16.mxu0 %v5122_v39  ;;  %3890 = vmatprep.subr.bf16.mxu1 %v5629_v18 }
 0xd81   :  { %2825 = vmatpush1.bf16.msra.mxu0 %v5128_v28  ;;  %3891 = vmatpush3.bf16.msra.mxu1 %v5157_v40 }
 0xd82   :  { %2914 = vmatprep.subr.bf16.mxu0 %v5081_v57  ;;  %3896 = vmatprep.subr.bf16.mxu1 %v5629_v18 }
 0xe24   :  { %v2740_v24 = vpop.f32.mrf.mxu0  ;;  %v2781_v43 = vpop.f32.mrf.mxu1 }
 0xe25   :  { %v2787_v52 = vadd.f32 %v2740_v24, %v1940_v5  ;;  %v2801_v42 = vadd.f32 %v5268_v38, %v2781_v43  ;;  %v4114_v5 = vld [vmem:[%s5614_s11 + $0x38] sm:$0xff]   ;;  %v5645_v24 = vld [vmem:[#allocation14_spill] sm:$0xff] }
 0xe26   :  { %v2742_v17 = vpop.f32.mrf.mxu0  ;;  %v3874_v1 = vpop.f32.mrf.mxu1  ;;  %v1946_v43 = vadd.f32 %v5645_v24, %v5249_v60 }
 0xe27   :  { %v3324_v8 = vmul.f32 -1.442695, %v2787_v52  ;;  %v2794_v57 = vadd.f32 %v2742_v17, %v1942_v11 }
 0xe28   :  { %v2744_v9 = vpop.f32.mrf.mxu0  ;;  %v2784_v10 = vpop.f32.mrf.mxu1 }
 0xe29   :  { %4252 = vpow2.f32 %v3324_v8  ;;  %v3325_v6 = vmul.f32 -1.442695, %v2794_v57 }
 0xe2a   :  { %v2745_v12 = vpop.f32.mrf.mxu0  ;;  %v3875_v13 = vpop.f32.mrf.mxu1 }
 0xe2b   :  { %4254 = vpow2.f32 %v3325_v6  ;;  %v5646_v12 = vld [vmem:[#allocation16_spill] sm:$0xff] }
 0xe2c   :  { %v1948_v13 = vadd.f32 %v5646_v12, %v5262_v29 }
 0xe36   :  { %v4253_v39 = vpop.eup %4252 }
 0xe37   :  { %v2791_v14 = vadd.f32 1.0, %v4253_v39 }
 0xe38   :  { %v4255_v28 = vpop.eup %4254 }
 0xe39   :  { %4256 = vrcp.f32 %v2791_v14  ;;  %v2798_v41 = vadd.f32 1.0, %v4255_v28 }
 0xe3b   :  { %4258 = vrcp.f32 %v2798_v41 }
 0xe46   :  { %v4257_v20 = vpop.eup %4256 }
 0xe47   :  { %v2802_v34 = vmul.f32 %v4257_v20, %v2801_v42 }
 0xe48   :  { %v4259_v46 = vpop.eup %4258 }
 0xe49   :  { %v2803_v40 = vadd.f32 %v2802_v34, %v2008_v15  ;;  %v2805_v49 = vsub.f32 1.0, %v4259_v46  ;;  %v2807_v61 = vmul.f32 %v4259_v46, %v5464_v3  ;;  %v5647_v34 = vld [vmem:[#allocation15_spill] sm:$0xff] }
 0xe4b   :  { %4260 = vtanh.f32 %v2803_v40  ;;  %v2013_v40 = vadd.f32 %v5647_v34, %v5273_v54 }
 0xe58   :  { %v4261_v59 = vpop.eup %4260 }
 0xe59   :  { %v2806_v7 = vmul.f32 %v4261_v59, %v2805_v49 }
 0xe5b   :  { %v5511_v58 = vadd.f32 %v2807_v61, %v2806_v7 }
 0xe5d   :  { %v2809_v33 = vpack.c.bf16 %v5511_v58, %v5511_v58 }
 0xe5f   :  { %2843 = vmatmul.mubr.bf16.vlgmr.msra.gmra.mxu0 %v2809_v33  ;;  %3893 = vmatmul.mubr.bf16.vlgmr.msra.gmra.mxu1 %v2809_v33 }
 0xe60   :  { %2915 = vmatpush1.bf16.msra.mxu0 %v4299_v19  ;;  %3897 = vmatpush3.bf16.msra.mxu1 %v4300_v25 }
 0xe61   :  { %2916 = vmatprep.subr.bf16.mxu0 %v4301_v30  ;;  %3898 = vmatprep.subr.bf16.mxu1 %v5629_v18 }
 0xe62   :  { %2946 = vmatprep.mubr.bf16.mxu0 %v5630_v63  ;;  %3912 = vmatprep.mubr.msk.bf16.mxu1 %vm4437_vm0, %v5629_v18  ;;  %v4308_v63 = vld [vmem:[#allocation9 + $0x60] ss:$12 sps:$4 sm:$0xff]  }
 0xe64   :  { %2917 = vmatpush1.bf16.msra.mxu0 %v4302_v16  ;;  %3899 = vmatpush3.bf16.msra.mxu1 %v4303_v62  ;;  %v4115_v16 = vld [vmem:[%s5614_s11 + $0x30] sm:$0xff]   ;;  %v3017_v62 = vpack.c.bf16 %v5323_v22, %v5276_v2  ;;  %v4118_v2 = vld [vmem:[%s5614_s11 + $0x18] sm:$0xff]  }
 0xe65   :  { %2918 = vmatprep.subr.bf16.mxu0 %v4304_v32  ;;  %3900 = vmatprep.subr.bf16.mxu1 %v5629_v18  ;;  %v4116_v32 = vld [vmem:[%s5614_s11 + $0x28] sm:$0xff]   ;;  %v4119_v22 = vld [vmem:[%s5614_s11 + $0x10] sm:$0xff]  }
 0xe68   :  { %2919 = vmatpush1.bf16.msra.mxu0 %v4305_v31  ;;  %3901 = vmatpush3.bf16.msra.mxu1 %v4306_v48  ;;  %v4117_v31 = vld [vmem:[%s5614_s11 + $0x20] sm:$0xff]   ;;  %v4120_v48 = vld [vmem:[%s5614_s11 + $0x8] sm:$0xff]  }
 0xe69   :  { %2920 = vmatprep.subr.bf16.mxu0 %v4307_v35  ;;  %3902 = vmatprep.subr.bf16.mxu1 %v5629_v18  ;;  %v4121_v35 = vld [vmem:[%s5614_s11] sm:$0xff]  }
 0xe6c   :  { %2921 = vmatpush1.bf16.msra.mxu0 %v4308_v63  ;;  %3903 = vmatpush3.bf16.msra.mxu1 %v4309_v36  ;;  %v3018_v63 = vpack.c.bf16 %v5417_v51, %v5370_v27  ;;  %v3019_v36 = vpack.c.bf16 %v5511_v58, %v5464_v3 }
 0xe6d   :  { %2922 = vmatprep.subr.bf16.mxu0 %v4310_v56  ;;  %3904 = vmatprep.subr.bf16.mxu1 %v5629_v18  ;;  %v5648_v56 = vld [vmem:[#allocation13_spill] sm:$0xff] }
 0xe70   :  { %2923 = vmatpush1.bf16.msra.mxu0 %v4311_v23  ;;  %3905 = vmatpush3.bf16.msra.mxu1 %v4312_v0  ;;  %v1950_v23 = vadd.f32 %v5648_v56, %v5249_v60 }
 0xe71   :  { %2924 = vmatprep.subr.bf16.mxu0 %v4313_v21  ;;  %3906 = vmatprep.subr.bf16.mxu1 %v5629_v18 }
 0xe74   :  { %2925 = vmatpush1.bf16.msra.mxu0 %v4314_v4  ;;  %3907 = vmatpush3.bf16.msra.mxu1 %v4315_v47 }
 0xe75   :  { %2926 = vmatprep.subr.bf16.mxu0 %v4316_v44  ;;  %3908 = vmatprep.subr.bf16.mxu1 %v5629_v18 }
 0xe78   :  { %2927 = vmatpush1.bf16.msra.mxu0 %v4317_v53  ;;  %3909 = vmatpush3.bf16.msra.mxu1 %v4318_v45 }
 0xe79   :  { %2928 = vmatprep.subr.bf16.mxu0 %v4319_v50  ;;  %3910 = vmatprep.subr.bf16.mxu1 %v5629_v18 }
 0xe7c   :  { %2929 = vmatpush1.bf16.msra.mxu0 %v4320_v37  ;;  %3911 = vmatpush3.bf16.msra.mxu1 %v4321_v55  ;;  %v5649_v37 = vld [vmem:[#allocation18_spill] sm:$0xff] }
 0xe7d   :  { %3916 = vmatprep.subr.bf16.mxu0 %v4114_v5  ;;  %v1952_v55 = vadd.f32 %v5649_v37, %v5262_v29 }
 0xf1f   :  { %v2844_v52 = vpop.f32.mrf.mxu0  ;;  %v2885_v17 = vpop.f32.mrf.mxu1 }
 0xf20   :  { %v2891_v1 = vadd.f32 %v2844_v52, %v1946_v43  ;;  %v2905_v26 = vadd.f32 %v5268_v38, %v2885_v17  ;;  %v3330_v43 = vld [vmem:[%s5615_s12] ss:$0 sm:$0xff] }
 0xf21   :  { %v2846_v8 = vpop.f32.mrf.mxu0  ;;  %v3894_v9 = vpop.f32.mrf.mxu1 }
 0xf22   :  { %v3326_v10 = vmul.f32 -1.442695, %v2891_v1  ;;  %v2898_v39 = vadd.f32 %v2846_v8, %v1948_v13 }
 0xf23   :  { %v2848_v11 = vpop.f32.mrf.mxu0  ;;  %v2888_v18 = vpop.f32.mrf.mxu1 }
 0xf24   :  { %4262 = vpow2.f32 %v3326_v10  ;;  %v3327_v14 = vmul.f32 -1.442695, %v2898_v39  ;;  %v5650_v10 = vld [vmem:[#allocation17_spill] sm:$0xff] }
 0xf25   :  { %v2849_v57 = vpop.f32.mrf.mxu0  ;;  %v3895_v6 = vpop.f32.mrf.mxu1  ;;  %v2016_v11 = vadd.f32 %v5650_v10, %v5273_v54 }
 0xf26   :  { %4264 = vpow2.f32 %v3327_v14 }
 0xf31   :  { %v4263_v28 = vpop.eup %4262 }
 0xf32   :  { %v2895_v41 = vadd.f32 1.0, %v4263_v28 }
 0xf33   :  { %v4265_v42 = vpop.eup %4264 }
 0xf34   :  { %4266 = vrcp.f32 %v2895_v41  ;;  %v2902_v20 = vadd.f32 1.0, %v4265_v42 }
 0xf36   :  { %4268 = vrcp.f32 %v2902_v20 }
 0xf41   :  { %v4267_v15 = vpop.eup %4266 }
 0xf42   :  { %v2906_v46 = vmul.f32 %v4267_v15, %v2905_v26 }
 0xf43   :  { %v4269_v59 = vpop.eup %4268 }
 0xf44   :  { %v2907_v49 = vadd.f32 %v2906_v46, %v2013_v40  ;;  %v2909_v7 = vsub.f32 1.0, %v4269_v59  ;;  %v2911_v19 = vmul.f32 %v4269_v59, %v5511_v58 }
 0xf46   :  { %4270 = vtanh.f32 %v2907_v49 }
 0xf53   :  { %v4271_v61 = vpop.eup %4270 }
 0xf54   :  { %v2910_v33 = vmul.f32 %v4271_v61, %v2909_v7 }
 0xf56   :  { %v5536_v25 = vadd.f32 %v2911_v19, %v2910_v33 }
 0xf58   :  { %v2913_v30 = vpack.c.bf16 %v5536_v25, %v5536_v25 }
 0xf5a   :  { %2947 = vmatmul.mubr.bf16.vlgmr.msra.gmra.mxu0 %v2913_v30  ;;  %3913 = vmatmul.mubr.bf16.vlgmr.msra.gmra.mxu1 %v2913_v30 }
 0xf5b   :  { %3917 = vmatpush3.bf16.msra.mxu0 %v4114_v5  ;;  %3932 = vmatprep.mubr.bf16.mxu0 %v3017_v62 }
 0xf5c   :  { %3918 = vmatprep.subr.bf16.mxu0 %v4115_v16 }
 0xf5f   :  { %3919 = vmatpush3.bf16.msra.mxu0 %v4115_v16 }
 0xf60   :  { %3920 = vmatprep.subr.bf16.mxu0 %v4116_v32 }
 0xf63   :  { %3921 = vmatpush3.bf16.msra.mxu0 %v4116_v32 }
 0xf64   :  { %3922 = vmatprep.subr.bf16.mxu0 %v4117_v31 }
 0xf67   :  { %3923 = vmatpush3.bf16.msra.mxu0 %v4117_v31 }
 0xf68   :  { %3924 = vmatprep.subr.bf16.mxu0 %v4118_v2 }
 0xf6b   :  { %3925 = vmatpush3.bf16.msra.mxu0 %v4118_v2 }
 0xf6c   :  { %3926 = vmatprep.subr.bf16.mxu0 %v4119_v22 }
 0xf6f   :  { %3927 = vmatpush3.bf16.msra.mxu0 %v4119_v22 }
 0xf70   :  { %3928 = vmatprep.subr.bf16.mxu0 %v4120_v48 }
 0xf73   :  { %3929 = vmatpush3.bf16.msra.mxu0 %v4120_v48 }
 0xf74   :  { %3930 = vmatprep.subr.bf16.mxu0 %v4121_v35 }
 0xf77   :  { %3931 = vmatpush3.bf16.msra.mxu0 %v4121_v35 }
 0xf7a   :  { %3933 = vmatmul.mubr.bf16.vlgmr.msra.gmra.mxu0 %v3018_v63 }
 0xf7b   :  { %3936 = vmatprep.mubr.bf16.mxu0 %v3019_v36 }
0x101a   :  { %v2948_v0 = vpop.f32.mrf.mxu0  ;;  %v2989_v21 = vpop.f32.mrf.mxu1 }
0x101b   :  { %v2995_v4 = vadd.f32 %v2948_v0, %v1950_v23  ;;  %v3009_v1 = vadd.f32 %v5268_v38, %v2989_v21 }
0x101c   :  { %v2950_v47 = vpop.f32.mrf.mxu0  ;;  %v3914_v44 = vpop.f32.mrf.mxu1 }
0x101d   :  { %v3328_v53 = vmul.f32 -1.442695, %v2995_v4  ;;  %v3002_v3 = vadd.f32 %v2950_v47, %v1952_v55 }
0x101e   :  { %v2952_v45 = vpop.f32.mrf.mxu0  ;;  %v2992_v50 = vpop.f32.mrf.mxu1 }
0x101f   :  { %4272 = vpow2.f32 %v3328_v53  ;;  %v3329_v58 = vmul.f32 -1.442695, %v3002_v3 }
0x1020   :  { %v2953_v27 = vpop.f32.mrf.mxu0  ;;  %v3915_v51 = vpop.f32.mrf.mxu1 }
0x1021   :  { %4274 = vpow2.f32 %v3329_v58 }
0x102c   :  { %v4273_v5 = vpop.eup %4272 }
0x102d   :  { %v2999_v24 = vadd.f32 1.0, %v4273_v5 }
0x102e   :  { %v4275_v60 = vpop.eup %4274 }
0x102f   :  { %4276 = vrcp.f32 %v2999_v24  ;;  %v3006_v52 = vadd.f32 1.0, %v4275_v60 }
0x1031   :  { %4278 = vrcp.f32 %v3006_v52 }
0x103a   :  { %v3934_v17 = vpop.f32.mrf.mxu0 }
0x103b   :  { %v3135_v8 = vadd.f32 %v3934_v17, %v3330_v43 }
0x103c   :  { %v4277_v29 = vpop.eup %4276  ;;  %v3126_v9 = vpop.f32.mrf.mxu0 }
0x103d   :  { %v3010_v18 = vmul.f32 %v4277_v29, %v3009_v1  ;;  %3159 = vst [vmem:[%s5616_s13 + $0x10] sm:$0xff] %v3135_v8  ;;  %v3127_v12 = vadd.f32 %v3330_v43, %v3126_v9 }
0x103e   :  { %v3935_v13 = vpop.f32.mrf.mxu0  ;;  %v4279_v39 = vpop.eup %4278 }
0x103f   :  { %v3011_v57 = vadd.f32 %v3010_v18, %v2016_v11  ;;  %3157 = vst [vmem:[%s5616_s13] sm:$0xff] %v3127_v12  ;;  %v3138_v38 = vadd.f32 %v3935_v13, %v3330_v43  ;;  %v3013_v14 = vsub.f32 1.0, %v4279_v39  ;;  %v3015_v42 = vmul.f32 %v4279_v39, %v5536_v25 }
0x1040   :  { %v3129_v6 = vpop.f32.mrf.mxu0 }
0x1041   :  { %4280 = vtanh.f32 %v3011_v57  ;;  %3160 = vst [vmem:[%s5616_s13 + $0x18] sm:$0xff] %v3138_v38  ;;  %v3130_v54 = vadd.f32 %v3330_v43, %v3129_v6 }
0x1043   :  { %3158 = vst [vmem:[%s5616_s13 + $0x8] sm:$0xff] %v3130_v54 }
0x104e   :  { %v4281_v28 = vpop.eup %4280 }
0x104f   :  { %v3014_v41 = vmul.f32 %v4281_v28, %v3013_v14 }
0x1051   :  { %v3016_v20 = vadd.f32 %v3015_v42, %v3014_v41 }
0x1053   :  { %v3020_v26 = vpack.c.bf16 %v3016_v20, %v5536_v25 }
0x1055   :  { %3937 = vmatmul.mubr.bf16.gmra.mxu0 %v3020_v26 }
0x1115   :  { %v3938_v15 = vpop.f32.mrf.mxu0 }
0x1116   :  { %v3151_v34 = vadd.f32 %v3938_v15, %v3330_v43 }
0x1117   :  { %v3142_v40 = vpop.f32.mrf.mxu0 }
0x1118   :  { %3163 = vst [vmem:[%s5616_s13 + $0x30] sm:$0xff] %v3151_v34  ;;  %v3143_v46 = vadd.f32 %v3330_v43, %v3142_v40 }
0x1119   :  { %v3939_v49 = vpop.f32.mrf.mxu0 }
0x111a   :  { %3161 = vst [vmem:[%s5616_s13 + $0x20] sm:$0xff] %v3143_v46  ;;  %v3154_v59 = vadd.f32 %v3939_v49, %v3330_v43 }
0x111b   :  { %v3145_v7 = vpop.f32.mrf.mxu0 }
0x111c   :  { %3164 = vst [vmem:[%s5616_s13 + $0x38] sm:$0xff] %v3154_v59  ;;  %v3146_v61 = vadd.f32 %v3330_v43, %v3145_v7 }
0x111e   :  { %3162 = vst [vmem:[%s5616_s13 + $0x28] sm:$0xff] %v3146_v61 }
0x111f   :  { %3169 = vsyncpa [#allocation3], 1 }
0x1120   :  { %3170 = vsyncpa [#allocation5], 1 }
0x1121   :  { %3171 = vsyncpa [#allocation8], 1 }

</bundles_post_ra>
